<compile_context>
chip_gen: v6e
topology: v6e:2x2x1
jax: 0.10.0
libtpu: 0.0.40
codegen_flags: <defaults>
</compile_context>

<pallas_src>
import functools
import math

import jax
import jax.numpy as jnp
from jax import lax
from jax.experimental import pallas as pl
from jax.experimental.pallas import tpu as pltpu


LANE_PAD = 128  # pad classifier output columns to one full 128-lane tile


# ------------------------------ Pallas kernel ------------------------------ #
def bert_forward_kernel(emb_ref, mask_ref,
                        emb_g_ref, emb_b_ref,
                        qkv_w_ref, qkv_b_ref,
                        ao_w_ref, ao_b_ref, ao_g_ref, ao_bb_ref,
                        ff1_w_ref, ff1_b_ref,
                        ff2_w_ref, ff2_b_ref,
                        out_g_ref, out_bb_ref,
                        pool_w_ref, pool_b_ref,
                        cls_w_ref, cls_b_ref,
                        logits_ref,
                        ctx_ref,
                        *, num_layers, num_heads, head_dim, batch, seq, scale):
    """Entire BERT-pair forward for the whole (tiny) batch in one kernel."""
    H = num_heads * head_dim

    def layer_norm(x, g, b):
        mu = jnp.mean(x, axis=-1, keepdims=True)
        var = jnp.mean(jnp.square(x - mu), axis=-1, keepdims=True)
        return (x - mu) * lax.rsqrt(var + 1e-12) * g + b

    def dense(x, w, b):
        # Weights are already bf16 (pre-cast on host); only activations are cast.
        return (jnp.dot(x.astype(jnp.bfloat16), w,
                        preferred_element_type=jnp.float32) + b)

    mask = mask_ref[...]                                        # (B, L) additive
    # ---- embedding LayerNorm on flattened rows ----
    h = layer_norm(emb_ref[...], emb_g_ref[...], emb_b_ref[...])    # (B*L, H) f32

    for l in range(num_layers):                                 # static unroll
        # ---- fused QKV projection: ONE (B*L,H) x (H,3H) MXU pass ----
        qkv = dense(h, qkv_w_ref[l], qkv_b_ref[l])              # (B*L, 3H) f32

        # ---- multi-head attention; context heads are written lane-contiguously
        #      into ctx_ref so the output projection is a single K=H matmul ----
        for b in range(batch):                                  # static (B small)
            r0 = b * seq
            qkv_b_blk = qkv[r0:r0 + seq, :]                     # (L, 3H)
            m = mask[b:b + 1, :]                                # (1, L)
            for hd in range(num_heads):                         # static (nH small)
                lo = hd * head_dim
                q = qkv_b_blk[:, lo:lo + head_dim]              # (L, dH)
                k = qkv_b_blk[:, H + lo:H + lo + head_dim]
                v = qkv_b_blk[:, 2 * H + lo:2 * H + lo + head_dim]
                # contract last axes of q and k (no XLU transpose)
                s = lax.dot_general(q, k, (((1,), (1,)), ((), ())),
                                    preferred_element_type=jnp.float32) * scale + m
                s = s - jnp.max(s, axis=-1, keepdims=True)
                p = jnp.exp(s)
                p = p * pl.reciprocal(jnp.sum(p, axis=-1, keepdims=True),
                                      approx=True)
                ctx_ref[r0:r0 + seq, lo:lo + head_dim] = jnp.dot(
                    p, v, preferred_element_type=jnp.float32)   # (L, dH)

        # ---- output projection (single matmul) + add & LayerNorm ----
        attn_out = dense(ctx_ref[...], ao_w_ref[l], ao_b_ref[l])    # (B*L, H)
        h1 = layer_norm(attn_out + h, ao_g_ref[l], ao_bb_ref[l])

        # ---- feed-forward (exact erf GELU, matches HF BERT) + add & LN ----
        inter = dense(h1, ff1_w_ref[l], ff1_b_ref[l])
        inter = 0.5 * inter * (1.0 + lax.erf(inter * 0.7071067811865476))
        ffo = dense(inter, ff2_w_ref[l], ff2_b_ref[l])
        h = layer_norm(ffo + h1, out_g_ref[l], out_bb_ref[l])

    # ---- pooler ([CLS] row per batch element) + classifier (padded lanes) ----
    for b in range(batch):
        cls_row = h[b * seq:b * seq + 1, :]                     # (1, H)
        pooled = jnp.tanh(dense(cls_row, pool_w_ref[...], pool_b_ref[...]))
        logits_ref[b:b + 1, :] = dense(pooled, cls_w_ref[...], cls_b_ref[...])


# ------------------------------ kernel wrapper ------------------------------ #
def pallas_bert_forward(emb2d, addmask, pk, cfg):
    B, L = addmask.shape
    H, I, NL = cfg.hidden, cfg.intermediate, cfg.layers
    dH = H // cfg.heads
    kernel = functools.partial(
        bert_forward_kernel, num_layers=NL, num_heads=cfg.heads, head_dim=dH,
        batch=B, seq=L, scale=1.0 / math.sqrt(dH))

    def full(shape):
        n = len(shape)
        # whole-array block, resident in VMEM for the single grid step
        return pl.BlockSpec(shape, lambda i: (0,) * n)

    return pl.pallas_call(
        kernel,
        out_shape=jax.ShapeDtypeStruct((B, LANE_PAD), jnp.float32),
        grid=(1,),
        in_specs=[
            full((B * L, H)), full((B, L)),
            full((1, H)), full((1, H)),
            full((NL, H, 3 * H)), full((NL, 1, 3 * H)),
            full((NL, H, H)), full((NL, 1, H)), full((NL, 1, H)), full((NL, 1, H)),
            full((NL, H, I)), full((NL, 1, I)),
            full((NL, I, H)), full((NL, 1, H)),
            full((NL, 1, H)), full((NL, 1, H)),
            full((H, H)), full((1, H)),
            full((H, LANE_PAD)), full((1, LANE_PAD)),
        ],
        out_specs=full((B, LANE_PAD)),
        scratch_shapes=[pltpu.VMEM((B * L, H), jnp.float32)],   # attention ctx
        compiler_params=pltpu.CompilerParams(
            dimension_semantics=("arbitrary",),
            vmem_limit_bytes=32 * 1024 * 1024),
    )(emb2d, addmask,
      pk["emb_ln_g"], pk["emb_ln_b"],
      pk["qkv_w"], pk["qkv_b"],
      pk["ao_w"], pk["ao_b"], pk["ao_ln_g"], pk["ao_ln_b"],
      pk["ff1_w"], pk["ff1_b"],
      pk["ff2_w"], pk["ff2_b"],
      pk["out_ln_g"], pk["out_ln_b"],
      pk["pool_w"], pk["pool_b"],
      pk["cls_w"], pk["cls_b"])


# ------------------------------ model (glue) -------------------------------- #
class Config:
    vocab = 100
    hidden = 32
    heads = 4
    layers = 2
    intermediate = 64
    max_pos = 16
    type_vocab = 2
    num_labels = 2


def init_params(key, cfg):
    def norm(key, shape):
        return 0.02 * jax.random.normal(key, shape, dtype=jnp.float32)

    keys = iter(jax.random.split(key, 8 + cfg.layers * 8))
    p = {
        "word_emb": norm(next(keys), (cfg.vocab, cfg.hidden)),
        "pos_emb": norm(next(keys), (cfg.max_pos, cfg.hidden)),
        "type_emb": norm(next(keys), (cfg.type_vocab, cfg.hidden)),
        "emb_ln_g": jnp.ones((cfg.hidden,), jnp.float32),
        "emb_ln_b": jnp.zeros((cfg.hidden,), jnp.float32),
        "pool_w": norm(next(keys), (cfg.hidden, cfg.hidden)),
        "pool_b": jnp.zeros((cfg.hidden,), jnp.float32),
        "cls_w": norm(next(keys), (cfg.hidden, cfg.num_labels)),
        "cls_b": jnp.zeros((cfg.num_labels,), jnp.float32),
        "layers": [],
    }
    for _ in range(cfg.layers):
        lp = {
            "q_w": norm(next(keys), (cfg.hidden, cfg.hidden)),
            "q_b": jnp.zeros((cfg.hidden,), jnp.float32),
            "k_w": norm(next(keys), (cfg.hidden, cfg.hidden)),
            "k_b": jnp.zeros((cfg.hidden,), jnp.float32),
            "v_w": norm(next(keys), (cfg.hidden, cfg.hidden)),
            "v_b": jnp.zeros((cfg.hidden,), jnp.float32),
            "ao_w": norm(next(keys), (cfg.hidden, cfg.hidden)),
            "ao_b": jnp.zeros((cfg.hidden,), jnp.float32),
            "ao_ln_g": jnp.ones((cfg.hidden,), jnp.float32),
            "ao_ln_b": jnp.zeros((cfg.hidden,), jnp.float32),
            "ff1_w": norm(next(keys), (cfg.hidden, cfg.intermediate)),
            "ff1_b": jnp.zeros((cfg.intermediate,), jnp.float32),
            "ff2_w": norm(next(keys), (cfg.intermediate, cfg.hidden)),
            "ff2_b": jnp.zeros((cfg.hidden,), jnp.float32),
            "out_ln_g": jnp.ones((cfg.hidden,), jnp.float32),
            "out_ln_b": jnp.zeros((cfg.hidden,), jnp.float32),
        }
        p["layers"].append(lp)
    return p


def prepare_packed_params(params, cfg):
    """One-time host-side packing: fuse QKV, stack per-layer weights, cast
    matmul weights to bf16, pad the classifier to a 128-lane output."""
    H = cfg.hidden
    L = params["layers"]
    row = lambda v: v.reshape(1, -1)
    stack_w = lambda name: jnp.stack([lp[name] for lp in L]).astype(jnp.bfloat16)
    stack_row = lambda name: jnp.stack([row(lp[name]) for lp in L])

    cls_w_pad = jnp.zeros((H, LANE_PAD), jnp.float32)
    cls_w_pad = cls_w_pad.at[:, :cfg.num_labels].set(params["cls_w"])
    cls_b_pad = jnp.zeros((1, LANE_PAD), jnp.float32)
    cls_b_pad = cls_b_pad.at[0, :cfg.num_labels].set(params["cls_b"])

    return {
        "word_emb": params["word_emb"],
        "pos_emb": params["pos_emb"],
        "type_emb": params["type_emb"],
        "emb_ln_g": row(params["emb_ln_g"]),
        "emb_ln_b": row(params["emb_ln_b"]),
        "qkv_w": jnp.stack([jnp.concatenate([lp["q_w"], lp["k_w"], lp["v_w"]],
                                            axis=1) for lp in L]).astype(jnp.bfloat16),
        "qkv_b": jnp.stack([jnp.concatenate([lp["q_b"], lp["k_b"],
                                             lp["v_b"]]).reshape(1, -1)
                            for lp in L]),
        "ao_w": stack_w("ao_w"),
        "ao_b": stack_row("ao_b"),
        "ao_ln_g": stack_row("ao_ln_g"),
        "ao_ln_b": stack_row("ao_ln_b"),
        "ff1_w": stack_w("ff1_w"),
        "ff1_b": stack_row("ff1_b"),
        "ff2_w": stack_w("ff2_w"),
        "ff2_b": stack_row("ff2_b"),
        "out_ln_g": stack_row("out_ln_g"),
        "out_ln_b": stack_row("out_ln_b"),
        "pool_w": params["pool_w"].astype(jnp.bfloat16),
        "pool_b": row(params["pool_b"]),
        "cls_w": cls_w_pad.astype(jnp.bfloat16),
        "cls_b": cls_b_pad,
    }


def bert_pair_encoder_forward(pk, word, seg, mask, cfg):
    B, L = word.shape
    H = cfg.hidden

    # ---- embedding gathers stay in XLA (table-lookup glue) ----
    pos = jnp.arange(L, dtype=jnp.int32)
    emb = (jnp.take(pk["word_emb"], word, axis=0)
           + jnp.take(pk["pos_emb"], pos, axis=0)[None, :, :]
           + jnp.take(pk["type_emb"], seg, axis=0))

    # HF-style additive attention mask: (1 - mask) * -10000
    addmask = (1.0 - mask.astype(jnp.float32)) * -10000.0       # [B, L]

    # ---- everything else is ONE fused Pallas kernel ----
    logits_pad = pallas_bert_forward(emb.reshape(B * L, H), addmask, pk, cfg)
    return logits_pad[:, :cfg.num_labels]   # == bert(...)[0] of BertForSequenceClassification


# --------------------------------- main ------------------------------------- #
if __name__ == "__main__":
    cfg = Config()
    B, L = 2, 8

    key = jax.random.PRNGKey(0)
    k_param, k_word, k_seg = jax.random.split(key, 3)

    params = init_params(k_param, cfg)
    packed = prepare_packed_params(params, cfg)   # one-time bf16 / fuse / stack

    word = jax.random.randint(k_word, (B, L), 0, cfg.vocab, dtype=jnp.int32)
    seg = jax.random.randint(k_seg, (B, L), 0, cfg.type_vocab, dtype=jnp.int32)
    mask = jnp.array([[1, 1, 1, 1, 1, 1, 1, 1],
                      [1, 1, 1, 1, 1, 0, 0, 0]], dtype=jnp.int32)

    fwd = jax.jit(lambda p, w, s, m: bert_pair_encoder_forward(p, w, s, m, cfg))
    logits = jax.block_until_ready(fwd(packed, word, seg, mask))
    assert logits.shape == (B, cfg.num_labels)
    assert bool(jnp.all(jnp.isfinite(logits)))
    print("KERNEL_OK")
</pallas_src>

<mosaic_0001>
module attributes {stable_mosaic.version = 11 : i64} {
  func.func @bert_forward_kernel(%arg0: i32, %arg1: memref<16x32xf32, #tpu.memory_space<vmem>>, %arg2: memref<2x8xf32, #tpu.memory_space<vmem>>, %arg3: memref<1x32xf32, #tpu.memory_space<vmem>>, %arg4: memref<1x32xf32, #tpu.memory_space<vmem>>, %arg5: memref<2x32x96xbf16, #tpu.memory_space<vmem>>, %arg6: memref<2x1x96xf32, #tpu.memory_space<vmem>>, %arg7: memref<2x32x32xbf16, #tpu.memory_space<vmem>>, %arg8: memref<2x1x32xf32, #tpu.memory_space<vmem>>, %arg9: memref<2x1x32xf32, #tpu.memory_space<vmem>>, %arg10: memref<2x1x32xf32, #tpu.memory_space<vmem>>, %arg11: memref<2x32x64xbf16, #tpu.memory_space<vmem>>, %arg12: memref<2x1x64xf32, #tpu.memory_space<vmem>>, %arg13: memref<2x64x32xbf16, #tpu.memory_space<vmem>>, %arg14: memref<2x1x32xf32, #tpu.memory_space<vmem>>, %arg15: memref<2x1x32xf32, #tpu.memory_space<vmem>>, %arg16: memref<2x1x32xf32, #tpu.memory_space<vmem>>, %arg17: memref<32x32xbf16, #tpu.memory_space<vmem>>, %arg18: memref<1x32xf32, #tpu.memory_space<vmem>>, %arg19: memref<32x128xbf16, #tpu.memory_space<vmem>>, %arg20: memref<1x128xf32, #tpu.memory_space<vmem>>, %arg21: memref<2x128xf32, #tpu.memory_space<vmem>>, %arg22: memref<16x32xf32, #tpu.memory_space<vmem>>) attributes {dimension_semantics = [#tpu.dimension_semantics<arbitrary>], iteration_bounds = array<i64: 1>, scalar_prefetch = 0 : i64, scratch_operands = 1 : i64, tpu.core_type = #tpu.core_type<tc>, window_params = [{pipeline_mode = #tpu.pipeline_mode<synchronous>, transform_indices = @transform_0, window_bounds = array<i64: 16, 32>}, {pipeline_mode = #tpu.pipeline_mode<synchronous>, transform_indices = @transform_1, window_bounds = array<i64: 2, 8>}, {pipeline_mode = #tpu.pipeline_mode<synchronous>, transform_indices = @transform_2, window_bounds = array<i64: 1, 32>}, {pipeline_mode = #tpu.pipeline_mode<synchronous>, transform_indices = @transform_3, window_bounds = array<i64: 1, 32>}, {pipeline_mode = #tpu.pipeline_mode<synchronous>, transform_indices = @transform_4, window_bounds = array<i64: 2, 32, 96>}, {pipeline_mode = #tpu.pipeline_mode<synchronous>, transform_indices = @transform_5, window_bounds = array<i64: 2, 1, 96>}, {pipeline_mode = #tpu.pipeline_mode<synchronous>, transform_indices = @transform_6, window_bounds = array<i64: 2, 32, 32>}, {pipeline_mode = #tpu.pipeline_mode<synchronous>, transform_indices = @transform_7, window_bounds = array<i64: 2, 1, 32>}, {pipeline_mode = #tpu.pipeline_mode<synchronous>, transform_indices = @transform_8, window_bounds = array<i64: 2, 1, 32>}, {pipeline_mode = #tpu.pipeline_mode<synchronous>, transform_indices = @transform_9, window_bounds = array<i64: 2, 1, 32>}, {pipeline_mode = #tpu.pipeline_mode<synchronous>, transform_indices = @transform_10, window_bounds = array<i64: 2, 32, 64>}, {pipeline_mode = #tpu.pipeline_mode<synchronous>, transform_indices = @transform_11, window_bounds = array<i64: 2, 1, 64>}, {pipeline_mode = #tpu.pipeline_mode<synchronous>, transform_indices = @transform_12, window_bounds = array<i64: 2, 64, 32>}, {pipeline_mode = #tpu.pipeline_mode<synchronous>, transform_indices = @transform_13, window_bounds = array<i64: 2, 1, 32>}, {pipeline_mode = #tpu.pipeline_mode<synchronous>, transform_indices = @transform_14, window_bounds = array<i64: 2, 1, 32>}, {pipeline_mode = #tpu.pipeline_mode<synchronous>, transform_indices = @transform_15, window_bounds = array<i64: 2, 1, 32>}, {pipeline_mode = #tpu.pipeline_mode<synchronous>, transform_indices = @transform_16, window_bounds = array<i64: 32, 32>}, {pipeline_mode = #tpu.pipeline_mode<synchronous>, transform_indices = @transform_17, window_bounds = array<i64: 1, 32>}, {pipeline_mode = #tpu.pipeline_mode<synchronous>, transform_indices = @transform_18, window_bounds = array<i64: 32, 128>}, {pipeline_mode = #tpu.pipeline_mode<synchronous>, transform_indices = @transform_19, window_bounds = array<i64: 1, 128>}, {pipeline_mode = #tpu.pipeline_mode<synchronous>, transform_indices = @transform_20, window_bounds = array<i64: 2, 128>}]} {
    %c0 = arith.constant 0 : index
    %c0_0 = arith.constant 0 : index
    %0 = vector.load %arg2[%c0, %c0_0] : memref<2x8xf32, #tpu.memory_space<vmem>>, vector<2x8xf32>
    %c0_1 = arith.constant 0 : index
    %c0_2 = arith.constant 0 : index
    %1 = vector.load %arg1[%c0_1, %c0_2] : memref<16x32xf32, #tpu.memory_space<vmem>>, vector<16x32xf32>
    %c0_3 = arith.constant 0 : index
    %c0_4 = arith.constant 0 : index
    %2 = vector.load %arg3[%c0_3, %c0_4] : memref<1x32xf32, #tpu.memory_space<vmem>>, vector<1x32xf32>
    %c0_5 = arith.constant 0 : index
    %c0_6 = arith.constant 0 : index
    %3 = vector.load %arg4[%c0_5, %c0_6] : memref<1x32xf32, #tpu.memory_space<vmem>>, vector<1x32xf32>
    %cst = arith.constant dense<0.000000e+00> : vector<16xf32>
    %4 = vector.multi_reduction <add>, %1, %cst [1] : vector<16x32xf32> to vector<16xf32>
    %5 = vector.shape_cast %4 : vector<16xf32> to vector<16x1xf32>
    %cst_7 = arith.constant 3.200000e+01 : f32
    %6 = vector.broadcast %cst_7 : f32 to vector<16x1xf32>
    %7 = arith.divf %5, %6 : vector<16x1xf32>
    %8 = vector.broadcast %7 : vector<16x1xf32> to vector<16x32xf32>
    %9 = arith.subf %1, %8 : vector<16x32xf32>
    %10 = arith.mulf %9, %9 : vector<16x32xf32>
    %cst_8 = arith.constant dense<0.000000e+00> : vector<16xf32>
    %11 = vector.multi_reduction <add>, %10, %cst_8 [1] : vector<16x32xf32> to vector<16xf32>
    %12 = vector.shape_cast %11 : vector<16xf32> to vector<16x1xf32>
    %cst_9 = arith.constant 3.200000e+01 : f32
    %13 = vector.broadcast %cst_9 : f32 to vector<16x1xf32>
    %14 = arith.divf %12, %13 : vector<16x1xf32>
    %15 = vector.broadcast %7 : vector<16x1xf32> to vector<16x32xf32>
    %16 = arith.subf %1, %15 : vector<16x32xf32>
    %cst_10 = arith.constant 9.99999996E-13 : f32
    %17 = vector.broadcast %cst_10 : f32 to vector<16x1xf32>
    %18 = arith.addf %14, %17 : vector<16x1xf32>
    %19 = math.rsqrt %18 : vector<16x1xf32>
    %20 = vector.broadcast %19 : vector<16x1xf32> to vector<16x32xf32>
    %21 = arith.mulf %16, %20 : vector<16x32xf32>
    %22 = vector.broadcast %2 : vector<1x32xf32> to vector<16x32xf32>
    %23 = arith.mulf %21, %22 : vector<16x32xf32>
    %24 = vector.broadcast %3 : vector<1x32xf32> to vector<16x32xf32>
    %25 = arith.addf %23, %24 : vector<16x32xf32>
    %c0_11 = arith.constant 0 : index
    %c0_12 = arith.constant 0 : index
    %c0_13 = arith.constant 0 : index
    %26 = vector.load %arg5[%c0_11, %c0_12, %c0_13] : memref<2x32x96xbf16, #tpu.memory_space<vmem>>, vector<1x32x96xbf16>
    %27 = vector.shape_cast %26 : vector<1x32x96xbf16> to vector<32x96xbf16>
    %c0_14 = arith.constant 0 : index
    %c0_15 = arith.constant 0 : index
    %c0_16 = arith.constant 0 : index
    %28 = vector.load %arg6[%c0_14, %c0_15, %c0_16] : memref<2x1x96xf32, #tpu.memory_space<vmem>>, vector<1x1x96xf32>
    %29 = vector.shape_cast %28 : vector<1x1x96xf32> to vector<1x96xf32>
    %30 = arith.truncf %25 : vector<16x32xf32> to vector<16x32xbf16>
    %cst_17 = arith.constant dense<0.000000e+00> : vector<16x96xf32>
    %31 = tpu.matmul %30, %27, %cst_17 {dimension_numbers = #tpu.dot_dimension_numbers<[1], [0], [0], [1], [0, 0, 1, 1], [], []>} : vector<16x32xbf16>, vector<32x96xbf16>, vector<16x96xf32> -> vector<16x96xf32>
    %32 = vector.broadcast %29 : vector<1x96xf32> to vector<16x96xf32>
    %33 = arith.addf %31, %32 : vector<16x96xf32>
    %34 = vector.extract_strided_slice %33 {offsets = [0, 0], sizes = [8, 96], strides = [1, 1]} : vector<16x96xf32> to vector<8x96xf32>
    %35 = vector.extract_strided_slice %0 {offsets = [0, 0], sizes = [1, 8], strides = [1, 1]} : vector<2x8xf32> to vector<1x8xf32>
    %36 = vector.extract_strided_slice %34 {offsets = [0, 0], sizes = [8, 8], strides = [1, 1]} : vector<8x96xf32> to vector<8x8xf32>
    %37 = vector.extract_strided_slice %34 {offsets = [0, 32], sizes = [8, 8], strides = [1, 1]} : vector<8x96xf32> to vector<8x8xf32>
    %38 = vector.extract_strided_slice %34 {offsets = [0, 64], sizes = [8, 8], strides = [1, 1]} : vector<8x96xf32> to vector<8x8xf32>
    %cst_18 = arith.constant dense<0.000000e+00> : vector<8x8xf32>
    %39 = tpu.matmul %36, %37, %cst_18 {dimension_numbers = #tpu.dot_dimension_numbers<[1], [1], [0], [0], [0, 0, 1, 0], [], []>} : vector<8x8xf32>, vector<8x8xf32>, vector<8x8xf32> -> vector<8x8xf32>
    %cst_19 = arith.constant 0.353553385 : f32
    %40 = vector.broadcast %cst_19 : f32 to vector<8x8xf32>
    %41 = arith.mulf %39, %40 : vector<8x8xf32>
    %42 = vector.broadcast %35 : vector<1x8xf32> to vector<8x8xf32>
    %43 = arith.addf %41, %42 : vector<8x8xf32>
    %cst_20 = arith.constant dense<0xFF800000> : vector<8xf32>
    %44 = vector.multi_reduction <maximumf>, %43, %cst_20 [1] : vector<8x8xf32> to vector<8xf32>
    %45 = vector.shape_cast %44 : vector<8xf32> to vector<8x1xf32>
    %46 = vector.broadcast %45 : vector<8x1xf32> to vector<8x8xf32>
    %47 = arith.subf %43, %46 : vector<8x8xf32>
    %48 = math.exp %47 : vector<8x8xf32>
    %cst_21 = arith.constant dense<0.000000e+00> : vector<8xf32>
    %49 = vector.multi_reduction <add>, %48, %cst_21 [1] : vector<8x8xf32> to vector<8xf32>
    %50 = vector.shape_cast %49 : vector<8xf32> to vector<8x1xf32>
    %51 = tpu.reciprocal %50 {approx = true} : vector<8x1xf32> -> vector<8x1xf32>
    %52 = vector.broadcast %51 : vector<8x1xf32> to vector<8x8xf32>
    %53 = arith.mulf %48, %52 : vector<8x8xf32>
    %cst_22 = arith.constant dense<0.000000e+00> : vector<8x8xf32>
    %54 = tpu.matmul %53, %38, %cst_22 {dimension_numbers = #tpu.dot_dimension_numbers<[1], [0], [0], [1], [0, 0, 1, 1], [], []>} : vector<8x8xf32>, vector<8x8xf32>, vector<8x8xf32> -> vector<8x8xf32>
    %c0_23 = arith.constant 0 : index
    %c0_24 = arith.constant 0 : index
    %55 = vector.load %arg22[%c0_23, %c0_24] : memref<16x32xf32, #tpu.memory_space<vmem>>, vector<8x8xf32>
    tpu.vector_store %arg22[%c0_23, %c0_24], %54 {strides = array<i32>} : memref<16x32xf32, #tpu.memory_space<vmem>>, vector<8x8xf32>,
    %56 = vector.extract_strided_slice %34 {offsets = [0, 8], sizes = [8, 8], strides = [1, 1]} : vector<8x96xf32> to vector<8x8xf32>
    %57 = vector.extract_strided_slice %34 {offsets = [0, 40], sizes = [8, 8], strides = [1, 1]} : vector<8x96xf32> to vector<8x8xf32>
    %58 = vector.extract_strided_slice %34 {offsets = [0, 72], sizes = [8, 8], strides = [1, 1]} : vector<8x96xf32> to vector<8x8xf32>
    %cst_25 = arith.constant dense<0.000000e+00> : vector<8x8xf32>
    %59 = tpu.matmul %56, %57, %cst_25 {dimension_numbers = #tpu.dot_dimension_numbers<[1], [1], [0], [0], [0, 0, 1, 0], [], []>} : vector<8x8xf32>, vector<8x8xf32>, vector<8x8xf32> -> vector<8x8xf32>
    %cst_26 = arith.constant 0.353553385 : f32
    %60 = vector.broadcast %cst_26 : f32 to vector<8x8xf32>
    %61 = arith.mulf %59, %60 : vector<8x8xf32>
    %62 = vector.broadcast %35 : vector<1x8xf32> to vector<8x8xf32>
    %63 = arith.addf %61, %62 : vector<8x8xf32>
    %cst_27 = arith.constant dense<0xFF800000> : vector<8xf32>
    %64 = vector.multi_reduction <maximumf>, %63, %cst_27 [1] : vector<8x8xf32> to vector<8xf32>
    %65 = vector.shape_cast %64 : vector<8xf32> to vector<8x1xf32>
    %66 = vector.broadcast %65 : vector<8x1xf32> to vector<8x8xf32>
    %67 = arith.subf %63, %66 : vector<8x8xf32>
    %68 = math.exp %67 : vector<8x8xf32>
    %cst_28 = arith.constant dense<0.000000e+00> : vector<8xf32>
    %69 = vector.multi_reduction <add>, %68, %cst_28 [1] : vector<8x8xf32> to vector<8xf32>
    %70 = vector.shape_cast %69 : vector<8xf32> to vector<8x1xf32>
    %71 = tpu.reciprocal %70 {approx = true} : vector<8x1xf32> -> vector<8x1xf32>
    %72 = vector.broadcast %71 : vector<8x1xf32> to vector<8x8xf32>
    %73 = arith.mulf %68, %72 : vector<8x8xf32>
    %cst_29 = arith.constant dense<0.000000e+00> : vector<8x8xf32>
    %74 = tpu.matmul %73, %58, %cst_29 {dimension_numbers = #tpu.dot_dimension_numbers<[1], [0], [0], [1], [0, 0, 1, 1], [], []>} : vector<8x8xf32>, vector<8x8xf32>, vector<8x8xf32> -> vector<8x8xf32>
    %c0_30 = arith.constant 0 : index
    %c8 = arith.constant 8 : index
    %75 = vector.load %arg22[%c0_30, %c8] : memref<16x32xf32, #tpu.memory_space<vmem>>, vector<8x8xf32>
    tpu.vector_store %arg22[%c0_30, %c8], %74 {strides = array<i32>} : memref<16x32xf32, #tpu.memory_space<vmem>>, vector<8x8xf32>,
    %76 = vector.extract_strided_slice %34 {offsets = [0, 16], sizes = [8, 8], strides = [1, 1]} : vector<8x96xf32> to vector<8x8xf32>
    %77 = vector.extract_strided_slice %34 {offsets = [0, 48], sizes = [8, 8], strides = [1, 1]} : vector<8x96xf32> to vector<8x8xf32>
    %78 = vector.extract_strided_slice %34 {offsets = [0, 80], sizes = [8, 8], strides = [1, 1]} : vector<8x96xf32> to vector<8x8xf32>
    %cst_31 = arith.constant dense<0.000000e+00> : vector<8x8xf32>
    %79 = tpu.matmul %76, %77, %cst_31 {dimension_numbers = #tpu.dot_dimension_numbers<[1], [1], [0], [0], [0, 0, 1, 0], [], []>} : vector<8x8xf32>, vector<8x8xf32>, vector<8x8xf32> -> vector<8x8xf32>
    %cst_32 = arith.constant 0.353553385 : f32
    %80 = vector.broadcast %cst_32 : f32 to vector<8x8xf32>
    %81 = arith.mulf %79, %80 : vector<8x8xf32>
    %82 = vector.broadcast %35 : vector<1x8xf32> to vector<8x8xf32>
    %83 = arith.addf %81, %82 : vector<8x8xf32>
    %cst_33 = arith.constant dense<0xFF800000> : vector<8xf32>
    %84 = vector.multi_reduction <maximumf>, %83, %cst_33 [1] : vector<8x8xf32> to vector<8xf32>
    %85 = vector.shape_cast %84 : vector<8xf32> to vector<8x1xf32>
    %86 = vector.broadcast %85 : vector<8x1xf32> to vector<8x8xf32>
    %87 = arith.subf %83, %86 : vector<8x8xf32>
    %88 = math.exp %87 : vector<8x8xf32>
    %cst_34 = arith.constant dense<0.000000e+00> : vector<8xf32>
    %89 = vector.multi_reduction <add>, %88, %cst_34 [1] : vector<8x8xf32> to vector<8xf32>
    %90 = vector.shape_cast %89 : vector<8xf32> to vector<8x1xf32>
    %91 = tpu.reciprocal %90 {approx = true} : vector<8x1xf32> -> vector<8x1xf32>
    %92 = vector.broadcast %91 : vector<8x1xf32> to vector<8x8xf32>
    %93 = arith.mulf %88, %92 : vector<8x8xf32>
    %cst_35 = arith.constant dense<0.000000e+00> : vector<8x8xf32>
    %94 = tpu.matmul %93, %78, %cst_35 {dimension_numbers = #tpu.dot_dimension_numbers<[1], [0], [0], [1], [0, 0, 1, 1], [], []>} : vector<8x8xf32>, vector<8x8xf32>, vector<8x8xf32> -> vector<8x8xf32>
    %c0_36 = arith.constant 0 : index
    %c16 = arith.constant 16 : index
    %95 = vector.load %arg22[%c0_36, %c16] : memref<16x32xf32, #tpu.memory_space<vmem>>, vector<8x8xf32>
    tpu.vector_store %arg22[%c0_36, %c16], %94 {strides = array<i32>} : memref<16x32xf32, #tpu.memory_space<vmem>>, vector<8x8xf32>,
    %96 = vector.extract_strided_slice %34 {offsets = [0, 24], sizes = [8, 8], strides = [1, 1]} : vector<8x96xf32> to vector<8x8xf32>
    %97 = vector.extract_strided_slice %34 {offsets = [0, 56], sizes = [8, 8], strides = [1, 1]} : vector<8x96xf32> to vector<8x8xf32>
    %98 = vector.extract_strided_slice %34 {offsets = [0, 88], sizes = [8, 8], strides = [1, 1]} : vector<8x96xf32> to vector<8x8xf32>
    %cst_37 = arith.constant dense<0.000000e+00> : vector<8x8xf32>
    %99 = tpu.matmul %96, %97, %cst_37 {dimension_numbers = #tpu.dot_dimension_numbers<[1], [1], [0], [0], [0, 0, 1, 0], [], []>} : vector<8x8xf32>, vector<8x8xf32>, vector<8x8xf32> -> vector<8x8xf32>
    %cst_38 = arith.constant 0.353553385 : f32
    %100 = vector.broadcast %cst_38 : f32 to vector<8x8xf32>
    %101 = arith.mulf %99, %100 : vector<8x8xf32>
    %102 = vector.broadcast %35 : vector<1x8xf32> to vector<8x8xf32>
    %103 = arith.addf %101, %102 : vector<8x8xf32>
    %cst_39 = arith.constant dense<0xFF800000> : vector<8xf32>
    %104 = vector.multi_reduction <maximumf>, %103, %cst_39 [1] : vector<8x8xf32> to vector<8xf32>
    %105 = vector.shape_cast %104 : vector<8xf32> to vector<8x1xf32>
    %106 = vector.broadcast %105 : vector<8x1xf32> to vector<8x8xf32>
    %107 = arith.subf %103, %106 : vector<8x8xf32>
    %108 = math.exp %107 : vector<8x8xf32>
    %cst_40 = arith.constant dense<0.000000e+00> : vector<8xf32>
    %109 = vector.multi_reduction <add>, %108, %cst_40 [1] : vector<8x8xf32> to vector<8xf32>
    %110 = vector.shape_cast %109 : vector<8xf32> to vector<8x1xf32>
    %111 = tpu.reciprocal %110 {approx = true} : vector<8x1xf32> -> vector<8x1xf32>
    %112 = vector.broadcast %111 : vector<8x1xf32> to vector<8x8xf32>
    %113 = arith.mulf %108, %112 : vector<8x8xf32>
    %cst_41 = arith.constant dense<0.000000e+00> : vector<8x8xf32>
    %114 = tpu.matmul %113, %98, %cst_41 {dimension_numbers = #tpu.dot_dimension_numbers<[1], [0], [0], [1], [0, 0, 1, 1], [], []>} : vector<8x8xf32>, vector<8x8xf32>, vector<8x8xf32> -> vector<8x8xf32>
    %c0_42 = arith.constant 0 : index
    %c24 = arith.constant 24 : index
    %115 = vector.load %arg22[%c0_42, %c24] : memref<16x32xf32, #tpu.memory_space<vmem>>, vector<8x8xf32>
    tpu.vector_store %arg22[%c0_42, %c24], %114 {strides = array<i32>} : memref<16x32xf32, #tpu.memory_space<vmem>>, vector<8x8xf32>,
    %116 = vector.extract_strided_slice %33 {offsets = [8, 0], sizes = [8, 96], strides = [1, 1]} : vector<16x96xf32> to vector<8x96xf32>
    %117 = vector.extract_strided_slice %0 {offsets = [1, 0], sizes = [1, 8], strides = [1, 1]} : vector<2x8xf32> to vector<1x8xf32>
    %118 = vector.extract_strided_slice %116 {offsets = [0, 0], sizes = [8, 8], strides = [1, 1]} : vector<8x96xf32> to vector<8x8xf32>
    %119 = vector.extract_strided_slice %116 {offsets = [0, 32], sizes = [8, 8], strides = [1, 1]} : vector<8x96xf32> to vector<8x8xf32>
    %120 = vector.extract_strided_slice %116 {offsets = [0, 64], sizes = [8, 8], strides = [1, 1]} : vector<8x96xf32> to vector<8x8xf32>
    %cst_43 = arith.constant dense<0.000000e+00> : vector<8x8xf32>
    %121 = tpu.matmul %118, %119, %cst_43 {dimension_numbers = #tpu.dot_dimension_numbers<[1], [1], [0], [0], [0, 0, 1, 0], [], []>} : vector<8x8xf32>, vector<8x8xf32>, vector<8x8xf32> -> vector<8x8xf32>
    %cst_44 = arith.constant 0.353553385 : f32
    %122 = vector.broadcast %cst_44 : f32 to vector<8x8xf32>
    %123 = arith.mulf %121, %122 : vector<8x8xf32>
    %124 = vector.broadcast %117 : vector<1x8xf32> to vector<8x8xf32>
    %125 = arith.addf %123, %124 : vector<8x8xf32>
    %cst_45 = arith.constant dense<0xFF800000> : vector<8xf32>
    %126 = vector.multi_reduction <maximumf>, %125, %cst_45 [1] : vector<8x8xf32> to vector<8xf32>
    %127 = vector.shape_cast %126 : vector<8xf32> to vector<8x1xf32>
    %128 = vector.broadcast %127 : vector<8x1xf32> to vector<8x8xf32>
    %129 = arith.subf %125, %128 : vector<8x8xf32>
    %130 = math.exp %129 : vector<8x8xf32>
    %cst_46 = arith.constant dense<0.000000e+00> : vector<8xf32>
    %131 = vector.multi_reduction <add>, %130, %cst_46 [1] : vector<8x8xf32> to vector<8xf32>
    %132 = vector.shape_cast %131 : vector<8xf32> to vector<8x1xf32>
    %133 = tpu.reciprocal %132 {approx = true} : vector<8x1xf32> -> vector<8x1xf32>
    %134 = vector.broadcast %133 : vector<8x1xf32> to vector<8x8xf32>
    %135 = arith.mulf %130, %134 : vector<8x8xf32>
    %cst_47 = arith.constant dense<0.000000e+00> : vector<8x8xf32>
    %136 = tpu.matmul %135, %120, %cst_47 {dimension_numbers = #tpu.dot_dimension_numbers<[1], [0], [0], [1], [0, 0, 1, 1], [], []>} : vector<8x8xf32>, vector<8x8xf32>, vector<8x8xf32> -> vector<8x8xf32>
    %c8_48 = arith.constant 8 : index
    %c0_49 = arith.constant 0 : index
    %137 = vector.load %arg22[%c8_48, %c0_49] : memref<16x32xf32, #tpu.memory_space<vmem>>, vector<8x8xf32>
    tpu.vector_store %arg22[%c8_48, %c0_49], %136 {strides = array<i32>} : memref<16x32xf32, #tpu.memory_space<vmem>>, vector<8x8xf32>,
    %138 = vector.extract_strided_slice %116 {offsets = [0, 8], sizes = [8, 8], strides = [1, 1]} : vector<8x96xf32> to vector<8x8xf32>
    %139 = vector.extract_strided_slice %116 {offsets = [0, 40], sizes = [8, 8], strides = [1, 1]} : vector<8x96xf32> to vector<8x8xf32>
    %140 = vector.extract_strided_slice %116 {offsets = [0, 72], sizes = [8, 8], strides = [1, 1]} : vector<8x96xf32> to vector<8x8xf32>
    %cst_50 = arith.constant dense<0.000000e+00> : vector<8x8xf32>
    %141 = tpu.matmul %138, %139, %cst_50 {dimension_numbers = #tpu.dot_dimension_numbers<[1], [1], [0], [0], [0, 0, 1, 0], [], []>} : vector<8x8xf32>, vector<8x8xf32>, vector<8x8xf32> -> vector<8x8xf32>
    %cst_51 = arith.constant 0.353553385 : f32
    %142 = vector.broadcast %cst_51 : f32 to vector<8x8xf32>
    %143 = arith.mulf %141, %142 : vector<8x8xf32>
    %144 = vector.broadcast %117 : vector<1x8xf32> to vector<8x8xf32>
    %145 = arith.addf %143, %144 : vector<8x8xf32>
    %cst_52 = arith.constant dense<0xFF800000> : vector<8xf32>
    %146 = vector.multi_reduction <maximumf>, %145, %cst_52 [1] : vector<8x8xf32> to vector<8xf32>
    %147 = vector.shape_cast %146 : vector<8xf32> to vector<8x1xf32>
    %148 = vector.broadcast %147 : vector<8x1xf32> to vector<8x8xf32>
    %149 = arith.subf %145, %148 : vector<8x8xf32>
    %150 = math.exp %149 : vector<8x8xf32>
    %cst_53 = arith.constant dense<0.000000e+00> : vector<8xf32>
    %151 = vector.multi_reduction <add>, %150, %cst_53 [1] : vector<8x8xf32> to vector<8xf32>
    %152 = vector.shape_cast %151 : vector<8xf32> to vector<8x1xf32>
    %153 = tpu.reciprocal %152 {approx = true} : vector<8x1xf32> -> vector<8x1xf32>
    %154 = vector.broadcast %153 : vector<8x1xf32> to vector<8x8xf32>
    %155 = arith.mulf %150, %154 : vector<8x8xf32>
    %cst_54 = arith.constant dense<0.000000e+00> : vector<8x8xf32>
    %156 = tpu.matmul %155, %140, %cst_54 {dimension_numbers = #tpu.dot_dimension_numbers<[1], [0], [0], [1], [0, 0, 1, 1], [], []>} : vector<8x8xf32>, vector<8x8xf32>, vector<8x8xf32> -> vector<8x8xf32>
    %c8_55 = arith.constant 8 : index
    %c8_56 = arith.constant 8 : index
    %157 = vector.load %arg22[%c8_55, %c8_56] : memref<16x32xf32, #tpu.memory_space<vmem>>, vector<8x8xf32>
    tpu.vector_store %arg22[%c8_55, %c8_56], %156 {strides = array<i32>} : memref<16x32xf32, #tpu.memory_space<vmem>>, vector<8x8xf32>,
    %158 = vector.extract_strided_slice %116 {offsets = [0, 16], sizes = [8, 8], strides = [1, 1]} : vector<8x96xf32> to vector<8x8xf32>
    %159 = vector.extract_strided_slice %116 {offsets = [0, 48], sizes = [8, 8], strides = [1, 1]} : vector<8x96xf32> to vector<8x8xf32>
    %160 = vector.extract_strided_slice %116 {offsets = [0, 80], sizes = [8, 8], strides = [1, 1]} : vector<8x96xf32> to vector<8x8xf32>
    %cst_57 = arith.constant dense<0.000000e+00> : vector<8x8xf32>
    %161 = tpu.matmul %158, %159, %cst_57 {dimension_numbers = #tpu.dot_dimension_numbers<[1], [1], [0], [0], [0, 0, 1, 0], [], []>} : vector<8x8xf32>, vector<8x8xf32>, vector<8x8xf32> -> vector<8x8xf32>
    %cst_58 = arith.constant 0.353553385 : f32
    %162 = vector.broadcast %cst_58 : f32 to vector<8x8xf32>
    %163 = arith.mulf %161, %162 : vector<8x8xf32>
    %164 = vector.broadcast %117 : vector<1x8xf32> to vector<8x8xf32>
    %165 = arith.addf %163, %164 : vector<8x8xf32>
    %cst_59 = arith.constant dense<0xFF800000> : vector<8xf32>
    %166 = vector.multi_reduction <maximumf>, %165, %cst_59 [1] : vector<8x8xf32> to vector<8xf32>
    %167 = vector.shape_cast %166 : vector<8xf32> to vector<8x1xf32>
    %168 = vector.broadcast %167 : vector<8x1xf32> to vector<8x8xf32>
    %169 = arith.subf %165, %168 : vector<8x8xf32>
    %170 = math.exp %169 : vector<8x8xf32>
    %cst_60 = arith.constant dense<0.000000e+00> : vector<8xf32>
    %171 = vector.multi_reduction <add>, %170, %cst_60 [1] : vector<8x8xf32> to vector<8xf32>
    %172 = vector.shape_cast %171 : vector<8xf32> to vector<8x1xf32>
    %173 = tpu.reciprocal %172 {approx = true} : vector<8x1xf32> -> vector<8x1xf32>
    %174 = vector.broadcast %173 : vector<8x1xf32> to vector<8x8xf32>
    %175 = arith.mulf %170, %174 : vector<8x8xf32>
    %cst_61 = arith.constant dense<0.000000e+00> : vector<8x8xf32>
    %176 = tpu.matmul %175, %160, %cst_61 {dimension_numbers = #tpu.dot_dimension_numbers<[1], [0], [0], [1], [0, 0, 1, 1], [], []>} : vector<8x8xf32>, vector<8x8xf32>, vector<8x8xf32> -> vector<8x8xf32>
    %c8_62 = arith.constant 8 : index
    %c16_63 = arith.constant 16 : index
    %177 = vector.load %arg22[%c8_62, %c16_63] : memref<16x32xf32, #tpu.memory_space<vmem>>, vector<8x8xf32>
    tpu.vector_store %arg22[%c8_62, %c16_63], %176 {strides = array<i32>} : memref<16x32xf32, #tpu.memory_space<vmem>>, vector<8x8xf32>,
    %178 = vector.extract_strided_slice %116 {offsets = [0, 24], sizes = [8, 8], strides = [1, 1]} : vector<8x96xf32> to vector<8x8xf32>
    %179 = vector.extract_strided_slice %116 {offsets = [0, 56], sizes = [8, 8], strides = [1, 1]} : vector<8x96xf32> to vector<8x8xf32>
    %180 = vector.extract_strided_slice %116 {offsets = [0, 88], sizes = [8, 8], strides = [1, 1]} : vector<8x96xf32> to vector<8x8xf32>
    %cst_64 = arith.constant dense<0.000000e+00> : vector<8x8xf32>
    %181 = tpu.matmul %178, %179, %cst_64 {dimension_numbers = #tpu.dot_dimension_numbers<[1], [1], [0], [0], [0, 0, 1, 0], [], []>} : vector<8x8xf32>, vector<8x8xf32>, vector<8x8xf32> -> vector<8x8xf32>
    %cst_65 = arith.constant 0.353553385 : f32
    %182 = vector.broadcast %cst_65 : f32 to vector<8x8xf32>
    %183 = arith.mulf %181, %182 : vector<8x8xf32>
    %184 = vector.broadcast %117 : vector<1x8xf32> to vector<8x8xf32>
    %185 = arith.addf %183, %184 : vector<8x8xf32>
    %cst_66 = arith.constant dense<0xFF800000> : vector<8xf32>
    %186 = vector.multi_reduction <maximumf>, %185, %cst_66 [1] : vector<8x8xf32> to vector<8xf32>
    %187 = vector.shape_cast %186 : vector<8xf32> to vector<8x1xf32>
    %188 = vector.broadcast %187 : vector<8x1xf32> to vector<8x8xf32>
    %189 = arith.subf %185, %188 : vector<8x8xf32>
    %190 = math.exp %189 : vector<8x8xf32>
    %cst_67 = arith.constant dense<0.000000e+00> : vector<8xf32>
    %191 = vector.multi_reduction <add>, %190, %cst_67 [1] : vector<8x8xf32> to vector<8xf32>
    %192 = vector.shape_cast %191 : vector<8xf32> to vector<8x1xf32>
    %193 = tpu.reciprocal %192 {approx = true} : vector<8x1xf32> -> vector<8x1xf32>
    %194 = vector.broadcast %193 : vector<8x1xf32> to vector<8x8xf32>
    %195 = arith.mulf %190, %194 : vector<8x8xf32>
    %cst_68 = arith.constant dense<0.000000e+00> : vector<8x8xf32>
    %196 = tpu.matmul %195, %180, %cst_68 {dimension_numbers = #tpu.dot_dimension_numbers<[1], [0], [0], [1], [0, 0, 1, 1], [], []>} : vector<8x8xf32>, vector<8x8xf32>, vector<8x8xf32> -> vector<8x8xf32>
    %c8_69 = arith.constant 8 : index
    %c24_70 = arith.constant 24 : index
    %197 = vector.load %arg22[%c8_69, %c24_70] : memref<16x32xf32, #tpu.memory_space<vmem>>, vector<8x8xf32>
    tpu.vector_store %arg22[%c8_69, %c24_70], %196 {strides = array<i32>} : memref<16x32xf32, #tpu.memory_space<vmem>>, vector<8x8xf32>,
    %c0_71 = arith.constant 0 : index
    %c0_72 = arith.constant 0 : index
    %198 = vector.load %arg22[%c0_71, %c0_72] : memref<16x32xf32, #tpu.memory_space<vmem>>, vector<16x32xf32>
    %c0_73 = arith.constant 0 : index
    %c0_74 = arith.constant 0 : index
    %c0_75 = arith.constant 0 : index
    %199 = vector.load %arg7[%c0_73, %c0_74, %c0_75] : memref<2x32x32xbf16, #tpu.memory_space<vmem>>, vector<1x32x32xbf16>
    %200 = vector.shape_cast %199 : vector<1x32x32xbf16> to vector<32x32xbf16>
    %c0_76 = arith.constant 0 : index
    %c0_77 = arith.constant 0 : index
    %c0_78 = arith.constant 0 : index
    %201 = vector.load %arg8[%c0_76, %c0_77, %c0_78] : memref<2x1x32xf32, #tpu.memory_space<vmem>>, vector<1x1x32xf32>
    %202 = vector.shape_cast %201 : vector<1x1x32xf32> to vector<1x32xf32>
    %203 = arith.truncf %198 : vector<16x32xf32> to vector<16x32xbf16>
    %cst_79 = arith.constant dense<0.000000e+00> : vector<16x32xf32>
    %204 = tpu.matmul %203, %200, %cst_79 {dimension_numbers = #tpu.dot_dimension_numbers<[1], [0], [0], [1], [0, 0, 1, 1], [], []>} : vector<16x32xbf16>, vector<32x32xbf16>, vector<16x32xf32> -> vector<16x32xf32>
    %205 = vector.broadcast %202 : vector<1x32xf32> to vector<16x32xf32>
    %206 = arith.addf %204, %205 : vector<16x32xf32>
    %207 = arith.addf %206, %25 : vector<16x32xf32>
    %c0_80 = arith.constant 0 : index
    %c0_81 = arith.constant 0 : index
    %c0_82 = arith.constant 0 : index
    %208 = vector.load %arg9[%c0_80, %c0_81, %c0_82] : memref<2x1x32xf32, #tpu.memory_space<vmem>>, vector<1x1x32xf32>
    %209 = vector.shape_cast %208 : vector<1x1x32xf32> to vector<1x32xf32>
    %c0_83 = arith.constant 0 : index
    %c0_84 = arith.constant 0 : index
    %c0_85 = arith.constant 0 : index
    %210 = vector.load %arg10[%c0_83, %c0_84, %c0_85] : memref<2x1x32xf32, #tpu.memory_space<vmem>>, vector<1x1x32xf32>
    %211 = vector.shape_cast %210 : vector<1x1x32xf32> to vector<1x32xf32>
    %cst_86 = arith.constant dense<0.000000e+00> : vector<16xf32>
    %212 = vector.multi_reduction <add>, %207, %cst_86 [1] : vector<16x32xf32> to vector<16xf32>
    %213 = vector.shape_cast %212 : vector<16xf32> to vector<16x1xf32>
    %cst_87 = arith.constant 3.200000e+01 : f32
    %214 = vector.broadcast %cst_87 : f32 to vector<16x1xf32>
    %215 = arith.divf %213, %214 : vector<16x1xf32>
    %216 = vector.broadcast %215 : vector<16x1xf32> to vector<16x32xf32>
    %217 = arith.subf %207, %216 : vector<16x32xf32>
    %218 = arith.mulf %217, %217 : vector<16x32xf32>
    %cst_88 = arith.constant dense<0.000000e+00> : vector<16xf32>
    %219 = vector.multi_reduction <add>, %218, %cst_88 [1] : vector<16x32xf32> to vector<16xf32>
    %220 = vector.shape_cast %219 : vector<16xf32> to vector<16x1xf32>
    %cst_89 = arith.constant 3.200000e+01 : f32
    %221 = vector.broadcast %cst_89 : f32 to vector<16x1xf32>
    %222 = arith.divf %220, %221 : vector<16x1xf32>
    %223 = vector.broadcast %215 : vector<16x1xf32> to vector<16x32xf32>
    %224 = arith.subf %207, %223 : vector<16x32xf32>
    %cst_90 = arith.constant 9.99999996E-13 : f32
    %225 = vector.broadcast %cst_90 : f32 to vector<16x1xf32>
    %226 = arith.addf %222, %225 : vector<16x1xf32>
    %227 = math.rsqrt %226 : vector<16x1xf32>
    %228 = vector.broadcast %227 : vector<16x1xf32> to vector<16x32xf32>
    %229 = arith.mulf %224, %228 : vector<16x32xf32>
    %230 = vector.broadcast %209 : vector<1x32xf32> to vector<16x32xf32>
    %231 = arith.mulf %229, %230 : vector<16x32xf32>
    %232 = vector.broadcast %211 : vector<1x32xf32> to vector<16x32xf32>
    %233 = arith.addf %231, %232 : vector<16x32xf32>
    %c0_91 = arith.constant 0 : index
    %c0_92 = arith.constant 0 : index
    %c0_93 = arith.constant 0 : index
    %234 = vector.load %arg11[%c0_91, %c0_92, %c0_93] : memref<2x32x64xbf16, #tpu.memory_space<vmem>>, vector<1x32x64xbf16>
    %235 = vector.shape_cast %234 : vector<1x32x64xbf16> to vector<32x64xbf16>
    %c0_94 = arith.constant 0 : index
    %c0_95 = arith.constant 0 : index
    %c0_96 = arith.constant 0 : index
    %236 = vector.load %arg12[%c0_94, %c0_95, %c0_96] : memref<2x1x64xf32, #tpu.memory_space<vmem>>, vector<1x1x64xf32>
    %237 = vector.shape_cast %236 : vector<1x1x64xf32> to vector<1x64xf32>
    %238 = arith.truncf %233 : vector<16x32xf32> to vector<16x32xbf16>
    %cst_97 = arith.constant dense<0.000000e+00> : vector<16x64xf32>
    %239 = tpu.matmul %238, %235, %cst_97 {dimension_numbers = #tpu.dot_dimension_numbers<[1], [0], [0], [1], [0, 0, 1, 1], [], []>} : vector<16x32xbf16>, vector<32x64xbf16>, vector<16x64xf32> -> vector<16x64xf32>
    %240 = vector.broadcast %237 : vector<1x64xf32> to vector<16x64xf32>
    %241 = arith.addf %239, %240 : vector<16x64xf32>
    %cst_98 = arith.constant 5.000000e-01 : f32
    %242 = vector.broadcast %cst_98 : f32 to vector<16x64xf32>
    %243 = arith.mulf %242, %241 : vector<16x64xf32>
    %cst_99 = arith.constant 0.707106769 : f32
    %244 = vector.broadcast %cst_99 : f32 to vector<16x64xf32>
    %245 = arith.mulf %241, %244 : vector<16x64xf32>
    %246 = math.erf %245 : vector<16x64xf32>
    %cst_100 = arith.constant 1.000000e+00 : f32
    %247 = vector.broadcast %cst_100 : f32 to vector<16x64xf32>
    %248 = arith.addf %247, %246 : vector<16x64xf32>
    %249 = arith.mulf %243, %248 : vector<16x64xf32>
    %c0_101 = arith.constant 0 : index
    %c0_102 = arith.constant 0 : index
    %c0_103 = arith.constant 0 : index
    %250 = vector.load %arg13[%c0_101, %c0_102, %c0_103] : memref<2x64x32xbf16, #tpu.memory_space<vmem>>, vector<1x64x32xbf16>
    %251 = vector.shape_cast %250 : vector<1x64x32xbf16> to vector<64x32xbf16>
    %c0_104 = arith.constant 0 : index
    %c0_105 = arith.constant 0 : index
    %c0_106 = arith.constant 0 : index
    %252 = vector.load %arg14[%c0_104, %c0_105, %c0_106] : memref<2x1x32xf32, #tpu.memory_space<vmem>>, vector<1x1x32xf32>
    %253 = vector.shape_cast %252 : vector<1x1x32xf32> to vector<1x32xf32>
    %254 = arith.truncf %249 : vector<16x64xf32> to vector<16x64xbf16>
    %cst_107 = arith.constant dense<0.000000e+00> : vector<16x32xf32>
    %255 = tpu.matmul %254, %251, %cst_107 {dimension_numbers = #tpu.dot_dimension_numbers<[1], [0], [0], [1], [0, 0, 1, 1], [], []>} : vector<16x64xbf16>, vector<64x32xbf16>, vector<16x32xf32> -> vector<16x32xf32>
    %256 = vector.broadcast %253 : vector<1x32xf32> to vector<16x32xf32>
    %257 = arith.addf %255, %256 : vector<16x32xf32>
    %258 = arith.addf %257, %233 : vector<16x32xf32>
    %c0_108 = arith.constant 0 : index
    %c0_109 = arith.constant 0 : index
    %c0_110 = arith.constant 0 : index
    %259 = vector.load %arg15[%c0_108, %c0_109, %c0_110] : memref<2x1x32xf32, #tpu.memory_space<vmem>>, vector<1x1x32xf32>
    %260 = vector.shape_cast %259 : vector<1x1x32xf32> to vector<1x32xf32>
    %c0_111 = arith.constant 0 : index
    %c0_112 = arith.constant 0 : index
    %c0_113 = arith.constant 0 : index
    %261 = vector.load %arg16[%c0_111, %c0_112, %c0_113] : memref<2x1x32xf32, #tpu.memory_space<vmem>>, vector<1x1x32xf32>
    %262 = vector.shape_cast %261 : vector<1x1x32xf32> to vector<1x32xf32>
    %cst_114 = arith.constant dense<0.000000e+00> : vector<16xf32>
    %263 = vector.multi_reduction <add>, %258, %cst_114 [1] : vector<16x32xf32> to vector<16xf32>
    %264 = vector.shape_cast %263 : vector<16xf32> to vector<16x1xf32>
    %cst_115 = arith.constant 3.200000e+01 : f32
    %265 = vector.broadcast %cst_115 : f32 to vector<16x1xf32>
    %266 = arith.divf %264, %265 : vector<16x1xf32>
    %267 = vector.broadcast %266 : vector<16x1xf32> to vector<16x32xf32>
    %268 = arith.subf %258, %267 : vector<16x32xf32>
    %269 = arith.mulf %268, %268 : vector<16x32xf32>
    %cst_116 = arith.constant dense<0.000000e+00> : vector<16xf32>
    %270 = vector.multi_reduction <add>, %269, %cst_116 [1] : vector<16x32xf32> to vector<16xf32>
    %271 = vector.shape_cast %270 : vector<16xf32> to vector<16x1xf32>
    %cst_117 = arith.constant 3.200000e+01 : f32
    %272 = vector.broadcast %cst_117 : f32 to vector<16x1xf32>
    %273 = arith.divf %271, %272 : vector<16x1xf32>
    %274 = vector.broadcast %266 : vector<16x1xf32> to vector<16x32xf32>
    %275 = arith.subf %258, %274 : vector<16x32xf32>
    %cst_118 = arith.constant 9.99999996E-13 : f32
    %276 = vector.broadcast %cst_118 : f32 to vector<16x1xf32>
    %277 = arith.addf %273, %276 : vector<16x1xf32>
    %278 = math.rsqrt %277 : vector<16x1xf32>
    %279 = vector.broadcast %278 : vector<16x1xf32> to vector<16x32xf32>
    %280 = arith.mulf %275, %279 : vector<16x32xf32>
    %281 = vector.broadcast %260 : vector<1x32xf32> to vector<16x32xf32>
    %282 = arith.mulf %280, %281 : vector<16x32xf32>
    %283 = vector.broadcast %262 : vector<1x32xf32> to vector<16x32xf32>
    %284 = arith.addf %282, %283 : vector<16x32xf32>
    %c1 = arith.constant 1 : index
    %c0_119 = arith.constant 0 : index
    %c0_120 = arith.constant 0 : index
    %285 = vector.load %arg5[%c1, %c0_119, %c0_120] : memref<2x32x96xbf16, #tpu.memory_space<vmem>>, vector<1x32x96xbf16>
    %286 = vector.shape_cast %285 : vector<1x32x96xbf16> to vector<32x96xbf16>
    %c1_121 = arith.constant 1 : index
    %c0_122 = arith.constant 0 : index
    %c0_123 = arith.constant 0 : index
    %287 = vector.load %arg6[%c1_121, %c0_122, %c0_123] : memref<2x1x96xf32, #tpu.memory_space<vmem>>, vector<1x1x96xf32>
    %288 = vector.shape_cast %287 : vector<1x1x96xf32> to vector<1x96xf32>
    %289 = arith.truncf %284 : vector<16x32xf32> to vector<16x32xbf16>
    %cst_124 = arith.constant dense<0.000000e+00> : vector<16x96xf32>
    %290 = tpu.matmul %289, %286, %cst_124 {dimension_numbers = #tpu.dot_dimension_numbers<[1], [0], [0], [1], [0, 0, 1, 1], [], []>} : vector<16x32xbf16>, vector<32x96xbf16>, vector<16x96xf32> -> vector<16x96xf32>
    %291 = vector.broadcast %288 : vector<1x96xf32> to vector<16x96xf32>
    %292 = arith.addf %290, %291 : vector<16x96xf32>
    %293 = vector.extract_strided_slice %292 {offsets = [0, 0], sizes = [8, 96], strides = [1, 1]} : vector<16x96xf32> to vector<8x96xf32>
    %294 = vector.extract_strided_slice %0 {offsets = [0, 0], sizes = [1, 8], strides = [1, 1]} : vector<2x8xf32> to vector<1x8xf32>
    %295 = vector.extract_strided_slice %293 {offsets = [0, 0], sizes = [8, 8], strides = [1, 1]} : vector<8x96xf32> to vector<8x8xf32>
    %296 = vector.extract_strided_slice %293 {offsets = [0, 32], sizes = [8, 8], strides = [1, 1]} : vector<8x96xf32> to vector<8x8xf32>
    %297 = vector.extract_strided_slice %293 {offsets = [0, 64], sizes = [8, 8], strides = [1, 1]} : vector<8x96xf32> to vector<8x8xf32>
    %cst_125 = arith.constant dense<0.000000e+00> : vector<8x8xf32>
    %298 = tpu.matmul %295, %296, %cst_125 {dimension_numbers = #tpu.dot_dimension_numbers<[1], [1], [0], [0], [0, 0, 1, 0], [], []>} : vector<8x8xf32>, vector<8x8xf32>, vector<8x8xf32> -> vector<8x8xf32>
    %cst_126 = arith.constant 0.353553385 : f32
    %299 = vector.broadcast %cst_126 : f32 to vector<8x8xf32>
    %300 = arith.mulf %298, %299 : vector<8x8xf32>
    %301 = vector.broadcast %294 : vector<1x8xf32> to vector<8x8xf32>
    %302 = arith.addf %300, %301 : vector<8x8xf32>
    %cst_127 = arith.constant dense<0xFF800000> : vector<8xf32>
    %303 = vector.multi_reduction <maximumf>, %302, %cst_127 [1] : vector<8x8xf32> to vector<8xf32>
    %304 = vector.shape_cast %303 : vector<8xf32> to vector<8x1xf32>
    %305 = vector.broadcast %304 : vector<8x1xf32> to vector<8x8xf32>
    %306 = arith.subf %302, %305 : vector<8x8xf32>
    %307 = math.exp %306 : vector<8x8xf32>
    %cst_128 = arith.constant dense<0.000000e+00> : vector<8xf32>
    %308 = vector.multi_reduction <add>, %307, %cst_128 [1] : vector<8x8xf32> to vector<8xf32>
    %309 = vector.shape_cast %308 : vector<8xf32> to vector<8x1xf32>
    %310 = tpu.reciprocal %309 {approx = true} : vector<8x1xf32> -> vector<8x1xf32>
    %311 = vector.broadcast %310 : vector<8x1xf32> to vector<8x8xf32>
    %312 = arith.mulf %307, %311 : vector<8x8xf32>
    %cst_129 = arith.constant dense<0.000000e+00> : vector<8x8xf32>
    %313 = tpu.matmul %312, %297, %cst_129 {dimension_numbers = #tpu.dot_dimension_numbers<[1], [0], [0], [1], [0, 0, 1, 1], [], []>} : vector<8x8xf32>, vector<8x8xf32>, vector<8x8xf32> -> vector<8x8xf32>
    %c0_130 = arith.constant 0 : index
    %c0_131 = arith.constant 0 : index
    %314 = vector.load %arg22[%c0_130, %c0_131] : memref<16x32xf32, #tpu.memory_space<vmem>>, vector<8x8xf32>
    tpu.vector_store %arg22[%c0_130, %c0_131], %313 {strides = array<i32>} : memref<16x32xf32, #tpu.memory_space<vmem>>, vector<8x8xf32>,
    %315 = vector.extract_strided_slice %293 {offsets = [0, 8], sizes = [8, 8], strides = [1, 1]} : vector<8x96xf32> to vector<8x8xf32>
    %316 = vector.extract_strided_slice %293 {offsets = [0, 40], sizes = [8, 8], strides = [1, 1]} : vector<8x96xf32> to vector<8x8xf32>
    %317 = vector.extract_strided_slice %293 {offsets = [0, 72], sizes = [8, 8], strides = [1, 1]} : vector<8x96xf32> to vector<8x8xf32>
    %cst_132 = arith.constant dense<0.000000e+00> : vector<8x8xf32>
    %318 = tpu.matmul %315, %316, %cst_132 {dimension_numbers = #tpu.dot_dimension_numbers<[1], [1], [0], [0], [0, 0, 1, 0], [], []>} : vector<8x8xf32>, vector<8x8xf32>, vector<8x8xf32> -> vector<8x8xf32>
    %cst_133 = arith.constant 0.353553385 : f32
    %319 = vector.broadcast %cst_133 : f32 to vector<8x8xf32>
    %320 = arith.mulf %318, %319 : vector<8x8xf32>
    %321 = vector.broadcast %294 : vector<1x8xf32> to vector<8x8xf32>
    %322 = arith.addf %320, %321 : vector<8x8xf32>
    %cst_134 = arith.constant dense<0xFF800000> : vector<8xf32>
    %323 = vector.multi_reduction <maximumf>, %322, %cst_134 [1] : vector<8x8xf32> to vector<8xf32>
    %324 = vector.shape_cast %323 : vector<8xf32> to vector<8x1xf32>
    %325 = vector.broadcast %324 : vector<8x1xf32> to vector<8x8xf32>
    %326 = arith.subf %322, %325 : vector<8x8xf32>
    %327 = math.exp %326 : vector<8x8xf32>
    %cst_135 = arith.constant dense<0.000000e+00> : vector<8xf32>
    %328 = vector.multi_reduction <add>, %327, %cst_135 [1] : vector<8x8xf32> to vector<8xf32>
    %329 = vector.shape_cast %328 : vector<8xf32> to vector<8x1xf32>
    %330 = tpu.reciprocal %329 {approx = true} : vector<8x1xf32> -> vector<8x1xf32>
    %331 = vector.broadcast %330 : vector<8x1xf32> to vector<8x8xf32>
    %332 = arith.mulf %327, %331 : vector<8x8xf32>
    %cst_136 = arith.constant dense<0.000000e+00> : vector<8x8xf32>
    %333 = tpu.matmul %332, %317, %cst_136 {dimension_numbers = #tpu.dot_dimension_numbers<[1], [0], [0], [1], [0, 0, 1, 1], [], []>} : vector<8x8xf32>, vector<8x8xf32>, vector<8x8xf32> -> vector<8x8xf32>
    %c0_137 = arith.constant 0 : index
    %c8_138 = arith.constant 8 : index
    %334 = vector.load %arg22[%c0_137, %c8_138] : memref<16x32xf32, #tpu.memory_space<vmem>>, vector<8x8xf32>
    tpu.vector_store %arg22[%c0_137, %c8_138], %333 {strides = array<i32>} : memref<16x32xf32, #tpu.memory_space<vmem>>, vector<8x8xf32>,
    %335 = vector.extract_strided_slice %293 {offsets = [0, 16], sizes = [8, 8], strides = [1, 1]} : vector<8x96xf32> to vector<8x8xf32>
    %336 = vector.extract_strided_slice %293 {offsets = [0, 48], sizes = [8, 8], strides = [1, 1]} : vector<8x96xf32> to vector<8x8xf32>
    %337 = vector.extract_strided_slice %293 {offsets = [0, 80], sizes = [8, 8], strides = [1, 1]} : vector<8x96xf32> to vector<8x8xf32>
    %cst_139 = arith.constant dense<0.000000e+00> : vector<8x8xf32>
    %338 = tpu.matmul %335, %336, %cst_139 {dimension_numbers = #tpu.dot_dimension_numbers<[1], [1], [0], [0], [0, 0, 1, 0], [], []>} : vector<8x8xf32>, vector<8x8xf32>, vector<8x8xf32> -> vector<8x8xf32>
    %cst_140 = arith.constant 0.353553385 : f32
    %339 = vector.broadcast %cst_140 : f32 to vector<8x8xf32>
    %340 = arith.mulf %338, %339 : vector<8x8xf32>
    %341 = vector.broadcast %294 : vector<1x8xf32> to vector<8x8xf32>
    %342 = arith.addf %340, %341 : vector<8x8xf32>
    %cst_141 = arith.constant dense<0xFF800000> : vector<8xf32>
    %343 = vector.multi_reduction <maximumf>, %342, %cst_141 [1] : vector<8x8xf32> to vector<8xf32>
    %344 = vector.shape_cast %343 : vector<8xf32> to vector<8x1xf32>
    %345 = vector.broadcast %344 : vector<8x1xf32> to vector<8x8xf32>
    %346 = arith.subf %342, %345 : vector<8x8xf32>
    %347 = math.exp %346 : vector<8x8xf32>
    %cst_142 = arith.constant dense<0.000000e+00> : vector<8xf32>
    %348 = vector.multi_reduction <add>, %347, %cst_142 [1] : vector<8x8xf32> to vector<8xf32>
    %349 = vector.shape_cast %348 : vector<8xf32> to vector<8x1xf32>
    %350 = tpu.reciprocal %349 {approx = true} : vector<8x1xf32> -> vector<8x1xf32>
    %351 = vector.broadcast %350 : vector<8x1xf32> to vector<8x8xf32>
    %352 = arith.mulf %347, %351 : vector<8x8xf32>
    %cst_143 = arith.constant dense<0.000000e+00> : vector<8x8xf32>
    %353 = tpu.matmul %352, %337, %cst_143 {dimension_numbers = #tpu.dot_dimension_numbers<[1], [0], [0], [1], [0, 0, 1, 1], [], []>} : vector<8x8xf32>, vector<8x8xf32>, vector<8x8xf32> -> vector<8x8xf32>
    %c0_144 = arith.constant 0 : index
    %c16_145 = arith.constant 16 : index
    %354 = vector.load %arg22[%c0_144, %c16_145] : memref<16x32xf32, #tpu.memory_space<vmem>>, vector<8x8xf32>
    tpu.vector_store %arg22[%c0_144, %c16_145], %353 {strides = array<i32>} : memref<16x32xf32, #tpu.memory_space<vmem>>, vector<8x8xf32>,
    %355 = vector.extract_strided_slice %293 {offsets = [0, 24], sizes = [8, 8], strides = [1, 1]} : vector<8x96xf32> to vector<8x8xf32>
    %356 = vector.extract_strided_slice %293 {offsets = [0, 56], sizes = [8, 8], strides = [1, 1]} : vector<8x96xf32> to vector<8x8xf32>
    %357 = vector.extract_strided_slice %293 {offsets = [0, 88], sizes = [8, 8], strides = [1, 1]} : vector<8x96xf32> to vector<8x8xf32>
    %cst_146 = arith.constant dense<0.000000e+00> : vector<8x8xf32>
    %358 = tpu.matmul %355, %356, %cst_146 {dimension_numbers = #tpu.dot_dimension_numbers<[1], [1], [0], [0], [0, 0, 1, 0], [], []>} : vector<8x8xf32>, vector<8x8xf32>, vector<8x8xf32> -> vector<8x8xf32>
    %cst_147 = arith.constant 0.353553385 : f32
    %359 = vector.broadcast %cst_147 : f32 to vector<8x8xf32>
    %360 = arith.mulf %358, %359 : vector<8x8xf32>
    %361 = vector.broadcast %294 : vector<1x8xf32> to vector<8x8xf32>
    %362 = arith.addf %360, %361 : vector<8x8xf32>
    %cst_148 = arith.constant dense<0xFF800000> : vector<8xf32>
    %363 = vector.multi_reduction <maximumf>, %362, %cst_148 [1] : vector<8x8xf32> to vector<8xf32>
    %364 = vector.shape_cast %363 : vector<8xf32> to vector<8x1xf32>
    %365 = vector.broadcast %364 : vector<8x1xf32> to vector<8x8xf32>
    %366 = arith.subf %362, %365 : vector<8x8xf32>
    %367 = math.exp %366 : vector<8x8xf32>
    %cst_149 = arith.constant dense<0.000000e+00> : vector<8xf32>
    %368 = vector.multi_reduction <add>, %367, %cst_149 [1] : vector<8x8xf32> to vector<8xf32>
    %369 = vector.shape_cast %368 : vector<8xf32> to vector<8x1xf32>
    %370 = tpu.reciprocal %369 {approx = true} : vector<8x1xf32> -> vector<8x1xf32>
    %371 = vector.broadcast %370 : vector<8x1xf32> to vector<8x8xf32>
    %372 = arith.mulf %367, %371 : vector<8x8xf32>
    %cst_150 = arith.constant dense<0.000000e+00> : vector<8x8xf32>
    %373 = tpu.matmul %372, %357, %cst_150 {dimension_numbers = #tpu.dot_dimension_numbers<[1], [0], [0], [1], [0, 0, 1, 1], [], []>} : vector<8x8xf32>, vector<8x8xf32>, vector<8x8xf32> -> vector<8x8xf32>
    %c0_151 = arith.constant 0 : index
    %c24_152 = arith.constant 24 : index
    %374 = vector.load %arg22[%c0_151, %c24_152] : memref<16x32xf32, #tpu.memory_space<vmem>>, vector<8x8xf32>
    tpu.vector_store %arg22[%c0_151, %c24_152], %373 {strides = array<i32>} : memref<16x32xf32, #tpu.memory_space<vmem>>, vector<8x8xf32>,
    %375 = vector.extract_strided_slice %292 {offsets = [8, 0], sizes = [8, 96], strides = [1, 1]} : vector<16x96xf32> to vector<8x96xf32>
    %376 = vector.extract_strided_slice %0 {offsets = [1, 0], sizes = [1, 8], strides = [1, 1]} : vector<2x8xf32> to vector<1x8xf32>
    %377 = vector.extract_strided_slice %375 {offsets = [0, 0], sizes = [8, 8], strides = [1, 1]} : vector<8x96xf32> to vector<8x8xf32>
    %378 = vector.extract_strided_slice %375 {offsets = [0, 32], sizes = [8, 8], strides = [1, 1]} : vector<8x96xf32> to vector<8x8xf32>
    %379 = vector.extract_strided_slice %375 {offsets = [0, 64], sizes = [8, 8], strides = [1, 1]} : vector<8x96xf32> to vector<8x8xf32>
    %cst_153 = arith.constant dense<0.000000e+00> : vector<8x8xf32>
    %380 = tpu.matmul %377, %378, %cst_153 {dimension_numbers = #tpu.dot_dimension_numbers<[1], [1], [0], [0], [0, 0, 1, 0], [], []>} : vector<8x8xf32>, vector<8x8xf32>, vector<8x8xf32> -> vector<8x8xf32>
    %cst_154 = arith.constant 0.353553385 : f32
    %381 = vector.broadcast %cst_154 : f32 to vector<8x8xf32>
    %382 = arith.mulf %380, %381 : vector<8x8xf32>
    %383 = vector.broadcast %376 : vector<1x8xf32> to vector<8x8xf32>
    %384 = arith.addf %382, %383 : vector<8x8xf32>
    %cst_155 = arith.constant dense<0xFF800000> : vector<8xf32>
    %385 = vector.multi_reduction <maximumf>, %384, %cst_155 [1] : vector<8x8xf32> to vector<8xf32>
    %386 = vector.shape_cast %385 : vector<8xf32> to vector<8x1xf32>
    %387 = vector.broadcast %386 : vector<8x1xf32> to vector<8x8xf32>
    %388 = arith.subf %384, %387 : vector<8x8xf32>
    %389 = math.exp %388 : vector<8x8xf32>
    %cst_156 = arith.constant dense<0.000000e+00> : vector<8xf32>
    %390 = vector.multi_reduction <add>, %389, %cst_156 [1] : vector<8x8xf32> to vector<8xf32>
    %391 = vector.shape_cast %390 : vector<8xf32> to vector<8x1xf32>
    %392 = tpu.reciprocal %391 {approx = true} : vector<8x1xf32> -> vector<8x1xf32>
    %393 = vector.broadcast %392 : vector<8x1xf32> to vector<8x8xf32>
    %394 = arith.mulf %389, %393 : vector<8x8xf32>
    %cst_157 = arith.constant dense<0.000000e+00> : vector<8x8xf32>
    %395 = tpu.matmul %394, %379, %cst_157 {dimension_numbers = #tpu.dot_dimension_numbers<[1], [0], [0], [1], [0, 0, 1, 1], [], []>} : vector<8x8xf32>, vector<8x8xf32>, vector<8x8xf32> -> vector<8x8xf32>
    %c8_158 = arith.constant 8 : index
    %c0_159 = arith.constant 0 : index
    %396 = vector.load %arg22[%c8_158, %c0_159] : memref<16x32xf32, #tpu.memory_space<vmem>>, vector<8x8xf32>
    tpu.vector_store %arg22[%c8_158, %c0_159], %395 {strides = array<i32>} : memref<16x32xf32, #tpu.memory_space<vmem>>, vector<8x8xf32>,
    %397 = vector.extract_strided_slice %375 {offsets = [0, 8], sizes = [8, 8], strides = [1, 1]} : vector<8x96xf32> to vector<8x8xf32>
    %398 = vector.extract_strided_slice %375 {offsets = [0, 40], sizes = [8, 8], strides = [1, 1]} : vector<8x96xf32> to vector<8x8xf32>
    %399 = vector.extract_strided_slice %375 {offsets = [0, 72], sizes = [8, 8], strides = [1, 1]} : vector<8x96xf32> to vector<8x8xf32>
    %cst_160 = arith.constant dense<0.000000e+00> : vector<8x8xf32>
    %400 = tpu.matmul %397, %398, %cst_160 {dimension_numbers = #tpu.dot_dimension_numbers<[1], [1], [0], [0], [0, 0, 1, 0], [], []>} : vector<8x8xf32>, vector<8x8xf32>, vector<8x8xf32> -> vector<8x8xf32>
    %cst_161 = arith.constant 0.353553385 : f32
    %401 = vector.broadcast %cst_161 : f32 to vector<8x8xf32>
    %402 = arith.mulf %400, %401 : vector<8x8xf32>
    %403 = vector.broadcast %376 : vector<1x8xf32> to vector<8x8xf32>
    %404 = arith.addf %402, %403 : vector<8x8xf32>
    %cst_162 = arith.constant dense<0xFF800000> : vector<8xf32>
    %405 = vector.multi_reduction <maximumf>, %404, %cst_162 [1] : vector<8x8xf32> to vector<8xf32>
    %406 = vector.shape_cast %405 : vector<8xf32> to vector<8x1xf32>
    %407 = vector.broadcast %406 : vector<8x1xf32> to vector<8x8xf32>
    %408 = arith.subf %404, %407 : vector<8x8xf32>
    %409 = math.exp %408 : vector<8x8xf32>
    %cst_163 = arith.constant dense<0.000000e+00> : vector<8xf32>
    %410 = vector.multi_reduction <add>, %409, %cst_163 [1] : vector<8x8xf32> to vector<8xf32>
    %411 = vector.shape_cast %410 : vector<8xf32> to vector<8x1xf32>
    %412 = tpu.reciprocal %411 {approx = true} : vector<8x1xf32> -> vector<8x1xf32>
    %413 = vector.broadcast %412 : vector<8x1xf32> to vector<8x8xf32>
    %414 = arith.mulf %409, %413 : vector<8x8xf32>
    %cst_164 = arith.constant dense<0.000000e+00> : vector<8x8xf32>
    %415 = tpu.matmul %414, %399, %cst_164 {dimension_numbers = #tpu.dot_dimension_numbers<[1], [0], [0], [1], [0, 0, 1, 1], [], []>} : vector<8x8xf32>, vector<8x8xf32>, vector<8x8xf32> -> vector<8x8xf32>
    %c8_165 = arith.constant 8 : index
    %c8_166 = arith.constant 8 : index
    %416 = vector.load %arg22[%c8_165, %c8_166] : memref<16x32xf32, #tpu.memory_space<vmem>>, vector<8x8xf32>
    tpu.vector_store %arg22[%c8_165, %c8_166], %415 {strides = array<i32>} : memref<16x32xf32, #tpu.memory_space<vmem>>, vector<8x8xf32>,
    %417 = vector.extract_strided_slice %375 {offsets = [0, 16], sizes = [8, 8], strides = [1, 1]} : vector<8x96xf32> to vector<8x8xf32>
    %418 = vector.extract_strided_slice %375 {offsets = [0, 48], sizes = [8, 8], strides = [1, 1]} : vector<8x96xf32> to vector<8x8xf32>
    %419 = vector.extract_strided_slice %375 {offsets = [0, 80], sizes = [8, 8], strides = [1, 1]} : vector<8x96xf32> to vector<8x8xf32>
    %cst_167 = arith.constant dense<0.000000e+00> : vector<8x8xf32>
    %420 = tpu.matmul %417, %418, %cst_167 {dimension_numbers = #tpu.dot_dimension_numbers<[1], [1], [0], [0], [0, 0, 1, 0], [], []>} : vector<8x8xf32>, vector<8x8xf32>, vector<8x8xf32> -> vector<8x8xf32>
    %cst_168 = arith.constant 0.353553385 : f32
    %421 = vector.broadcast %cst_168 : f32 to vector<8x8xf32>
    %422 = arith.mulf %420, %421 : vector<8x8xf32>
    %423 = vector.broadcast %376 : vector<1x8xf32> to vector<8x8xf32>
    %424 = arith.addf %422, %423 : vector<8x8xf32>
    %cst_169 = arith.constant dense<0xFF800000> : vector<8xf32>
    %425 = vector.multi_reduction <maximumf>, %424, %cst_169 [1] : vector<8x8xf32> to vector<8xf32>
    %426 = vector.shape_cast %425 : vector<8xf32> to vector<8x1xf32>
    %427 = vector.broadcast %426 : vector<8x1xf32> to vector<8x8xf32>
    %428 = arith.subf %424, %427 : vector<8x8xf32>
    %429 = math.exp %428 : vector<8x8xf32>
    %cst_170 = arith.constant dense<0.000000e+00> : vector<8xf32>
    %430 = vector.multi_reduction <add>, %429, %cst_170 [1] : vector<8x8xf32> to vector<8xf32>
    %431 = vector.shape_cast %430 : vector<8xf32> to vector<8x1xf32>
    %432 = tpu.reciprocal %431 {approx = true} : vector<8x1xf32> -> vector<8x1xf32>
    %433 = vector.broadcast %432 : vector<8x1xf32> to vector<8x8xf32>
    %434 = arith.mulf %429, %433 : vector<8x8xf32>
    %cst_171 = arith.constant dense<0.000000e+00> : vector<8x8xf32>
    %435 = tpu.matmul %434, %419, %cst_171 {dimension_numbers = #tpu.dot_dimension_numbers<[1], [0], [0], [1], [0, 0, 1, 1], [], []>} : vector<8x8xf32>, vector<8x8xf32>, vector<8x8xf32> -> vector<8x8xf32>
    %c8_172 = arith.constant 8 : index
    %c16_173 = arith.constant 16 : index
    %436 = vector.load %arg22[%c8_172, %c16_173] : memref<16x32xf32, #tpu.memory_space<vmem>>, vector<8x8xf32>
    tpu.vector_store %arg22[%c8_172, %c16_173], %435 {strides = array<i32>} : memref<16x32xf32, #tpu.memory_space<vmem>>, vector<8x8xf32>,
    %437 = vector.extract_strided_slice %375 {offsets = [0, 24], sizes = [8, 8], strides = [1, 1]} : vector<8x96xf32> to vector<8x8xf32>
    %438 = vector.extract_strided_slice %375 {offsets = [0, 56], sizes = [8, 8], strides = [1, 1]} : vector<8x96xf32> to vector<8x8xf32>
    %439 = vector.extract_strided_slice %375 {offsets = [0, 88], sizes = [8, 8], strides = [1, 1]} : vector<8x96xf32> to vector<8x8xf32>
    %cst_174 = arith.constant dense<0.000000e+00> : vector<8x8xf32>
    %440 = tpu.matmul %437, %438, %cst_174 {dimension_numbers = #tpu.dot_dimension_numbers<[1], [1], [0], [0], [0, 0, 1, 0], [], []>} : vector<8x8xf32>, vector<8x8xf32>, vector<8x8xf32> -> vector<8x8xf32>
    %cst_175 = arith.constant 0.353553385 : f32
    %441 = vector.broadcast %cst_175 : f32 to vector<8x8xf32>
    %442 = arith.mulf %440, %441 : vector<8x8xf32>
    %443 = vector.broadcast %376 : vector<1x8xf32> to vector<8x8xf32>
    %444 = arith.addf %442, %443 : vector<8x8xf32>
    %cst_176 = arith.constant dense<0xFF800000> : vector<8xf32>
    %445 = vector.multi_reduction <maximumf>, %444, %cst_176 [1] : vector<8x8xf32> to vector<8xf32>
    %446 = vector.shape_cast %445 : vector<8xf32> to vector<8x1xf32>
    %447 = vector.broadcast %446 : vector<8x1xf32> to vector<8x8xf32>
    %448 = arith.subf %444, %447 : vector<8x8xf32>
    %449 = math.exp %448 : vector<8x8xf32>
    %cst_177 = arith.constant dense<0.000000e+00> : vector<8xf32>
    %450 = vector.multi_reduction <add>, %449, %cst_177 [1] : vector<8x8xf32> to vector<8xf32>
    %451 = vector.shape_cast %450 : vector<8xf32> to vector<8x1xf32>
    %452 = tpu.reciprocal %451 {approx = true} : vector<8x1xf32> -> vector<8x1xf32>
    %453 = vector.broadcast %452 : vector<8x1xf32> to vector<8x8xf32>
    %454 = arith.mulf %449, %453 : vector<8x8xf32>
    %cst_178 = arith.constant dense<0.000000e+00> : vector<8x8xf32>
    %455 = tpu.matmul %454, %439, %cst_178 {dimension_numbers = #tpu.dot_dimension_numbers<[1], [0], [0], [1], [0, 0, 1, 1], [], []>} : vector<8x8xf32>, vector<8x8xf32>, vector<8x8xf32> -> vector<8x8xf32>
    %c8_179 = arith.constant 8 : index
    %c24_180 = arith.constant 24 : index
    %456 = vector.load %arg22[%c8_179, %c24_180] : memref<16x32xf32, #tpu.memory_space<vmem>>, vector<8x8xf32>
    tpu.vector_store %arg22[%c8_179, %c24_180], %455 {strides = array<i32>} : memref<16x32xf32, #tpu.memory_space<vmem>>, vector<8x8xf32>,
    %c0_181 = arith.constant 0 : index
    %c0_182 = arith.constant 0 : index
    %457 = vector.load %arg22[%c0_181, %c0_182] : memref<16x32xf32, #tpu.memory_space<vmem>>, vector<16x32xf32>
    %c1_183 = arith.constant 1 : index
    %c0_184 = arith.constant 0 : index
    %c0_185 = arith.constant 0 : index
    %458 = vector.load %arg7[%c1_183, %c0_184, %c0_185] : memref<2x32x32xbf16, #tpu.memory_space<vmem>>, vector<1x32x32xbf16>
    %459 = vector.shape_cast %458 : vector<1x32x32xbf16> to vector<32x32xbf16>
    %c1_186 = arith.constant 1 : index
    %c0_187 = arith.constant 0 : index
    %c0_188 = arith.constant 0 : index
    %460 = vector.load %arg8[%c1_186, %c0_187, %c0_188] : memref<2x1x32xf32, #tpu.memory_space<vmem>>, vector<1x1x32xf32>
    %461 = vector.shape_cast %460 : vector<1x1x32xf32> to vector<1x32xf32>
    %462 = arith.truncf %457 : vector<16x32xf32> to vector<16x32xbf16>
    %cst_189 = arith.constant dense<0.000000e+00> : vector<16x32xf32>
    %463 = tpu.matmul %462, %459, %cst_189 {dimension_numbers = #tpu.dot_dimension_numbers<[1], [0], [0], [1], [0, 0, 1, 1], [], []>} : vector<16x32xbf16>, vector<32x32xbf16>, vector<16x32xf32> -> vector<16x32xf32>
    %464 = vector.broadcast %461 : vector<1x32xf32> to vector<16x32xf32>
    %465 = arith.addf %463, %464 : vector<16x32xf32>
    %466 = arith.addf %465, %284 : vector<16x32xf32>
    %c1_190 = arith.constant 1 : index
    %c0_191 = arith.constant 0 : index
    %c0_192 = arith.constant 0 : index
    %467 = vector.load %arg9[%c1_190, %c0_191, %c0_192] : memref<2x1x32xf32, #tpu.memory_space<vmem>>, vector<1x1x32xf32>
    %468 = vector.shape_cast %467 : vector<1x1x32xf32> to vector<1x32xf32>
    %c1_193 = arith.constant 1 : index
    %c0_194 = arith.constant 0 : index
    %c0_195 = arith.constant 0 : index
    %469 = vector.load %arg10[%c1_193, %c0_194, %c0_195] : memref<2x1x32xf32, #tpu.memory_space<vmem>>, vector<1x1x32xf32>
    %470 = vector.shape_cast %469 : vector<1x1x32xf32> to vector<1x32xf32>
    %cst_196 = arith.constant dense<0.000000e+00> : vector<16xf32>
    %471 = vector.multi_reduction <add>, %466, %cst_196 [1] : vector<16x32xf32> to vector<16xf32>
    %472 = vector.shape_cast %471 : vector<16xf32> to vector<16x1xf32>
    %cst_197 = arith.constant 3.200000e+01 : f32
    %473 = vector.broadcast %cst_197 : f32 to vector<16x1xf32>
    %474 = arith.divf %472, %473 : vector<16x1xf32>
    %475 = vector.broadcast %474 : vector<16x1xf32> to vector<16x32xf32>
    %476 = arith.subf %466, %475 : vector<16x32xf32>
    %477 = arith.mulf %476, %476 : vector<16x32xf32>
    %cst_198 = arith.constant dense<0.000000e+00> : vector<16xf32>
    %478 = vector.multi_reduction <add>, %477, %cst_198 [1] : vector<16x32xf32> to vector<16xf32>
    %479 = vector.shape_cast %478 : vector<16xf32> to vector<16x1xf32>
    %cst_199 = arith.constant 3.200000e+01 : f32
    %480 = vector.broadcast %cst_199 : f32 to vector<16x1xf32>
    %481 = arith.divf %479, %480 : vector<16x1xf32>
    %482 = vector.broadcast %474 : vector<16x1xf32> to vector<16x32xf32>
    %483 = arith.subf %466, %482 : vector<16x32xf32>
    %cst_200 = arith.constant 9.99999996E-13 : f32
    %484 = vector.broadcast %cst_200 : f32 to vector<16x1xf32>
    %485 = arith.addf %481, %484 : vector<16x1xf32>
    %486 = math.rsqrt %485 : vector<16x1xf32>
    %487 = vector.broadcast %486 : vector<16x1xf32> to vector<16x32xf32>
    %488 = arith.mulf %483, %487 : vector<16x32xf32>
    %489 = vector.broadcast %468 : vector<1x32xf32> to vector<16x32xf32>
    %490 = arith.mulf %488, %489 : vector<16x32xf32>
    %491 = vector.broadcast %470 : vector<1x32xf32> to vector<16x32xf32>
    %492 = arith.addf %490, %491 : vector<16x32xf32>
    %c1_201 = arith.constant 1 : index
    %c0_202 = arith.constant 0 : index
    %c0_203 = arith.constant 0 : index
    %493 = vector.load %arg11[%c1_201, %c0_202, %c0_203] : memref<2x32x64xbf16, #tpu.memory_space<vmem>>, vector<1x32x64xbf16>
    %494 = vector.shape_cast %493 : vector<1x32x64xbf16> to vector<32x64xbf16>
    %c1_204 = arith.constant 1 : index
    %c0_205 = arith.constant 0 : index
    %c0_206 = arith.constant 0 : index
    %495 = vector.load %arg12[%c1_204, %c0_205, %c0_206] : memref<2x1x64xf32, #tpu.memory_space<vmem>>, vector<1x1x64xf32>
    %496 = vector.shape_cast %495 : vector<1x1x64xf32> to vector<1x64xf32>
    %497 = arith.truncf %492 : vector<16x32xf32> to vector<16x32xbf16>
    %cst_207 = arith.constant dense<0.000000e+00> : vector<16x64xf32>
    %498 = tpu.matmul %497, %494, %cst_207 {dimension_numbers = #tpu.dot_dimension_numbers<[1], [0], [0], [1], [0, 0, 1, 1], [], []>} : vector<16x32xbf16>, vector<32x64xbf16>, vector<16x64xf32> -> vector<16x64xf32>
    %499 = vector.broadcast %496 : vector<1x64xf32> to vector<16x64xf32>
    %500 = arith.addf %498, %499 : vector<16x64xf32>
    %cst_208 = arith.constant 5.000000e-01 : f32
    %501 = vector.broadcast %cst_208 : f32 to vector<16x64xf32>
    %502 = arith.mulf %501, %500 : vector<16x64xf32>
    %cst_209 = arith.constant 0.707106769 : f32
    %503 = vector.broadcast %cst_209 : f32 to vector<16x64xf32>
    %504 = arith.mulf %500, %503 : vector<16x64xf32>
    %505 = math.erf %504 : vector<16x64xf32>
    %cst_210 = arith.constant 1.000000e+00 : f32
    %506 = vector.broadcast %cst_210 : f32 to vector<16x64xf32>
    %507 = arith.addf %506, %505 : vector<16x64xf32>
    %508 = arith.mulf %502, %507 : vector<16x64xf32>
    %c1_211 = arith.constant 1 : index
    %c0_212 = arith.constant 0 : index
    %c0_213 = arith.constant 0 : index
    %509 = vector.load %arg13[%c1_211, %c0_212, %c0_213] : memref<2x64x32xbf16, #tpu.memory_space<vmem>>, vector<1x64x32xbf16>
    %510 = vector.shape_cast %509 : vector<1x64x32xbf16> to vector<64x32xbf16>
    %c1_214 = arith.constant 1 : index
    %c0_215 = arith.constant 0 : index
    %c0_216 = arith.constant 0 : index
    %511 = vector.load %arg14[%c1_214, %c0_215, %c0_216] : memref<2x1x32xf32, #tpu.memory_space<vmem>>, vector<1x1x32xf32>
    %512 = vector.shape_cast %511 : vector<1x1x32xf32> to vector<1x32xf32>
    %513 = arith.truncf %508 : vector<16x64xf32> to vector<16x64xbf16>
    %cst_217 = arith.constant dense<0.000000e+00> : vector<16x32xf32>
    %514 = tpu.matmul %513, %510, %cst_217 {dimension_numbers = #tpu.dot_dimension_numbers<[1], [0], [0], [1], [0, 0, 1, 1], [], []>} : vector<16x64xbf16>, vector<64x32xbf16>, vector<16x32xf32> -> vector<16x32xf32>
    %515 = vector.broadcast %512 : vector<1x32xf32> to vector<16x32xf32>
    %516 = arith.addf %514, %515 : vector<16x32xf32>
    %517 = arith.addf %516, %492 : vector<16x32xf32>
    %c1_218 = arith.constant 1 : index
    %c0_219 = arith.constant 0 : index
    %c0_220 = arith.constant 0 : index
    %518 = vector.load %arg15[%c1_218, %c0_219, %c0_220] : memref<2x1x32xf32, #tpu.memory_space<vmem>>, vector<1x1x32xf32>
    %519 = vector.shape_cast %518 : vector<1x1x32xf32> to vector<1x32xf32>
    %c1_221 = arith.constant 1 : index
    %c0_222 = arith.constant 0 : index
    %c0_223 = arith.constant 0 : index
    %520 = vector.load %arg16[%c1_221, %c0_222, %c0_223] : memref<2x1x32xf32, #tpu.memory_space<vmem>>, vector<1x1x32xf32>
    %521 = vector.shape_cast %520 : vector<1x1x32xf32> to vector<1x32xf32>
    %cst_224 = arith.constant dense<0.000000e+00> : vector<16xf32>
    %522 = vector.multi_reduction <add>, %517, %cst_224 [1] : vector<16x32xf32> to vector<16xf32>
    %523 = vector.shape_cast %522 : vector<16xf32> to vector<16x1xf32>
    %cst_225 = arith.constant 3.200000e+01 : f32
    %524 = vector.broadcast %cst_225 : f32 to vector<16x1xf32>
    %525 = arith.divf %523, %524 : vector<16x1xf32>
    %526 = vector.broadcast %525 : vector<16x1xf32> to vector<16x32xf32>
    %527 = arith.subf %517, %526 : vector<16x32xf32>
    %528 = arith.mulf %527, %527 : vector<16x32xf32>
    %cst_226 = arith.constant dense<0.000000e+00> : vector<16xf32>
    %529 = vector.multi_reduction <add>, %528, %cst_226 [1] : vector<16x32xf32> to vector<16xf32>
    %530 = vector.shape_cast %529 : vector<16xf32> to vector<16x1xf32>
    %cst_227 = arith.constant 3.200000e+01 : f32
    %531 = vector.broadcast %cst_227 : f32 to vector<16x1xf32>
    %532 = arith.divf %530, %531 : vector<16x1xf32>
    %533 = vector.broadcast %525 : vector<16x1xf32> to vector<16x32xf32>
    %534 = arith.subf %517, %533 : vector<16x32xf32>
    %cst_228 = arith.constant 9.99999996E-13 : f32
    %535 = vector.broadcast %cst_228 : f32 to vector<16x1xf32>
    %536 = arith.addf %532, %535 : vector<16x1xf32>
    %537 = math.rsqrt %536 : vector<16x1xf32>
    %538 = vector.broadcast %537 : vector<16x1xf32> to vector<16x32xf32>
    %539 = arith.mulf %534, %538 : vector<16x32xf32>
    %540 = vector.broadcast %519 : vector<1x32xf32> to vector<16x32xf32>
    %541 = arith.mulf %539, %540 : vector<16x32xf32>
    %542 = vector.broadcast %521 : vector<1x32xf32> to vector<16x32xf32>
    %543 = arith.addf %541, %542 : vector<16x32xf32>
    %544 = vector.extract_strided_slice %543 {offsets = [0, 0], sizes = [1, 32], strides = [1, 1]} : vector<16x32xf32> to vector<1x32xf32>
    %c0_229 = arith.constant 0 : index
    %c0_230 = arith.constant 0 : index
    %545 = vector.load %arg17[%c0_229, %c0_230] : memref<32x32xbf16, #tpu.memory_space<vmem>>, vector<32x32xbf16>
    %c0_231 = arith.constant 0 : index
    %c0_232 = arith.constant 0 : index
    %546 = vector.load %arg18[%c0_231, %c0_232] : memref<1x32xf32, #tpu.memory_space<vmem>>, vector<1x32xf32>
    %547 = arith.truncf %544 : vector<1x32xf32> to vector<1x32xbf16>
    %cst_233 = arith.constant dense<0.000000e+00> : vector<1x32xf32>
    %548 = tpu.matmul %547, %545, %cst_233 {dimension_numbers = #tpu.dot_dimension_numbers<[1], [0], [0], [1], [0, 0, 1, 1], [], []>} : vector<1x32xbf16>, vector<32x32xbf16>, vector<1x32xf32> -> vector<1x32xf32>
    %549 = arith.addf %548, %546 : vector<1x32xf32>
    %550 = math.tanh %549 : vector<1x32xf32>
    %c0_234 = arith.constant 0 : index
    %c0_235 = arith.constant 0 : index
    %551 = vector.load %arg19[%c0_234, %c0_235] : memref<32x128xbf16, #tpu.memory_space<vmem>>, vector<32x128xbf16>
    %c0_236 = arith.constant 0 : index
    %c0_237 = arith.constant 0 : index
    %552 = vector.load %arg20[%c0_236, %c0_237] : memref<1x128xf32, #tpu.memory_space<vmem>>, vector<1x128xf32>
    %553 = arith.truncf %550 : vector<1x32xf32> to vector<1x32xbf16>
    %cst_238 = arith.constant dense<0.000000e+00> : vector<1x128xf32>
    %554 = tpu.matmul %553, %551, %cst_238 {dimension_numbers = #tpu.dot_dimension_numbers<[1], [0], [0], [1], [0, 0, 1, 1], [], []>} : vector<1x32xbf16>, vector<32x128xbf16>, vector<1x128xf32> -> vector<1x128xf32>
    %555 = arith.addf %554, %552 : vector<1x128xf32>
    %c0_239 = arith.constant 0 : index
    %c0_240 = arith.constant 0 : index
    %556 = vector.load %arg21[%c0_239, %c0_240] : memref<2x128xf32, #tpu.memory_space<vmem>>, vector<1x128xf32>
    tpu.vector_store %arg21[%c0_239, %c0_240], %555 {strides = array<i32>} : memref<2x128xf32, #tpu.memory_space<vmem>>, vector<1x128xf32>,
    %557 = vector.extract_strided_slice %543 {offsets = [8, 0], sizes = [1, 32], strides = [1, 1]} : vector<16x32xf32> to vector<1x32xf32>
    %c0_241 = arith.constant 0 : index
    %c0_242 = arith.constant 0 : index
    %558 = vector.load %arg17[%c0_241, %c0_242] : memref<32x32xbf16, #tpu.memory_space<vmem>>, vector<32x32xbf16>
    %c0_243 = arith.constant 0 : index
    %c0_244 = arith.constant 0 : index
    %559 = vector.load %arg18[%c0_243, %c0_244] : memref<1x32xf32, #tpu.memory_space<vmem>>, vector<1x32xf32>
    %560 = arith.truncf %557 : vector<1x32xf32> to vector<1x32xbf16>
    %cst_245 = arith.constant dense<0.000000e+00> : vector<1x32xf32>
    %561 = tpu.matmul %560, %558, %cst_245 {dimension_numbers = #tpu.dot_dimension_numbers<[1], [0], [0], [1], [0, 0, 1, 1], [], []>} : vector<1x32xbf16>, vector<32x32xbf16>, vector<1x32xf32> -> vector<1x32xf32>
    %562 = arith.addf %561, %559 : vector<1x32xf32>
    %563 = math.tanh %562 : vector<1x32xf32>
    %c0_246 = arith.constant 0 : index
    %c0_247 = arith.constant 0 : index
    %564 = vector.load %arg19[%c0_246, %c0_247] : memref<32x128xbf16, #tpu.memory_space<vmem>>, vector<32x128xbf16>
    %c0_248 = arith.constant 0 : index
    %c0_249 = arith.constant 0 : index
    %565 = vector.load %arg20[%c0_248, %c0_249] : memref<1x128xf32, #tpu.memory_space<vmem>>, vector<1x128xf32>
    %566 = arith.truncf %563 : vector<1x32xf32> to vector<1x32xbf16>
    %cst_250 = arith.constant dense<0.000000e+00> : vector<1x128xf32>
    %567 = tpu.matmul %566, %564, %cst_250 {dimension_numbers = #tpu.dot_dimension_numbers<[1], [0], [0], [1], [0, 0, 1, 1], [], []>} : vector<1x32xbf16>, vector<32x128xbf16>, vector<1x128xf32> -> vector<1x128xf32>
    %568 = arith.addf %567, %565 : vector<1x128xf32>
    %c1_251 = arith.constant 1 : index
    %c0_252 = arith.constant 0 : index
    %569 = vector.load %arg21[%c1_251, %c0_252] : memref<2x128xf32, #tpu.memory_space<vmem>>, vector<1x128xf32>
    tpu.vector_store %arg21[%c1_251, %c0_252], %568 {strides = array<i32>} : memref<2x128xf32, #tpu.memory_space<vmem>>, vector<1x128xf32>,
    return
  }
  func.func @transform_0(%arg0: i32) -> (i32, i32) {
    %c0_i32 = arith.constant 0 : i32
    %c0_i32_0 = arith.constant 0 : i32
    %c0_i32_1 = arith.constant 0 : i32
    return %c0_i32, %c0_i32_0 : i32, i32
  }
  func.func @transform_1(%arg0: i32) -> (i32, i32) {
    %c0_i32 = arith.constant 0 : i32
    %c0_i32_0 = arith.constant 0 : i32
    %c0_i32_1 = arith.constant 0 : i32
    return %c0_i32, %c0_i32_0 : i32, i32
  }
  func.func @transform_2(%arg0: i32) -> (i32, i32) {
    %c0_i32 = arith.constant 0 : i32
    %c0_i32_0 = arith.constant 0 : i32
    %c0_i32_1 = arith.constant 0 : i32
    return %c0_i32, %c0_i32_0 : i32, i32
  }
  func.func @transform_3(%arg0: i32) -> (i32, i32) {
    %c0_i32 = arith.constant 0 : i32
    %c0_i32_0 = arith.constant 0 : i32
    %c0_i32_1 = arith.constant 0 : i32
    return %c0_i32, %c0_i32_0 : i32, i32
  }
  func.func @transform_4(%arg0: i32) -> (i32, i32, i32) {
    %c0_i32 = arith.constant 0 : i32
    %c0_i32_0 = arith.constant 0 : i32
    %c0_i32_1 = arith.constant 0 : i32
    %c0_i32_2 = arith.constant 0 : i32
    return %c0_i32, %c0_i32_0, %c0_i32_1 : i32, i32, i32
  }
  func.func @transform_5(%arg0: i32) -> (i32, i32, i32) {
    %c0_i32 = arith.constant 0 : i32
    %c0_i32_0 = arith.constant 0 : i32
    %c0_i32_1 = arith.constant 0 : i32
    %c0_i32_2 = arith.constant 0 : i32
    return %c0_i32, %c0_i32_0, %c0_i32_1 : i32, i32, i32
  }
  func.func @transform_6(%arg0: i32) -> (i32, i32, i32) {
    %c0_i32 = arith.constant 0 : i32
    %c0_i32_0 = arith.constant 0 : i32
    %c0_i32_1 = arith.constant 0 : i32
    %c0_i32_2 = arith.constant 0 : i32
    return %c0_i32, %c0_i32_0, %c0_i32_1 : i32, i32, i32
  }
  func.func @transform_7(%arg0: i32) -> (i32, i32, i32) {
    %c0_i32 = arith.constant 0 : i32
    %c0_i32_0 = arith.constant 0 : i32
    %c0_i32_1 = arith.constant 0 : i32
    %c0_i32_2 = arith.constant 0 : i32
    return %c0_i32, %c0_i32_0, %c0_i32_1 : i32, i32, i32
  }
  func.func @transform_8(%arg0: i32) -> (i32, i32, i32) {
    %c0_i32 = arith.constant 0 : i32
    %c0_i32_0 = arith.constant 0 : i32
    %c0_i32_1 = arith.constant 0 : i32
    %c0_i32_2 = arith.constant 0 : i32
    return %c0_i32, %c0_i32_0, %c0_i32_1 : i32, i32, i32
  }
  func.func @transform_9(%arg0: i32) -> (i32, i32, i32) {
    %c0_i32 = arith.constant 0 : i32
    %c0_i32_0 = arith.constant 0 : i32
    %c0_i32_1 = arith.constant 0 : i32
    %c0_i32_2 = arith.constant 0 : i32
    return %c0_i32, %c0_i32_0, %c0_i32_1 : i32, i32, i32
  }
  func.func @transform_10(%arg0: i32) -> (i32, i32, i32) {
    %c0_i32 = arith.constant 0 : i32
    %c0_i32_0 = arith.constant 0 : i32
    %c0_i32_1 = arith.constant 0 : i32
    %c0_i32_2 = arith.constant 0 : i32
    return %c0_i32, %c0_i32_0, %c0_i32_1 : i32, i32, i32
  }
  func.func @transform_11(%arg0: i32) -> (i32, i32, i32) {
    %c0_i32 = arith.constant 0 : i32
    %c0_i32_0 = arith.constant 0 : i32
    %c0_i32_1 = arith.constant 0 : i32
    %c0_i32_2 = arith.constant 0 : i32
    return %c0_i32, %c0_i32_0, %c0_i32_1 : i32, i32, i32
  }
  func.func @transform_12(%arg0: i32) -> (i32, i32, i32) {
    %c0_i32 = arith.constant 0 : i32
    %c0_i32_0 = arith.constant 0 : i32
    %c0_i32_1 = arith.constant 0 : i32
    %c0_i32_2 = arith.constant 0 : i32
    return %c0_i32, %c0_i32_0, %c0_i32_1 : i32, i32, i32
  }
  func.func @transform_13(%arg0: i32) -> (i32, i32, i32) {
    %c0_i32 = arith.constant 0 : i32
    %c0_i32_0 = arith.constant 0 : i32
    %c0_i32_1 = arith.constant 0 : i32
    %c0_i32_2 = arith.constant 0 : i32
    return %c0_i32, %c0_i32_0, %c0_i32_1 : i32, i32, i32
  }
  func.func @transform_14(%arg0: i32) -> (i32, i32, i32) {
    %c0_i32 = arith.constant 0 : i32
    %c0_i32_0 = arith.constant 0 : i32
    %c0_i32_1 = arith.constant 0 : i32
    %c0_i32_2 = arith.constant 0 : i32
    return %c0_i32, %c0_i32_0, %c0_i32_1 : i32, i32, i32
  }
  func.func @transform_15(%arg0: i32) -> (i32, i32, i32) {
    %c0_i32 = arith.constant 0 : i32
    %c0_i32_0 = arith.constant 0 : i32
    %c0_i32_1 = arith.constant 0 : i32
    %c0_i32_2 = arith.constant 0 : i32
    return %c0_i32, %c0_i32_0, %c0_i32_1 : i32, i32, i32
  }
  func.func @transform_16(%arg0: i32) -> (i32, i32) {
    %c0_i32 = arith.constant 0 : i32
    %c0_i32_0 = arith.constant 0 : i32
    %c0_i32_1 = arith.constant 0 : i32
    return %c0_i32, %c0_i32_0 : i32, i32
  }
  func.func @transform_17(%arg0: i32) -> (i32, i32) {
    %c0_i32 = arith.constant 0 : i32
    %c0_i32_0 = arith.constant 0 : i32
    %c0_i32_1 = arith.constant 0 : i32
    return %c0_i32, %c0_i32_0 : i32, i32
  }
  func.func @transform_18(%arg0: i32) -> (i32, i32) {
    %c0_i32 = arith.constant 0 : i32
    %c0_i32_0 = arith.constant 0 : i32
    %c0_i32_1 = arith.constant 0 : i32
    return %c0_i32, %c0_i32_0 : i32, i32
  }
  func.func @transform_19(%arg0: i32) -> (i32, i32) {
    %c0_i32 = arith.constant 0 : i32
    %c0_i32_0 = arith.constant 0 : i32
    %c0_i32_1 = arith.constant 0 : i32
    return %c0_i32, %c0_i32_0 : i32, i32
  }
  func.func @transform_20(%arg0: i32) -> (i32, i32) {
    %c0_i32 = arith.constant 0 : i32
    %c0_i32_0 = arith.constant 0 : i32
    %c0_i32_1 = arith.constant 0 : i32
    return %c0_i32, %c0_i32_0 : i32, i32
  }
}

</mosaic_0001>

<bundles_post_ra>
// kernel: _lambda_.1
= control target key start
LH: loop header
LB: loop body
LE: loop exit
PB: predicated region body
PF: predicated region fallthrough
CT: control target
= control target key end

     0   :  { %s5324_s0 = inlined_call_operand.vmem [shape: f32[16,32], index: 0, kind: input, shape index: {}]   ;;  %s5325_s1 = inlined_call_operand.vmem [shape: f32[2,8], index: 1, kind: input, shape index: {}]   ;;  %s5326_s2 = inlined_call_operand.vmem [shape: f32[1,32], index: 2, kind: input, shape index: {}]   ;;  %s5327_s3 = inlined_call_operand.vmem [shape: f32[1,32], index: 3, kind: input, shape index: {}]   ;;  %s5328_s4 = inlined_call_operand.vmem [shape: bf16[2,32,96], index: 4, kind: input, shape index: {}]   ;;  %s5329_s5 = inlined_call_operand.vmem [shape: f32[2,1,96], index: 5, kind: input, shape index: {}]   ;;  %s5330_s6 = inlined_call_operand.vmem [shape: bf16[2,32,32], index: 6, kind: input, shape index: {}]   ;;  %s5331_s7 = inlined_call_operand.vmem [shape: f32[2,1,32], index: 7, kind: input, shape index: {}]   ;;  %s5332_s8 = inlined_call_operand.vmem [shape: f32[2,1,32], index: 8, kind: input, shape index: {}]   ;;  %s5333_s9 = inlined_call_operand.vmem [shape: f32[2,1,32], index: 9, kind: input, shape index: {}]   ;;  %s5334_s10 = inlined_call_operand.vmem [shape: bf16[2,32,64], index: 10, kind: input, shape index: {}]   ;;  %s5335_s11 = inlined_call_operand.vmem [shape: f32[2,1,64], index: 11, kind: input, shape index: {}]   ;;  %s5336_s12 = inlined_call_operand.vmem [shape: bf16[2,64,32], index: 12, kind: input, shape index: {}]   ;;  %s5337_s13 = inlined_call_operand.vmem [shape: f32[2,1,32], index: 13, kind: input, shape index: {}]   ;;  %s5338_s14 = inlined_call_operand.vmem [shape: f32[2,1,32], index: 14, kind: input, shape index: {}]   ;;  %s5339_s15 = inlined_call_operand.vmem [shape: f32[2,1,32], index: 15, kind: input, shape index: {}]   ;;  %s5340_s16 = inlined_call_operand.vmem [shape: bf16[32,32], index: 16, kind: input, shape index: {}]   ;;  %s5341_s17 = inlined_call_operand.vmem [shape: f32[1,32], index: 17, kind: input, shape index: {}]   ;;  %s5342_s18 = inlined_call_operand.vmem [shape: bf16[32,128], index: 18, kind: input, shape index: {}]   ;;  %s5343_s19 = inlined_call_operand.vmem [shape: f32[1,128], index: 19, kind: input, shape index: {}]   ;;  %s5344_s20 = inlined_call_operand.hbm [shape: f32[2,128], index: 20, kind: output, shape index: {}]  }
   0x1   :  { %5361 = sst [smem:[#allocation6_spill]] %s5324_s0 }
   0x2   :  { %5362 = sst [smem:[#allocation7_spill]] %s5325_s1 }
   0x3   :  { %5363 = sst [smem:[#allocation8_spill]] %s5326_s2 }
   0x4   :  { %5364 = sst [smem:[#allocation9_spill]] %s5327_s3 }
   0x5   :  { %5365 = sst [smem:[#allocation10_spill]] %s5328_s4 }
   0x6   :  { %s5366_s23 = sld [smem:[#allocation6_spill]]  ;;  %vm72_vm0 = vcmask 261120  }
   0xc   :  { %v68_v0 = vld [vmem:[%s5366_s23] sm:$0xff]  ;;  %v69_v1 = vld [vmem:[%s5366_s23 + $0x8] sm:$0xff] }
   0xd   :  { %v73_v2 = vsel %vm72_vm0, %v68_v0, 0.0  ;;  %v76_v3 = vsel %vm72_vm0, %v69_v1, 0.0 }
   0xe   :  { %74 = vadd.xlane.f32.xlu0 %v73_v2 }
  0x12   :  { %77 = vadd.xlane.f32.xlu0 %v76_v3 }
  0x13   :  { %25 = vsyncpa [#allocation4], 0  ;;  %s5367_s26 = sld [smem:[#allocation10_spill]]  ;;  %v4584_v15 = vmov 0.0   ;;  %vm4585_vm1 = vmmov 0   ;;  %s4586_s24 = smov 96   ;;  %v263_v42 = vlaneseq }
  0x14   :  { %4157 = vmatprep.subr.bf16.mxu0 %v4584_v15  ;;  %4161 = vmatprep.mubr.msk.bf16.mxu0 %vm4585_vm1, %v4584_v15  ;;  %s5368_s30 = sld [smem:[#allocation8_spill]]  ;;  %v3921_v34 = vld [vmem:[%s5329_s5] ss:$0 sm:$0xff]  ;;  %s4587_s2 = smov 88   ;;  %vm187_vm2 = vcmask 64512   ;;  %vm527_vm3 = vcmask 130112  }
  0x15   :  { %4165 = vmatprep.subr.mxu1 %v4584_v15  ;;  %4167 = vmatprep.mubr.msk.f32.mxu1 %vm4585_vm1, %v4584_v15  ;;  %s5369_s1 = sld [smem:[#allocation9_spill]]  ;;  %s4588_s25 = smov 80   ;;  %v4774_v43 = vshrl.u32 %v263_v42, 7  ;;  %vm700_vm4 = vcmask 195712   ;;  %vm873_vm5 = vcmask 261312   ;;  %vm1796_vm6 = vcmask 523264  }
  0x16   :  { %s4589_s3 = smov 72   ;;  %s4590_s27 = smov 120  }
  0x17   :  { %s4591_s28 = smov 112   ;;  %s4592_s4 = smov 104   ;;  %v265_v44 = vsub.s32 0, %v4774_v43 }
  0x18   :  { %s5370_s0 = sld [smem:[#allocation7_spill]]  ;;  %s5353_s21 = smov 64  }
  0x19   :  { %v4438_v14 = vld [vmem:[%s5367_s26 + $0x8] sm:$0xff]   ;;  %v4439_v16 = vld [vmem:[%s5367_s26] sm:$0xff]   ;;  %s5349_s22 = smov 40   ;;  %s5351_s23 = smov 48  }
  0x1a   :  { %4158 = vmatpush3.bf16.msra.mxu0 %v4438_v14  ;;  %v3919_v25 = vld [vmem:[%s5368_s30] ss:$0 sm:$0xff]  ;;  %s5359_s29 = smov 8   ;;  %s5357_s30 = smov 16  }
  0x1b   :  { %4159 = vmatprep.subr.bf16.mxu0 %v4584_v15  ;;  %v3920_v29 = vld [vmem:[%s5369_s1] ss:$0 sm:$0xff]  ;;  %s5347_s1 = smov 56  }
  0x1e   :  { %4160 = vmatpush3.bf16.msra.mxu0 %v4439_v16  ;;  %v4780_v45 = vld [vmem:[%s5370_s0] sm:$0x3]  ;;  %s5355_s0 = smov 24  }
  0x1f   :  { %4180 = vmatprep.subr.mxu0 %v4584_v15  ;;  %v4783_v46 = vrot.slane %v4780_v45, %v265_v44 }
  0x97   :  { %v75_v4 = vpop.xlane.xlu0 %74 }
  0x98   :  { %v80_v5 = vmul.f32 0.03125, %v75_v4 }
  0x9a   :  { %v82_v6 = vsub.f32 %v68_v0, %v80_v5 }
  0x9b   :  { %v78_v7 = vpop.xlane.xlu0 %77 }
  0x9c   :  { %v81_v8 = vmul.f32 0.03125, %v78_v7  ;;  %v84_v9 = vmul.f32 %v82_v6, %v82_v6 }
  0x9e   :  { %v83_v10 = vsub.f32 %v69_v1, %v81_v8  ;;  %v86_v11 = vsel %vm72_vm0, %v84_v9, 0.0 }
  0x9f   :  { %87 = vadd.xlane.f32.xlu1 %v86_v11 }
  0xa0   :  { %v85_v12 = vmul.f32 %v83_v10, %v83_v10 }
  0xa2   :  { %v89_v13 = vsel %vm72_vm0, %v85_v12, 0.0 }
  0xa3   :  { %90 = vadd.xlane.f32.xlu1 %v89_v13 }
 0x128   :  { %v88_v17 = vpop.xlane.xlu1 %87 }
 0x129   :  { %v92_v18 = vmul.f32 0.03125, %v88_v17 }
 0x12b   :  { %v94_v19 = vadd.f32 1e-12, %v92_v18 }
 0x12c   :  { %v91_v20 = vpop.xlane.xlu1 %90 }
 0x12d   :  { %4466 = vrsqrt.f32 %v94_v19  ;;  %v93_v21 = vmul.f32 0.03125, %v91_v20 }
 0x12f   :  { %v95_v22 = vadd.f32 1e-12, %v93_v21 }
 0x131   :  { %4468 = vrsqrt.f32 %v95_v22  ;;  %v955_v22 = vsub.s32 1, %v4774_v43 }
 0x13a   :  { %v4467_v23 = vpop.eup %4466 }
 0x13b   :  { %v98_v24 = vmul.f32 %v4467_v23, %v82_v6 }
 0x13d   :  { %v106_v28 = vmul.f32 %v3919_v25, %v98_v24 }
 0x13e   :  { %v4469_v26 = vpop.eup %4468 }
 0x13f   :  { %v99_v27 = vmul.f32 %v4469_v26, %v83_v10  ;;  %v4736_v31 = vadd.f32 %v3920_v29, %v106_v28  ;;  %v4850_v28 = vrot.slane %v4780_v45, %v955_v22 }
 0x141   :  { %v107_v30 = vmul.f32 %v3919_v25, %v99_v27 }
 0x143   :  { %v4738_v32 = vadd.f32 %v3920_v29, %v107_v30 }
 0x145   :  { %v121_v33 = vpack.c.bf16 %v4738_v32, %v4736_v31 }
 0x147   :  { %4162 = vmatmul.mubr.msk.bf16.vlgmr.msra.gmra.mxu0 %vm72_vm0, %v121_v33 }
 0x148   :  { %4182 = vmatprep.mubr.msk.f32.mxu0 %vm4585_vm1, %v4584_v15 }
 0x207   :  { %v177_v35 = vpop.f32.mrf.mxu0 }
 0x208   :  { %v4748_v36 = vadd.f32 %v3921_v34, %v177_v35 }
 0x209   :  { %v4163_v37 = vpop.f32.mrf.mxu0 }
 0x20a   :  { %185 = vrot.lane.b32.xlu0 %v4748_v36, %s4586_s24 }
 0x20b   :  { %v180_v38 = vpop.f32.mrf.mxu0 }
 0x20c   :  { %v4758_v40 = vadd.f32 %v3921_v34, %v180_v38 }
 0x20d   :  { %v4164_v39 = vpop.f32.mrf.mxu0 }
 0x20e   :  { %358 = vrot.lane.b32.xlu0 %v4748_v36, %s4587_s2 }
 0x212   :  { %531 = vrot.lane.b32.xlu0 %v4748_v36, %s4588_s25 }
 0x216   :  { %704 = vrot.lane.b32.xlu0 %v4748_v36, %s4589_s3 }
 0x21a   :  { %876 = vrot.lane.b32.xlu0 %v4758_v40, %s4586_s24 }
 0x21e   :  { %1046 = vrot.lane.b32.xlu0 %v4758_v40, %s4590_s27 }
 0x222   :  { %1218 = vrot.lane.b32.xlu0 %v4758_v40, %s4591_s28 }
 0x226   :  { %1390 = vrot.lane.b32.xlu0 %v4758_v40, %s4592_s4 }
 0x27c   :  { %v186_v41 = vpop.permute.xlu0 %185 }
 0x27d   :  { %4166 = vmatpush3.xpose.msk.msra.mxu1 %vm187_vm2, %v186_v41 }
 0x27e   :  { %4170 = vmatprep.subr.mxu1 %v4584_v15 }
 0x280   :  { %4168 = vmatmul.mubr.msk.f32.vlgmr.msra.gmra.mxu1 %vm187_vm2, %v4748_v36  ;;  %v359_v60 = vpop.permute.xlu0 %358 }
 0x281   :  { %4172 = vmatprep.mubr.msk.f32.mxu1 %vm4585_vm1, %v4584_v15 }
 0x284   :  { %v532_v62 = vpop.permute.xlu0 %531 }
 0x288   :  { %v705_v1 = vpop.permute.xlu0 %704 }
 0x28c   :  { %v877_v3 = vpop.permute.xlu0 %876 }
 0x290   :  { %v1047_v5 = vpop.permute.xlu0 %1046 }
 0x294   :  { %v1219_v7 = vpop.permute.xlu0 %1218 }
 0x298   :  { %v1391_v9 = vpop.permute.xlu0 %1390 }
 0x340   :  { %v258_v47 = vpop.f32.mrf.mxu1 }
 0x341   :  { %v262_v48 = vmul.f32 0.35355338, %v258_v47 }
 0x342   :  { %v4169_v49 = vpop.f32.mrf.mxu1 }
 0x343   :  { %v267_v50 = vadd.f32 %v4783_v46, %v262_v48 }
 0x345   :  { %v268_v51 = vsel %vm187_vm2, %v267_v50, -inf }
 0x346   :  { %269 = vmax.xlane.f32.xlu1 %v268_v51 }
 0x357   :  { %279 = vrot.lane.b32.xlu1 %v4748_v36, %s5353_s21 }
 0x35b   :  { %356 = vrot.lane.b32.xlu1 %v4748_v36, %s4590_s27 }
 0x3cf   :  { %v270_v52 = vpop.xlane.xlu1 %269 }
 0x3d0   :  { %v271_v53 = vsub.f32 %v267_v50, %v270_v52 }
 0x3d2   :  { %v272_v54 = vmul.f32 1.442695, %v271_v53 }
 0x3d3   :  { %v280_v55 = vpop.permute.xlu1 %279 }
 0x3d4   :  { %4470 = vpow2.f32 %v272_v54  ;;  %4171 = vmatpush3.msra.mxu1 %v280_v55 }
 0x3d5   :  { %4175 = vmatprep.subr.mxu1 %v4584_v15 }
 0x3d7   :  { %v357_v58 = vpop.permute.xlu1 %356 }
 0x3e1   :  { %v4471_v56 = vpop.eup %4470 }
 0x3e2   :  { %v274_v57 = vsel %vm187_vm2, %v4471_v56, 0.0 }
 0x3e3   :  { %275 = vadd.xlane.f32.xlu1 %v274_v57 }
 0x3f4   :  { %529 = vrot.lane.b32.xlu1 %v4748_v36, %s4591_s28 }
 0x3f8   :  { %702 = vrot.lane.b32.xlu1 %v4748_v36, %s4592_s4 }
 0x3fc   :  { %1048 = vrot.lane.b32.xlu1 %v4758_v40, %s4587_s2 }
 0x400   :  { %1220 = vrot.lane.b32.xlu1 %v4758_v40, %s4588_s25 }
 0x404   :  { %1392 = vrot.lane.b32.xlu1 %v4758_v40, %s4589_s3 }
 0x46c   :  { %v276_v59 = vpop.xlane.xlu1 %275 }
 0x46d   :  { %4472 = vrcp.f32 %v276_v59 }
 0x470   :  { %v530_v0 = vpop.permute.xlu1 %529 }
 0x474   :  { %v703_v2 = vpop.permute.xlu1 %702 }
 0x478   :  { %v1049_v4 = vpop.permute.xlu1 %1048 }
 0x47a   :  { %v4473_v61 = vpop.eup %4472 }
 0x47b   :  { %v278_v63 = vmul.f32 %v4473_v61, %v4471_v56 }
 0x47c   :  { %v1221_v6 = vpop.permute.xlu1 %1220 }
 0x47d   :  { %4173 = vmatmul.mubr.msk.f32.vlgmr.msra.gmra.mxu1 %vm187_vm2, %v278_v63 }
 0x47e   :  { %4176 = vmatpush3.xpose.msk.msra.mxu1 %vm187_vm2, %v359_v60  ;;  %4177 = vmatprep.mubr.msk.f32.mxu1 %vm4585_vm1, %v4584_v15 }
 0x47f   :  { %4185 = vmatprep.subr.mxu1 %v4584_v15 }
 0x480   :  { %v1393_v8 = vpop.permute.xlu1 %1392 }
 0x481   :  { %4178 = vmatmul.mubr.msk.f32.vlgmr.msra.gmra.mxu1 %vm187_vm2, %v357_v58 }
 0x482   :  { %4186 = vmatpush3.xpose.msk.msra.mxu1 %vm187_vm2, %v532_v62  ;;  %4187 = vmatprep.mubr.msk.f32.mxu1 %vm4585_vm1, %v4584_v15 }
 0x483   :  { %4195 = vmatprep.subr.mxu1 %v4584_v15 }
 0x485   :  { %4188 = vmatmul.mubr.msk.f32.vlgmr.msra.gmra.mxu1 %vm187_vm2, %v530_v0 }
 0x486   :  { %4196 = vmatpush3.xpose.msk.msra.mxu1 %vm187_vm2, %v705_v1  ;;  %4197 = vmatprep.mubr.msk.f32.mxu1 %vm4585_vm1, %v4584_v15 }
 0x487   :  { %4205 = vmatprep.subr.mxu1 %v4584_v15 }
 0x489   :  { %4198 = vmatmul.mubr.msk.f32.vlgmr.msra.gmra.mxu1 %vm187_vm2, %v703_v2 }
 0x48a   :  { %4206 = vmatpush3.xpose.msk.msra.mxu1 %vm187_vm2, %v877_v3  ;;  %4207 = vmatprep.mubr.msk.f32.mxu1 %vm4585_vm1, %v4584_v15 }
 0x48b   :  { %4215 = vmatprep.subr.mxu1 %v4584_v15 }
 0x48d   :  { %4208 = vmatmul.mubr.msk.f32.vlgmr.msra.gmra.mxu1 %vm187_vm2, %v4758_v40 }
 0x48e   :  { %4216 = vmatpush3.xpose.msk.msra.mxu1 %vm187_vm2, %v1049_v4  ;;  %4217 = vmatprep.mubr.msk.f32.mxu1 %vm4585_vm1, %v4584_v15 }
 0x48f   :  { %4225 = vmatprep.subr.mxu1 %v4584_v15 }
 0x491   :  { %4218 = vmatmul.mubr.msk.f32.vlgmr.msra.gmra.mxu1 %vm187_vm2, %v1047_v5 }
 0x492   :  { %4226 = vmatpush3.xpose.msk.msra.mxu1 %vm187_vm2, %v1221_v6  ;;  %4227 = vmatprep.mubr.msk.f32.mxu1 %vm4585_vm1, %v4584_v15 }
 0x493   :  { %4235 = vmatprep.subr.mxu1 %v4584_v15 }
 0x495   :  { %4228 = vmatmul.mubr.msk.f32.vlgmr.msra.gmra.mxu1 %vm187_vm2, %v1219_v7 }
 0x496   :  { %4236 = vmatpush3.xpose.msk.msra.mxu1 %vm187_vm2, %v1393_v8  ;;  %4237 = vmatprep.mubr.msk.f32.mxu1 %vm4585_vm1, %v4584_v15 }
 0x497   :  { %4245 = vmatprep.subr.bf16.mxu1 %v4584_v15 }
 0x499   :  { %4238 = vmatmul.mubr.msk.f32.vlgmr.msra.gmra.mxu1 %vm187_vm2, %v1391_v9 }
 0x49a   :  { %4249 = vmatprep.mubr.msk.bf16.mxu1 %vm4585_vm1, %v4584_v15 }
 0x53d   :  { %v351_v10 = vpop.f32.mrf.mxu1 }
 0x53e   :  { %355 = vst.msk [vmem:[#allocation2] sm:$0xff] %vm187_vm2, %v351_v10 }
 0x53f   :  { %v4174_v11 = vpop.f32.mrf.mxu1 }
 0x541   :  { %v430_v12 = vpop.f32.mrf.mxu1 }
 0x542   :  { %v434_v13 = vmul.f32 0.35355338, %v430_v12 }
 0x543   :  { %v4179_v14 = vpop.f32.mrf.mxu1 }
 0x544   :  { %v435_v16 = vadd.f32 %v434_v13, %v4783_v46 }
 0x545   :  { %v603_v17 = vpop.f32.mrf.mxu1 }
 0x546   :  { %v607_v18 = vmul.f32 0.35355338, %v603_v17  ;;  %v436_v19 = vsel %vm187_vm2, %v435_v16, -inf }
 0x547   :  { %437 = vmax.xlane.f32.xlu1 %v436_v19  ;;  %v4189_v20 = vpop.f32.mrf.mxu1 }
 0x548   :  { %v608_v21 = vadd.f32 %v607_v18, %v4783_v46 }
 0x549   :  { %v776_v23 = vpop.f32.mrf.mxu1 }
 0x54a   :  { %v780_v24 = vmul.f32 0.35355338, %v776_v23  ;;  %v609_v25 = vsel %vm187_vm2, %v608_v21, -inf }
 0x54b   :  { %610 = vmax.xlane.f32.xlu0 %v609_v25  ;;  %v4199_v26 = vpop.f32.mrf.mxu1 }
 0x54c   :  { %v781_v27 = vadd.f32 %v780_v24, %v4783_v46 }
 0x54d   :  { %v948_v29 = vpop.f32.mrf.mxu1 }
 0x54e   :  { %v952_v30 = vmul.f32 0.35355338, %v948_v29  ;;  %v782_v33 = vsel %vm187_vm2, %v781_v27, -inf }
 0x54f   :  { %783 = vmax.xlane.f32.xlu0 %v782_v33  ;;  %v4209_v34 = vpop.f32.mrf.mxu1 }
 0x550   :  { %v957_v35 = vadd.f32 %v4850_v28, %v952_v30 }
 0x551   :  { %v1120_v37 = vpop.f32.mrf.mxu1 }
 0x552   :  { %v1124_v38 = vmul.f32 0.35355338, %v1120_v37  ;;  %v958_v39 = vsel %vm187_vm2, %v957_v35, -inf }
 0x553   :  { %959 = vmax.xlane.f32.xlu0 %v958_v39  ;;  %v4219_v41 = vpop.f32.mrf.mxu1 }
 0x554   :  { %v1125_v42 = vadd.f32 %v1124_v38, %v4850_v28 }
 0x555   :  { %v1292_v43 = vpop.f32.mrf.mxu1 }
 0x556   :  { %v1296_v44 = vmul.f32 0.35355338, %v1292_v43  ;;  %v1126_v45 = vsel %vm187_vm2, %v1125_v42, -inf }
 0x557   :  { %1127 = vmax.xlane.f32.xlu1 %v1126_v45  ;;  %v4229_v47 = vpop.f32.mrf.mxu1 }
 0x558   :  { %v1297_v48 = vadd.f32 %v1296_v44, %v4850_v28 }
 0x559   :  { %v1464_v49 = vpop.f32.mrf.mxu1 }
 0x55a   :  { %v1298_v50 = vsel %vm187_vm2, %v1297_v48, -inf  ;;  %v1468_v52 = vmul.f32 0.35355338, %v1464_v49 }
 0x55b   :  { %1299 = vmax.xlane.f32.xlu0 %v1298_v50  ;;  %v4239_v51 = vpop.f32.mrf.mxu1 }
 0x55c   :  { %v1469_v53 = vadd.f32 %v1468_v52, %v4850_v28 }
 0x55e   :  { %v1470_v54 = vsel %vm187_vm2, %v1469_v53, -inf }
 0x568   :  { %447 = vrot.lane.b32.xlu1 %v4748_v36, %s5347_s1 }
 0x58c   :  { %1471 = vmax.xlane.f32.xlu1 %v1470_v54 }
 0x59d   :  { %793 = vrot.lane.b32.xlu1 %v4748_v36, %s5349_s22 }
 0x5a1   :  { %969 = vrot.lane.b32.xlu1 %v4758_v40, %s5353_s21 }
 0x5d0   :  { %v438_v55 = vpop.xlane.xlu1 %437 }
 0x5d1   :  { %v439_v56 = vsub.f32 %v435_v16, %v438_v55 }
 0x5d3   :  { %v440_v57 = vmul.f32 1.442695, %v439_v56 }
 0x5d4   :  { %v611_v58 = vpop.xlane.xlu0 %610 }
 0x5d5   :  { %4474 = vpow2.f32 %v440_v57  ;;  %v612_v59 = vsub.f32 %v608_v21, %v611_v58 }
 0x5d7   :  { %v613_v60 = vmul.f32 1.442695, %v612_v59 }
 0x5d8   :  { %v784_v3 = vpop.xlane.xlu0 %783 }
 0x5d9   :  { %4476 = vpow2.f32 %v613_v60  ;;  %v785_v4 = vsub.f32 %v781_v27, %v784_v3 }
 0x5db   :  { %v786_v7 = vmul.f32 1.442695, %v785_v4  ;;  %v4441_v4 = vld [vmem:[%s5330_s6] sm:$0xff]  }
 0x5dc   :  { %v960_v5 = vpop.xlane.xlu0 %959 }
 0x5dd   :  { %v961_v6 = vsub.f32 %v957_v35, %v960_v5  ;;  %4478 = vpow2.f32 %v786_v7 }
 0x5df   :  { %v962_v10 = vmul.f32 1.442695, %v961_v6 }
 0x5e0   :  { %v1128_v61 = vpop.xlane.xlu1 %1127 }
 0x5e1   :  { %v1129_v8 = vsub.f32 %v1125_v42, %v1128_v61  ;;  %4480 = vpow2.f32 %v962_v10 }
 0x5e2   :  { %v4475_v62 = vpop.eup %4474 }
 0x5e3   :  { %v442_v63 = vsel %vm187_vm2, %v4475_v62, 0.0  ;;  %v1130_v11 = vmul.f32 1.442695, %v1129_v8 }
 0x5e4   :  { %443 = vadd.xlane.f32.xlu0 %v442_v63  ;;  %v448_v0 = vpop.permute.xlu1 %447  ;;  %v1300_v9 = vpop.xlane.xlu0 %1299 }
 0x5e5   :  { %4181 = vmatpush3.msra.mxu0 %v448_v0  ;;  %v1301_v12 = vsub.f32 %v1297_v48, %v1300_v9  ;;  %4482 = vpow2.f32 %v1130_v11 }
 0x5e6   :  { %v4477_v1 = vpop.eup %4476  ;;  %4190 = vmatprep.subr.mxu0 %v4584_v15 }
 0x5e7   :  { %v615_v2 = vsel %vm187_vm2, %v4477_v1, 0.0  ;;  %v1302_v13 = vmul.f32 1.442695, %v1301_v12 }
 0x5e8   :  { %616 = vadd.xlane.f32.xlu1 %v615_v2  ;;  %v4440_v2 = vld [vmem:[%s5330_s6 + $0x8] sm:$0xff]  }
 0x5e9   :  { %4484 = vpow2.f32 %v1302_v13  ;;  %4246 = vmatpush3.bf16.msra.mxu1 %v4440_v2  ;;  %v4447_v2 = vld [vmem:[%s5336_s12] sm:$0xff]  }
 0x5ea   :  { %v4479_v14 = vpop.eup %4478  ;;  %4247 = vmatprep.subr.bf16.mxu1 %v4584_v15 }
 0x5ed   :  { %4248 = vmatpush3.bf16.msra.mxu1 %v4441_v4 }
 0x5ee   :  { %v4481_v18 = vpop.eup %4480  ;;  %4261 = vmatprep.subr.bf16.mxu1 %v4584_v15 }
 0x5ef   :  { %v964_v21 = vsel %vm187_vm2, %v4481_v18, 0.0 }
 0x5f2   :  { %v4483_v20 = vpop.eup %4482 }
 0x5f3   :  { %v1132_v22 = vsel %vm187_vm2, %v4483_v20, 0.0 }
 0x5f6   :  { %v4485_v23 = vpop.eup %4484 }
 0x5f7   :  { %v1304_v24 = vsel %vm187_vm2, %v4485_v23, 0.0 }
 0x5f9   :  { %1137 = vrot.lane.b32.xlu1 %v4758_v40, %s5347_s1 }
 0x5fa   :  { %620 = vrot.lane.b32.xlu0 %v4748_v36, %s5351_s23  ;;  %v788_v36 = vsel %vm187_vm2, %v4479_v14, 0.0 }
 0x615   :  { %v1472_v16 = vpop.xlane.xlu1 %1471 }
 0x616   :  { %v1473_v17 = vsub.f32 %v1469_v53, %v1472_v16 }
 0x618   :  { %v1474_v19 = vmul.f32 1.442695, %v1473_v17 }
 0x619   :  { %789 = vadd.xlane.f32.xlu0 %v788_v36  ;;  %v794_v27 = vpop.permute.xlu1 %793 }
 0x61a   :  { %4486 = vpow2.f32 %v1474_v19 }
 0x61d   :  { %965 = vadd.xlane.f32.xlu1 %v964_v21  ;;  %1133 = vadd.xlane.f32.xlu0 %v1132_v22  ;;  %v970_v29 = vpop.permute.xlu1 %969 }
 0x621   :  { %1305 = vadd.xlane.f32.xlu1 %v1304_v24 }
 0x627   :  { %v4487_v25 = vpop.eup %4486 }
 0x628   :  { %v1476_v26 = vsel %vm187_vm2, %v4487_v25, 0.0 }
 0x629   :  { %1477 = vadd.xlane.f32.xlu0 %v1476_v26 }
 0x632   :  { %1481 = vrot.lane.b32.xlu1 %v4758_v40, %s5349_s22 }
 0x63f   :  { %1309 = vrot.lane.b32.xlu0 %v4758_v40, %s5351_s23 }
 0x66d   :  { %v444_v30 = vpop.xlane.xlu0 %443 }
 0x66e   :  { %4488 = vrcp.f32 %v444_v30 }
 0x671   :  { %v617_v33 = vpop.xlane.xlu1 %616  ;;  %v621_v37 = vpop.permute.xlu0 %620 }
 0x672   :  { %4490 = vrcp.f32 %v617_v33 }
 0x675   :  { %v1138_v40 = vpop.permute.xlu1 %1137 }
 0x67b   :  { %v4489_v34 = vpop.eup %4488 }
 0x67c   :  { %v446_v35 = vmul.f32 %v4489_v34, %v4475_v62 }
 0x67e   :  { %4183 = vmatmul.mubr.msk.f32.vlgmr.msra.gmra.mxu0 %vm187_vm2, %v446_v35 }
 0x67f   :  { %v4491_v38 = vpop.eup %4490  ;;  %4191 = vmatpush3.msra.mxu0 %v621_v37  ;;  %4192 = vmatprep.mubr.msk.f32.mxu0 %vm4585_vm1, %v4584_v15 }
 0x680   :  { %4200 = vmatprep.subr.mxu0 %v4584_v15  ;;  %v619_v39 = vmul.f32 %v4491_v38, %v4477_v1 }
 0x682   :  { %4193 = vmatmul.mubr.msk.f32.vlgmr.msra.gmra.mxu0 %vm187_vm2, %v619_v39 }
 0x683   :  { %4201 = vmatpush3.msra.mxu0 %v794_v27  ;;  %4202 = vmatprep.mubr.msk.f32.mxu0 %vm4585_vm1, %v4584_v15 }
 0x684   :  { %4210 = vmatprep.subr.mxu0 %v4584_v15 }
 0x6a2   :  { %v790_v41 = vpop.xlane.xlu0 %789 }
 0x6a3   :  { %4492 = vrcp.f32 %v790_v41 }
 0x6a6   :  { %v966_v42 = vpop.xlane.xlu1 %965  ;;  %v1134_v43 = vpop.xlane.xlu0 %1133 }
 0x6a7   :  { %4494 = vrcp.f32 %v966_v42 }
 0x6a8   :  { %4496 = vrcp.f32 %v1134_v43 }
 0x6aa   :  { %v1306_v44 = vpop.xlane.xlu1 %1305 }
 0x6ab   :  { %4498 = vrcp.f32 %v1306_v44  ;;  %v4443_v44 = vld [vmem:[%s5334_s10] sm:$0xff]  }
 0x6ae   :  { %v1482_v57 = vpop.permute.xlu1 %1481 }
 0x6b0   :  { %v4493_v45 = vpop.eup %4492 }
 0x6b1   :  { %v792_v47 = vmul.f32 %v4493_v45, %v4479_v14 }
 0x6b2   :  { %v1478_v48 = vpop.xlane.xlu0 %1477 }
 0x6b3   :  { %4500 = vrcp.f32 %v1478_v48  ;;  %4203 = vmatmul.mubr.msk.f32.vlgmr.msra.gmra.mxu0 %vm187_vm2, %v792_v47 }
 0x6b4   :  { %4211 = vmatpush3.msra.mxu0 %v970_v29  ;;  %4212 = vmatprep.mubr.msk.f32.mxu0 %vm4585_vm1, %v4584_v15  ;;  %v4495_v49 = vpop.eup %4494 }
 0x6b5   :  { %4220 = vmatprep.subr.mxu0 %v4584_v15  ;;  %v968_v50 = vmul.f32 %v4495_v49, %v4481_v18  ;;  %v4497_v51 = vpop.eup %4496 }
 0x6b6   :  { %v1136_v52 = vmul.f32 %v4497_v51, %v4483_v20  ;;  %v1310_v54 = vpop.permute.xlu0 %1309  ;;  %v3949_v20 = vld [vmem:[%s5331_s7] ss:$0 sm:$0xff] }
 0x6b7   :  { %4213 = vmatmul.mubr.msk.f32.vlgmr.msra.gmra.mxu0 %vm187_vm2, %v968_v50 }
 0x6b8   :  { %4221 = vmatpush3.msra.mxu0 %v1138_v40  ;;  %4222 = vmatprep.mubr.msk.f32.mxu0 %vm4585_vm1, %v4584_v15  ;;  %v4499_v53 = vpop.eup %4498 }
 0x6b9   :  { %4230 = vmatprep.subr.mxu0 %v4584_v15  ;;  %v1308_v55 = vmul.f32 %v4499_v53, %v4485_v23 }
 0x6bb   :  { %4223 = vmatmul.mubr.msk.f32.vlgmr.msra.gmra.mxu0 %vm187_vm2, %v1136_v52 }
 0x6bc   :  { %4231 = vmatpush3.msra.mxu0 %v1310_v54  ;;  %4232 = vmatprep.mubr.msk.f32.mxu0 %vm4585_vm1, %v4584_v15  ;;  %v3953_v54 = vld [vmem:[%s5332_s8] ss:$0 sm:$0xff] }
 0x6bd   :  { %4240 = vmatprep.subr.mxu0 %v4584_v15 }
 0x6bf   :  { %4233 = vmatmul.mubr.msk.f32.vlgmr.msra.gmra.mxu0 %vm187_vm2, %v1308_v55 }
 0x6c0   :  { %v4501_v56 = vpop.eup %4500  ;;  %4241 = vmatpush3.msra.mxu0 %v1482_v57  ;;  %4242 = vmatprep.mubr.msk.f32.mxu0 %vm4585_vm1, %v4584_v15 }
 0x6c1   :  { %v1480_v58 = vmul.f32 %v4501_v56, %v4487_v25  ;;  %4253 = vmatprep.subr.bf16.mxu0 %v4584_v15 }
 0x6c3   :  { %4243 = vmatmul.mubr.msk.f32.vlgmr.msra.gmra.mxu0 %vm187_vm2, %v1480_v58  ;;  %v3954_v58 = vld [vmem:[%s5333_s9] ss:$0 sm:$0xff] }
 0x6c4   :  { %4257 = vmatprep.mubr.msk.bf16.mxu0 %vm4585_vm1, %v4584_v15 }
 0x73e   :  { %v519_v59 = vpop.f32.mrf.mxu0 }
 0x73f   :  { %524 = vrot.lane.b32.xlu0 %v519_v59, %s5359_s29 }
 0x740   :  { %v4184_v60 = vpop.f32.mrf.mxu0 }
 0x742   :  { %v692_v61 = vpop.f32.mrf.mxu0 }
 0x743   :  { %697 = vrot.lane.b32.xlu0 %v692_v61, %s5357_s30 }
 0x744   :  { %v4194_v62 = vpop.f32.mrf.mxu0 }
 0x773   :  { %v865_v63 = vpop.f32.mrf.mxu0 }
 0x774   :  { %870 = vrot.lane.b32.xlu0 %v865_v63, %s5355_s0  ;;  %v4444_v63 = vld [vmem:[%s5336_s12 + $0x18] sm:$0xff]  }
 0x775   :  { %v4204_v0 = vpop.f32.mrf.mxu0 }
 0x776   :  { %v4445_v0 = vld [vmem:[%s5336_s12 + $0x10] sm:$0xff]  }
 0x777   :  { %v1041_v1 = vpop.f32.mrf.mxu0 }
 0x778   :  { %1045 = vst.msk [vmem:[#allocation2 + $0x8] sm:$0xff] %vm187_vm2, %v1041_v1  ;;  %v4446_v1 = vld [vmem:[%s5336_s12 + $0x8] sm:$0xff]  }
 0x779   :  { %v4214_v3 = vpop.f32.mrf.mxu0 }
 0x77a   :  { %v3955_v3 = vld [vmem:[%s5335_s11] ss:$0 sm:$0xff] }
 0x77b   :  { %v1209_v5 = vpop.f32.mrf.mxu0 }
 0x77c   :  { %1214 = vrot.lane.b32.xlu1 %v1209_v5, %s5359_s29 }
 0x77d   :  { %v4224_v6 = vpop.f32.mrf.mxu0 }
 0x77f   :  { %v1381_v7 = vpop.f32.mrf.mxu0 }
 0x780   :  { %1386 = vrot.lane.b32.xlu1 %v1381_v7, %s5357_s30 }
 0x781   :  { %v4234_v8 = vpop.f32.mrf.mxu0 }
 0x783   :  { %v1553_v9 = vpop.f32.mrf.mxu0 }
 0x784   :  { %1558 = vrot.lane.b32.xlu1 %v1553_v9, %s5355_s0 }
 0x785   :  { %v4244_v10 = vpop.f32.mrf.mxu0 }
 0x7b1   :  { %v525_v11 = vpop.permute.xlu0 %524 }
 0x7b2   :  { %528 = vst.msk [vmem:[#allocation2] sm:$0xff] %vm527_vm3, %v525_v11 }
 0x7b5   :  { %v698_v12 = vpop.permute.xlu0 %697 }
 0x7b6   :  { %701 = vst.msk [vmem:[#allocation2] sm:$0xff] %vm700_vm4, %v698_v12 }
 0x7e6   :  { %v871_v13 = vpop.permute.xlu0 %870 }
 0x7e7   :  { %874 = vst.msk [vmem:[#allocation2] sm:$0xff] %vm873_vm5, %v871_v13 }
 0x7ee   :  { %v1215_v14 = vpop.permute.xlu1 %1214  ;;  %v1562_v18 = vld [vmem:[#allocation2] sm:$0xff] }
 0x7ef   :  { %1217 = vst.msk [vmem:[#allocation2 + $0x8] sm:$0xff] %vm527_vm3, %v1215_v14 }
 0x7f2   :  { %v1387_v16 = vpop.permute.xlu1 %1386 }
 0x7f3   :  { %1389 = vst.msk [vmem:[#allocation2 + $0x8] sm:$0xff] %vm700_vm4, %v1387_v16 }
 0x7f6   :  { %v1559_v17 = vpop.permute.xlu1 %1558 }
 0x7f7   :  { %1561 = vst.msk [vmem:[#allocation2 + $0x8] sm:$0xff] %vm873_vm5, %v1559_v17 }
 0x7fe   :  { %v1563_v19 = vld [vmem:[#allocation2 + $0x8] sm:$0xff] }
 0x7ff   :  { %v1569_v36 = vpack.c.bf16 %v1563_v19, %v1562_v18 }
 0x801   :  { %4250 = vmatmul.mubr.msk.bf16.vlgmr.msra.gmra.mxu1 %vm72_vm0, %v1569_v36 }
 0x802   :  { %4269 = vmatprep.mubr.msk.bf16.mxu1 %vm4585_vm1, %v4584_v15  ;;  %4262 = vmatpush3.bf16.msra.mxu1 %v4444_v63 }
 0x803   :  { %4263 = vmatprep.subr.bf16.mxu1 %v4584_v15 }
 0x806   :  { %4264 = vmatpush3.bf16.msra.mxu1 %v4445_v0  ;;  %v3972_v0 = vld [vmem:[%s5329_s5 + $0x1] ss:$0 sm:$0xff]  ;;  %s5371_s5 = smov 64  }
 0x807   :  { %4265 = vmatprep.subr.bf16.mxu1 %v4584_v15 }
 0x80a   :  { %4266 = vmatpush3.bf16.msra.mxu1 %v4446_v1 }
 0x80b   :  { %4267 = vmatprep.subr.bf16.mxu1 %v4584_v15 }
 0x80e   :  { %4268 = vmatpush3.bf16.msra.mxu1 %v4447_v2 }
 0x80f   :  { %4291 = vmatprep.subr.mxu1 %v4584_v15 }
 0x8c1   :  { %v1625_v21 = vpop.f32.mrf.mxu1 }
 0x8c2   :  { %v1626_v22 = vadd.f32 %v3949_v20, %v1625_v21  ;;  %v3959_v21 = vld [vmem:[%s5337_s13] ss:$0 sm:$0xff] }
 0x8c3   :  { %v4251_v23 = vpop.f32.mrf.mxu1 }
 0x8c4   :  { %v1632_v24 = vadd.f32 %v1626_v22, %v4736_v31 }
 0x8c5   :  { %v1628_v25 = vpop.f32.mrf.mxu1 }
 0x8c6   :  { %v1629_v26 = vadd.f32 %v3949_v20, %v1628_v25  ;;  %v1636_v27 = vsel %vm72_vm0, %v1632_v24, 0.0 }
 0x8c7   :  { %1637 = vadd.xlane.f32.xlu0 %v1636_v27  ;;  %v4252_v29 = vpop.f32.mrf.mxu1 }
 0x8c8   :  { %v1633_v30 = vadd.f32 %v1629_v26, %v4738_v32  ;;  %v4442_v32 = vld [vmem:[%s5334_s10 + $0x8] sm:$0xff]  }
 0x8c9   :  { %4254 = vmatpush3.bf16.msra.mxu0 %v4442_v32 }
 0x8ca   :  { %v1639_v33 = vsel %vm72_vm0, %v1633_v30, 0.0  ;;  %4255 = vmatprep.subr.bf16.mxu0 %v4584_v15 }
 0x8cb   :  { %1640 = vadd.xlane.f32.xlu1 %v1639_v33 }
 0x8cd   :  { %4256 = vmatpush3.bf16.msra.mxu0 %v4443_v44  ;;  %v4448_v44 = vld [vmem:[%s5367_s26 + $0x18] sm:$0xff]  }
 0x8ce   :  { %4273 = vmatprep.subr.bf16.mxu0 %v4584_v15 }
 0x950   :  { %v1638_v34 = vpop.xlane.xlu0 %1637 }
 0x951   :  { %v1642_v35 = vmul.f32 0.03125, %v1638_v34 }
 0x953   :  { %v1644_v37 = vsub.f32 %v1632_v24, %v1642_v35 }
 0x954   :  { %v1641_v38 = vpop.xlane.xlu1 %1640 }
 0x955   :  { %v1643_v39 = vmul.f32 0.03125, %v1641_v38  ;;  %v1646_v40 = vmul.f32 %v1644_v37, %v1644_v37 }
 0x957   :  { %v1645_v41 = vsub.f32 %v1633_v30, %v1643_v39  ;;  %v1648_v31 = vsel %vm72_vm0, %v1646_v40, 0.0 }
 0x958   :  { %1649 = vadd.xlane.f32.xlu0 %v1648_v31 }
 0x959   :  { %v1647_v42 = vmul.f32 %v1645_v41, %v1645_v41 }
 0x95b   :  { %v1651_v43 = vsel %vm72_vm0, %v1647_v42, 0.0 }
 0x95c   :  { %1652 = vadd.xlane.f32.xlu0 %v1651_v43 }
 0x9e1   :  { %v1650_v45 = vpop.xlane.xlu0 %1649 }
 0x9e2   :  { %v1654_v47 = vmul.f32 0.03125, %v1650_v45  ;;  %v4449_v45 = vld [vmem:[%s5367_s26 + $0x10] sm:$0xff]  }
 0x9e4   :  { %v1656_v48 = vadd.f32 1e-12, %v1654_v47 }
 0x9e5   :  { %v1653_v49 = vpop.xlane.xlu0 %1652 }
 0x9e6   :  { %4502 = vrsqrt.f32 %v1656_v48  ;;  %v1655_v50 = vmul.f32 0.03125, %v1653_v49 }
 0x9e8   :  { %v1657_v51 = vadd.f32 1e-12, %v1655_v50 }
 0x9ea   :  { %4504 = vrsqrt.f32 %v1657_v51 }
 0x9f3   :  { %v4503_v52 = vpop.eup %4502 }
 0x9f4   :  { %v1660_v53 = vmul.f32 %v4503_v52, %v1644_v37 }
 0x9f6   :  { %v1668_v57 = vmul.f32 %v3953_v54, %v1660_v53 }
 0x9f7   :  { %v4505_v55 = vpop.eup %4504 }
 0x9f8   :  { %v1661_v56 = vmul.f32 %v4505_v55, %v1645_v41  ;;  %v1676_v60 = vadd.f32 %v3954_v58, %v1668_v57  ;;  %v3965_v55 = vld [vmem:[%s5338_s14] ss:$0 sm:$0xff] }
 0x9fa   :  { %v1669_v59 = vmul.f32 %v3953_v54, %v1661_v56 }
 0x9fc   :  { %v1677_v61 = vadd.f32 %v3954_v58, %v1669_v59  ;;  %v3966_v59 = vld [vmem:[%s5339_s15] ss:$0 sm:$0xff] }
 0x9fe   :  { %v1683_v62 = vpack.c.bf16 %v1677_v61, %v1676_v60 }
 0xa00   :  { %4258 = vmatmul.mubr.msk.bf16.vlgmr.msra.gmra.mxu0 %vm72_vm0, %v1683_v62 }
 0xa01   :  { %4277 = vmatprep.mubr.msk.bf16.mxu0 %vm4585_vm1, %v4584_v15  ;;  %4274 = vmatpush3.bf16.msra.mxu0 %v4448_v44 }
 0xa02   :  { %4275 = vmatprep.subr.bf16.mxu0 %v4584_v15 }
 0xa05   :  { %4276 = vmatpush3.bf16.msra.mxu0 %v4449_v45 }
 0xa06   :  { %4281 = vmatprep.subr.mxu0 %v4584_v15 }
 0xac0   :  { %v1739_v4 = vpop.f32.mrf.mxu0 }
 0xac1   :  { %v1740_v5 = vadd.f32 %v3955_v3, %v1739_v4 }
 0xac2   :  { %v4259_v6 = vpop.f32.mrf.mxu0 }
 0xac3   :  { %v1748_v7 = vmul.f32 0.70710677, %v1740_v5  ;;  %v1746_v16 = vmul.f32 0.5, %v1740_v5 }
 0xac4   :  { %v1742_v8 = vpop.f32.mrf.mxu0 }
 0xac5   :  { %4506 = verf.f32 %v1748_v7  ;;  %v1743_v9 = vadd.f32 %v3955_v3, %v1742_v8 }
 0xac6   :  { %v4260_v10 = vpop.f32.mrf.mxu0 }
 0xac7   :  { %v1749_v11 = vmul.f32 0.70710677, %v1743_v9  ;;  %v1747_v17 = vmul.f32 0.5, %v1743_v9 }
 0xac9   :  { %4508 = verf.f32 %v1749_v11 }
 0xad2   :  { %v4507_v12 = vpop.eup %4506 }
 0xad3   :  { %v1752_v13 = vadd.f32 1.0, %v4507_v12 }
 0xad5   :  { %v1754_v19 = vmul.f32 %v1752_v13, %v1746_v16 }
 0xad6   :  { %v4509_v14 = vpop.eup %4508 }
 0xad7   :  { %v1753_v18 = vadd.f32 1.0, %v4509_v14 }
 0xad9   :  { %v1755_v36 = vmul.f32 %v1753_v18, %v1747_v17 }
 0xadb   :  { %v1765_v20 = vpack.c.bf16 %v1755_v36, %v1754_v19 }
 0xadd   :  { %4270 = vmatmul.mubr.msk.bf16.vlgmr.msra.gmra.mxu1 %vm1796_vm6, %v1765_v20 }
 0xade   :  { %4293 = vmatprep.mubr.msk.f32.mxu1 %vm4585_vm1, %v4584_v15 }
 0xb9d   :  { %v1834_v22 = vpop.f32.mrf.mxu1 }
 0xb9e   :  { %v1835_v23 = vadd.f32 %v3959_v21, %v1834_v22 }
 0xb9f   :  { %v4271_v24 = vpop.f32.mrf.mxu1 }
 0xba0   :  { %v1841_v25 = vadd.f32 %v1835_v23, %v1676_v60 }
 0xba1   :  { %v1837_v26 = vpop.f32.mrf.mxu1 }
 0xba2   :  { %v1838_v27 = vadd.f32 %v3959_v21, %v1837_v26  ;;  %v1845_v29 = vsel %vm72_vm0, %v1841_v25, 0.0 }
 0xba3   :  { %1846 = vadd.xlane.f32.xlu0 %v1845_v29  ;;  %v4272_v30 = vpop.f32.mrf.mxu1 }
 0xba4   :  { %v1842_v33 = vadd.f32 %v1838_v27, %v1677_v61 }
 0xba6   :  { %v1848_v34 = vsel %vm72_vm0, %v1842_v33, 0.0 }
 0xba7   :  { %1849 = vadd.xlane.f32.xlu1 %v1848_v34 }
 0xc2c   :  { %v1847_v35 = vpop.xlane.xlu0 %1846 }
 0xc2d   :  { %v1851_v37 = vmul.f32 0.03125, %v1847_v35 }
 0xc2f   :  { %v1853_v38 = vsub.f32 %v1841_v25, %v1851_v37 }
 0xc30   :  { %v1850_v39 = vpop.xlane.xlu1 %1849 }
 0xc31   :  { %v1852_v40 = vmul.f32 0.03125, %v1850_v39  ;;  %v1855_v41 = vmul.f32 %v1853_v38, %v1853_v38 }
 0xc33   :  { %v1854_v31 = vsub.f32 %v1842_v33, %v1852_v40  ;;  %v1857_v42 = vsel %vm72_vm0, %v1855_v41, 0.0 }
 0xc34   :  { %1858 = vadd.xlane.f32.xlu0 %v1857_v42 }
 0xc35   :  { %v1856_v43 = vmul.f32 %v1854_v31, %v1854_v31 }
 0xc37   :  { %v1860_v32 = vsel %vm72_vm0, %v1856_v43, 0.0 }
 0xc38   :  { %1861 = vadd.xlane.f32.xlu1 %v1860_v32 }
 0xcbd   :  { %v1859_v47 = vpop.xlane.xlu0 %1858 }
 0xcbe   :  { %v1863_v48 = vmul.f32 0.03125, %v1859_v47 }
 0xcc0   :  { %v1865_v49 = vadd.f32 1e-12, %v1863_v48 }
 0xcc1   :  { %v1862_v50 = vpop.xlane.xlu1 %1861 }
 0xcc2   :  { %4510 = vrsqrt.f32 %v1865_v49  ;;  %v1864_v51 = vmul.f32 0.03125, %v1862_v50 }
 0xcc4   :  { %v1866_v52 = vadd.f32 1e-12, %v1864_v51 }
 0xcc6   :  { %4512 = vrsqrt.f32 %v1866_v52 }
 0xccf   :  { %v4511_v53 = vpop.eup %4510 }
 0xcd0   :  { %v1869_v54 = vmul.f32 %v4511_v53, %v1853_v38 }
 0xcd2   :  { %v1877_v58 = vmul.f32 %v3965_v55, %v1869_v54 }
 0xcd3   :  { %v4513_v56 = vpop.eup %4512 }
 0xcd4   :  { %v1870_v57 = vmul.f32 %v4513_v56, %v1854_v31  ;;  %v5003_v61 = vadd.f32 %v3966_v59, %v1877_v58 }
 0xcd6   :  { %v1878_v60 = vmul.f32 %v3965_v55, %v1870_v57 }
 0xcd8   :  { %v5005_v62 = vadd.f32 %v3966_v59, %v1878_v60 }
 0xcda   :  { %v1894_v63 = vpack.c.bf16 %v5005_v62, %v5003_v61 }
 0xcdc   :  { %4278 = vmatmul.mubr.msk.bf16.vlgmr.msra.gmra.mxu0 %vm72_vm0, %v1894_v63 }
 0xcdd   :  { %4283 = vmatprep.mubr.msk.f32.mxu0 %vm4585_vm1, %v4584_v15 }
 0xd9c   :  { %v1950_v1 = vpop.f32.mrf.mxu0 }
 0xd9d   :  { %v5015_v2 = vadd.f32 %v3972_v0, %v1950_v1 }
 0xd9e   :  { %v4279_v3 = vpop.f32.mrf.mxu0 }
 0xd9f   :  { %2126 = vrot.lane.b32.xlu1 %v5015_v2, %s4587_s2  ;;  %1958 = vrot.lane.b32.xlu0 %v5015_v2, %s4586_s24 }
 0xda0   :  { %v1953_v4 = vpop.f32.mrf.mxu0 }
 0xda1   :  { %v5029_v6 = vadd.f32 %v3972_v0, %v1953_v4 }
 0xda2   :  { %v4280_v5 = vpop.f32.mrf.mxu0 }
 0xda3   :  { %2124 = vrot.lane.b32.xlu1 %v5015_v2, %s4590_s27  ;;  %2296 = vrot.lane.b32.xlu0 %v5015_v2, %s4591_s28 }
 0xda7   :  { %2298 = vrot.lane.b32.xlu1 %v5015_v2, %s4588_s25  ;;  %2468 = vrot.lane.b32.xlu0 %v5015_v2, %s4592_s4 }
 0xdab   :  { %2470 = vrot.lane.b32.xlu1 %v5015_v2, %s4589_s3  ;;  %2809 = vrot.lane.b32.xlu0 %v5029_v6, %s4587_s2  ;;  %s5373_s2 = smov 40  }
 0xdaf   :  { %2981 = vrot.lane.b32.xlu0 %v5029_v6, %s4588_s25  ;;  %2641 = vrot.lane.b32.xlu1 %v5029_v6, %s4586_s24  ;;  %s5372_s24 = smov 48   ;;  %s5374_s25 = smov 56  }
 0xdb3   :  { %3153 = vrot.lane.b32.xlu0 %v5029_v6, %s4589_s3  ;;  %2807 = vrot.lane.b32.xlu1 %v5029_v6, %s4590_s27  ;;  %s5375_s3 = smov 8   ;;  %s5376_s27 = smov 16  }
 0xdb7   :  { %2979 = vrot.lane.b32.xlu1 %v5029_v6, %s4591_s28  ;;  %s5377_s28 = smov 24  }
 0xdbb   :  { %3151 = vrot.lane.b32.xlu1 %v5029_v6, %s4592_s4 }
 0xe11   :  { %v2127_v7 = vpop.permute.xlu1 %2126  ;;  %v1959_v8 = vpop.permute.xlu0 %1958 }
 0xe12   :  { %4282 = vmatpush3.xpose.msk.msra.mxu0 %vm187_vm2, %v1959_v8  ;;  %4292 = vmatpush3.xpose.msk.msra.mxu1 %vm187_vm2, %v2127_v7 }
 0xe13   :  { %4301 = vmatprep.subr.mxu1 %v4584_v15  ;;  %4286 = vmatprep.subr.mxu0 %v4584_v15 }
 0xe15   :  { %v2125_v9 = vpop.permute.xlu1 %2124  ;;  %4284 = vmatmul.mubr.msk.f32.vlgmr.msra.gmra.mxu0 %vm187_vm2, %v5015_v2  ;;  %v2297_v10 = vpop.permute.xlu0 %2296 }
 0xe16   :  { %4294 = vmatmul.mubr.msk.f32.vlgmr.msra.gmra.mxu1 %vm187_vm2, %v2125_v9  ;;  %4288 = vmatprep.mubr.msk.f32.mxu0 %vm4585_vm1, %v4584_v15 }
 0xe17   :  { %4303 = vmatprep.mubr.msk.f32.mxu1 %vm4585_vm1, %v4584_v15 }
 0xe19   :  { %v2299_v11 = vpop.permute.xlu1 %2298  ;;  %v2469_v12 = vpop.permute.xlu0 %2468 }
 0xe1a   :  { %4302 = vmatpush3.xpose.msk.msra.mxu1 %vm187_vm2, %v2299_v11 }
 0xe1b   :  { %4311 = vmatprep.subr.mxu1 %v4584_v15 }
 0xe1d   :  { %v2471_v13 = vpop.permute.xlu1 %2470  ;;  %4304 = vmatmul.mubr.msk.f32.vlgmr.msra.gmra.mxu1 %vm187_vm2, %v2297_v10  ;;  %v2810_v14 = vpop.permute.xlu0 %2809 }
 0xe1e   :  { %4312 = vmatpush3.xpose.msk.msra.mxu1 %vm187_vm2, %v2471_v13  ;;  %4313 = vmatprep.mubr.msk.f32.mxu1 %vm4585_vm1, %v4584_v15 }
 0xe1f   :  { %4321 = vmatprep.subr.mxu1 %v4584_v15 }
 0xe21   :  { %4314 = vmatmul.mubr.msk.f32.vlgmr.msra.gmra.mxu1 %vm187_vm2, %v2469_v12  ;;  %v2642_v16 = vpop.permute.xlu1 %2641  ;;  %v2982_v18 = vpop.permute.xlu0 %2981 }
 0xe22   :  { %4322 = vmatpush3.xpose.msk.msra.mxu1 %vm187_vm2, %v2642_v16  ;;  %4323 = vmatprep.mubr.msk.f32.mxu1 %vm4585_vm1, %v4584_v15 }
 0xe23   :  { %4331 = vmatprep.subr.mxu1 %v4584_v15 }
 0xe25   :  { %4324 = vmatmul.mubr.msk.f32.vlgmr.msra.gmra.mxu1 %vm187_vm2, %v5029_v6  ;;  %v2808_v17 = vpop.permute.xlu1 %2807  ;;  %v3154_v36 = vpop.permute.xlu0 %3153 }
 0xe26   :  { %4332 = vmatpush3.xpose.msk.msra.mxu1 %vm187_vm2, %v2810_v14  ;;  %4333 = vmatprep.mubr.msk.f32.mxu1 %vm4585_vm1, %v4584_v15 }
 0xe27   :  { %4341 = vmatprep.subr.mxu1 %v4584_v15 }
 0xe29   :  { %4334 = vmatmul.mubr.msk.f32.vlgmr.msra.gmra.mxu1 %vm187_vm2, %v2808_v17  ;;  %v2980_v19 = vpop.permute.xlu1 %2979 }
 0xe2a   :  { %4342 = vmatpush3.xpose.msk.msra.mxu1 %vm187_vm2, %v2982_v18  ;;  %4343 = vmatprep.mubr.msk.f32.mxu1 %vm4585_vm1, %v4584_v15 }
 0xe2b   :  { %4351 = vmatprep.subr.mxu1 %v4584_v15 }
 0xe2d   :  { %4344 = vmatmul.mubr.msk.f32.vlgmr.msra.gmra.mxu1 %vm187_vm2, %v2980_v19  ;;  %v3152_v20 = vpop.permute.xlu1 %3151 }
 0xe2e   :  { %4352 = vmatpush3.xpose.msk.msra.mxu1 %vm187_vm2, %v3154_v36  ;;  %4353 = vmatprep.mubr.msk.f32.mxu1 %vm4585_vm1, %v4584_v15 }
 0xe2f   :  { %4361 = vmatprep.subr.bf16.mxu1 %v4584_v15 }
 0xe31   :  { %4354 = vmatmul.mubr.msk.f32.vlgmr.msra.gmra.mxu1 %vm187_vm2, %v3152_v20 }
 0xe32   :  { %4365 = vmatprep.mubr.msk.bf16.mxu1 %vm4585_vm1, %v4584_v15 }
 0xed5   :  { %v2030_v21 = vpop.f32.mrf.mxu0 }
 0xed6   :  { %v2034_v22 = vmul.f32 0.35355338, %v2030_v21  ;;  %v2198_v23 = vpop.f32.mrf.mxu1 }
 0xed7   :  { %v2202_v24 = vmul.f32 0.35355338, %v2198_v23  ;;  %v4285_v25 = vpop.f32.mrf.mxu0 }
 0xed8   :  { %v4295_v26 = vpop.f32.mrf.mxu1  ;;  %v2035_v27 = vadd.f32 %v2034_v22, %v4783_v46 }
 0xed9   :  { %v2203_v29 = vadd.f32 %v2202_v24, %v4783_v46 }
 0xeda   :  { %v2036_v30 = vsel %vm187_vm2, %v2035_v27, -inf }
 0xedb   :  { %2037 = vmax.xlane.f32.xlu0 %v2036_v30  ;;  %v2204_v33 = vsel %vm187_vm2, %v2203_v29, -inf }
 0xedc   :  { %2205 = vmax.xlane.f32.xlu1 %v2204_v33 }
 0xedd   :  { %v2370_v34 = vpop.f32.mrf.mxu1 }
 0xede   :  { %v2374_v35 = vmul.f32 0.35355338, %v2370_v34 }
 0xedf   :  { %v4305_v37 = vpop.f32.mrf.mxu1 }
 0xee0   :  { %v5094_v38 = vadd.f32 %v2374_v35, %v4783_v46 }
 0xee1   :  { %v2542_v39 = vpop.f32.mrf.mxu1 }
 0xee2   :  { %v2546_v40 = vmul.f32 0.35355338, %v2542_v39  ;;  %v2376_v41 = vsel %vm187_vm2, %v5094_v38, -inf }
 0xee3   :  { %2377 = vmax.xlane.f32.xlu0 %v2376_v41  ;;  %v4315_v31 = vpop.f32.mrf.mxu1 }
 0xee4   :  { %v2547_v42 = vadd.f32 %v2546_v40, %v4783_v46 }
 0xee5   :  { %v2713_v43 = vpop.f32.mrf.mxu1 }
 0xee6   :  { %v2717_v32 = vmul.f32 0.35355338, %v2713_v43  ;;  %v2548_v44 = vsel %vm187_vm2, %v2547_v42, -inf }
 0xee7   :  { %2549 = vmax.xlane.f32.xlu0 %v2548_v44  ;;  %v4325_v45 = vpop.f32.mrf.mxu1 }
 0xee8   :  { %v2718_v47 = vadd.f32 %v2717_v32, %v4850_v28 }
 0xee9   :  { %v2881_v48 = vpop.f32.mrf.mxu1 }
 0xeea   :  { %v2885_v49 = vmul.f32 0.35355338, %v2881_v48  ;;  %v2719_v50 = vsel %vm187_vm2, %v2718_v47, -inf }
 0xeeb   :  { %2720 = vmax.xlane.f32.xlu0 %v2719_v50  ;;  %v4335_v51 = vpop.f32.mrf.mxu1 }
 0xeec   :  { %v2886_v52 = vadd.f32 %v2885_v49, %v4850_v28 }
 0xeed   :  { %v3053_v53 = vpop.f32.mrf.mxu1 }
 0xeee   :  { %v3057_v54 = vmul.f32 0.35355338, %v3053_v53  ;;  %v2887_v46 = vsel %vm187_vm2, %v2886_v52, -inf }
 0xeef   :  { %2888 = vmax.xlane.f32.xlu1 %v2887_v46  ;;  %v4345_v55 = vpop.f32.mrf.mxu1 }
 0xef0   :  { %v3058_v56 = vadd.f32 %v3057_v54, %v4850_v28 }
 0xef1   :  { %v3225_v57 = vpop.f32.mrf.mxu1 }
 0xef2   :  { %v3059_v58 = vsel %vm187_vm2, %v3058_v56, -inf  ;;  %v3229_v60 = vmul.f32 0.35355338, %v3225_v57 }
 0xef3   :  { %3060 = vmax.xlane.f32.xlu0 %v3059_v58  ;;  %v4355_v59 = vpop.f32.mrf.mxu1 }
 0xef4   :  { %v3230_v63 = vadd.f32 %v3229_v60, %v4850_v28 }
 0xef6   :  { %v3231_v0 = vsel %vm187_vm2, %v3230_v63, -inf }
 0xf00   :  { %2047 = vrot.lane.b32.xlu1 %v5015_v2, %s5371_s5 }
 0xf24   :  { %3232 = vmax.xlane.f32.xlu1 %v3231_v0 }
 0xf35   :  { %2387 = vrot.lane.b32.xlu1 %v5015_v2, %s5372_s24 }
 0xf39   :  { %2559 = vrot.lane.b32.xlu1 %v5015_v2, %s5373_s2 }
 0xf3d   :  { %2730 = vrot.lane.b32.xlu1 %v5029_v6, %s5371_s5 }
 0xf64   :  { %v2038_v1 = vpop.xlane.xlu0 %2037 }
 0xf65   :  { %v2039_v3 = vsub.f32 %v2035_v27, %v2038_v1  ;;  %v2206_v4 = vpop.xlane.xlu1 %2205 }
 0xf66   :  { %v2207_v5 = vsub.f32 %v2203_v29, %v2206_v4 }
 0xf67   :  { %v2040_v7 = vmul.f32 1.442695, %v2039_v3 }
 0xf68   :  { %v2208_v8 = vmul.f32 1.442695, %v2207_v5 }
 0xf69   :  { %4514 = vpow2.f32 %v2040_v7 }
 0xf6a   :  { %4516 = vpow2.f32 %v2208_v8 }
 0xf6c   :  { %v2378_v28 = vpop.xlane.xlu0 %2377 }
 0xf6d   :  { %v2379_v20 = vsub.f32 %v5094_v38, %v2378_v28 }
 0xf6f   :  { %v2380_v22 = vmul.f32 1.442695, %v2379_v20 }
 0xf70   :  { %v2550_v9 = vpop.xlane.xlu0 %2549 }
 0xf71   :  { %v2551_v10 = vsub.f32 %v2547_v42, %v2550_v9 }
 0xf73   :  { %v2552_v11 = vmul.f32 1.442695, %v2551_v10 }
 0xf74   :  { %v2721_v21 = vpop.xlane.xlu0 %2720 }
 0xf75   :  { %4518 = vpow2.f32 %v2552_v11  ;;  %v2722_v23 = vsub.f32 %v2718_v47, %v2721_v21 }
 0xf76   :  { %v4515_v12 = vpop.eup %4514  ;;  %4520 = vpow2.f32 %v2380_v22  ;;  %v4450_v22 = vld [vmem:[%s5330_s6 + $0x18] sm:$0xff]  }
 0xf77   :  { %v5116_v13 = vpop.eup %4516  ;;  %v2042_v14 = vsel %vm187_vm2, %v4515_v12, 0.0  ;;  %v2723_v25 = vmul.f32 1.442695, %v2722_v23  ;;  %4362 = vmatpush3.bf16.msra.mxu1 %v4450_v22 }
 0xf78   :  { %v2889_v16 = vpop.xlane.xlu1 %2888  ;;  %2043 = vadd.xlane.f32.xlu0 %v2042_v14  ;;  %v2210_v17 = vsel %vm187_vm2, %v5116_v13, 0.0  ;;  %4363 = vmatprep.subr.bf16.mxu1 %v4584_v15 }
 0xf79   :  { %2211 = vadd.xlane.f32.xlu1 %v2210_v17  ;;  %4522 = vpow2.f32 %v2723_v25  ;;  %v2890_v27 = vsub.f32 %v2886_v52, %v2889_v16 }
 0xf7b   :  { %v2891_v30 = vmul.f32 1.442695, %v2890_v27 }
 0xf7c   :  { %v2048_v18 = vpop.permute.xlu1 %2047  ;;  %v3061_v24 = vpop.xlane.xlu0 %3060 }
 0xf7d   :  { %4287 = vmatpush3.msra.mxu0 %v2048_v18  ;;  %v3062_v26 = vsub.f32 %v3058_v56, %v3061_v24  ;;  %v4451_v24 = vld [vmem:[%s5330_s6 + $0x10] sm:$0xff]  }
 0xf7e   :  { %4296 = vmatprep.subr.mxu0 %v4584_v15  ;;  %4364 = vmatpush3.bf16.msra.mxu1 %v4451_v24 }
 0xf7f   :  { %v3063_v29 = vmul.f32 1.442695, %v3062_v26  ;;  %4377 = vmatprep.subr.bf16.mxu1 %v4584_v15 }
 0xf81   :  { %4524 = vpow2.f32 %v3063_v29 }
 0xf82   :  { %v5122_v19 = vpop.eup %4518  ;;  %4526 = vpow2.f32 %v2891_v30 }
 0xf83   :  { %v2554_v36 = vsel %vm187_vm2, %v5122_v19, 0.0  ;;  %v4521_v33 = vpop.eup %4520 }
 0xf84   :  { %2555 = vadd.xlane.f32.xlu1 %v2554_v36 }
 0xf86   :  { %v5132_v34 = vpop.eup %4522 }
 0xf87   :  { %v2725_v39 = vsel %vm187_vm2, %v5132_v34, 0.0 }
 0xf8e   :  { %2215 = vrot.lane.b32.xlu0 %v5015_v2, %s5374_s25  ;;  %v2382_v2 = vsel %vm187_vm2, %v4521_v33, 0.0  ;;  %v5136_v40 = vpop.eup %4524 }
 0xf8f   :  { %v3065_v41 = vsel %vm187_vm2, %v5136_v40, 0.0  ;;  %v4527_v31 = vpop.eup %4526 }
 0xf90   :  { %v2893_v42 = vsel %vm187_vm2, %v4527_v31, 0.0 }
 0xf95   :  { %2898 = vrot.lane.b32.xlu1 %v5029_v6, %s5374_s25 }
 0xfad   :  { %2383 = vadd.xlane.f32.xlu0 %v2382_v2  ;;  %v3233_v35 = vpop.xlane.xlu1 %3232 }
 0xfae   :  { %v3234_v37 = vsub.f32 %v3230_v63, %v3233_v35 }
 0xfb0   :  { %v3235_v38 = vmul.f32 1.442695, %v3234_v37 }
 0xfb1   :  { %2726 = vadd.xlane.f32.xlu0 %v2725_v39  ;;  %v2388_v44 = vpop.permute.xlu1 %2387 }
 0xfb2   :  { %4528 = vpow2.f32 %v3235_v38 }
 0xfb5   :  { %3066 = vadd.xlane.f32.xlu0 %v3065_v41  ;;  %v2560_v45 = vpop.permute.xlu1 %2559 }
 0xfb9   :  { %2894 = vadd.xlane.f32.xlu1 %v2893_v42  ;;  %v2731_v47 = vpop.permute.xlu1 %2730  ;;  %v4005_v42 = vld [vmem:[%s5331_s7 + $0x1] ss:$0 sm:$0xff] }
 0xfbf   :  { %v5141_v43 = vpop.eup %4528 }
 0xfc0   :  { %v3237_v32 = vsel %vm187_vm2, %v5141_v43, 0.0 }
 0xfc1   :  { %3238 = vadd.xlane.f32.xlu0 %v3237_v32 }
 0xfca   :  { %3242 = vrot.lane.b32.xlu1 %v5029_v6, %s5373_s2 }
 0xfd7   :  { %3070 = vrot.lane.b32.xlu0 %v5029_v6, %s5372_s24 }
0x1001   :  { %v2044_v48 = vpop.xlane.xlu0 %2043 }
0x1002   :  { %4530 = vrcp.f32 %v2044_v48  ;;  %v2212_v49 = vpop.xlane.xlu1 %2211 }
0x1003   :  { %4532 = vrcp.f32 %v2212_v49 }
0x1005   :  { %v2216_v53 = vpop.permute.xlu0 %2215 }
0x100d   :  { %v2556_v54 = vpop.xlane.xlu1 %2555 }
0x100f   :  { %v4531_v50 = vpop.eup %4530 }
0x1010   :  { %v2046_v51 = vmul.f32 %v4531_v50, %v4515_v12  ;;  %v4533_v52 = vpop.eup %4532 }
0x1011   :  { %v2214_v6 = vmul.f32 %v4533_v52, %v5116_v13  ;;  %v2899_v56 = vpop.permute.xlu1 %2898 }
0x1012   :  { %4289 = vmatmul.mubr.msk.f32.vlgmr.msra.gmra.mxu0 %vm187_vm2, %v2046_v51 }
0x1013   :  { %4297 = vmatpush3.msra.mxu0 %v2216_v53  ;;  %4298 = vmatprep.mubr.msk.f32.mxu0 %vm4585_vm1, %v4584_v15 }
0x1014   :  { %4306 = vmatprep.subr.mxu0 %v4584_v15 }
0x1016   :  { %4299 = vmatmul.mubr.msk.f32.vlgmr.msra.gmra.mxu0 %vm187_vm2, %v2214_v6 }
0x1017   :  { %4307 = vmatpush3.msra.mxu0 %v2388_v44  ;;  %4308 = vmatprep.mubr.msk.f32.mxu0 %vm4585_vm1, %v4584_v15 }
0x1018   :  { %4316 = vmatprep.subr.mxu0 %v4584_v15 }
0x1036   :  { %v2384_v46 = vpop.xlane.xlu0 %2383 }
0x1037   :  { %4534 = vrcp.f32 %v2384_v46 }
0x1038   :  { %4536 = vrcp.f32 %v2556_v54 }
0x103a   :  { %v2727_v55 = vpop.xlane.xlu0 %2726 }
0x103b   :  { %4538 = vrcp.f32 %v2727_v55 }
0x103e   :  { %v3067_v57 = vpop.xlane.xlu0 %3066 }
0x1042   :  { %v2895_v58 = vpop.xlane.xlu1 %2894 }
0x1043   :  { %4540 = vrcp.f32 %v2895_v58 }
0x1044   :  { %v4535_v59 = vpop.eup %4534  ;;  %4542 = vrcp.f32 %v3067_v57 }
0x1045   :  { %v2386_v60 = vmul.f32 %v4535_v59, %v4521_v33  ;;  %v4537_v63 = vpop.eup %4536 }
0x1046   :  { %v2558_v0 = vmul.f32 %v4537_v63, %v5122_v19  ;;  %v3243_v10 = vpop.permute.xlu1 %3242 }
0x1047   :  { %4309 = vmatmul.mubr.msk.f32.vlgmr.msra.gmra.mxu0 %vm187_vm2, %v2386_v60  ;;  %v4453_v60 = vld [vmem:[%s5334_s10 + $0x10] sm:$0xff]  }
0x1048   :  { %4317 = vmatpush3.msra.mxu0 %v2560_v45  ;;  %4318 = vmatprep.mubr.msk.f32.mxu0 %vm4585_vm1, %v4584_v15  ;;  %v4539_v1 = vpop.eup %4538 }
0x1049   :  { %4326 = vmatprep.subr.mxu0 %v4584_v15  ;;  %v2729_v4 = vmul.f32 %v4539_v1, %v5132_v34 }
0x104a   :  { %v3239_v3 = vpop.xlane.xlu0 %3238 }
0x104b   :  { %4544 = vrcp.f32 %v3239_v3  ;;  %4319 = vmatmul.mubr.msk.f32.vlgmr.msra.gmra.mxu0 %vm187_vm2, %v2558_v0 }
0x104c   :  { %4327 = vmatpush3.msra.mxu0 %v2731_v47  ;;  %4328 = vmatprep.mubr.msk.f32.mxu0 %vm4585_vm1, %v4584_v15 }
0x104d   :  { %4336 = vmatprep.subr.mxu0 %v4584_v15 }
0x104e   :  { %v3071_v28 = vpop.permute.xlu0 %3070 }
0x104f   :  { %4329 = vmatmul.mubr.msk.f32.vlgmr.msra.gmra.mxu0 %vm187_vm2, %v2729_v4 }
0x1050   :  { %v4541_v5 = vpop.eup %4540  ;;  %4337 = vmatpush3.msra.mxu0 %v2899_v56  ;;  %4338 = vmatprep.mubr.msk.f32.mxu0 %vm4585_vm1, %v4584_v15 }
0x1051   :  { %4346 = vmatprep.subr.mxu0 %v4584_v15  ;;  %v2897_v7 = vmul.f32 %v4541_v5, %v4527_v31  ;;  %v4543_v8 = vpop.eup %4542 }
0x1052   :  { %v3069_v9 = vmul.f32 %v4543_v8, %v5136_v40 }
0x1053   :  { %4339 = vmatmul.mubr.msk.f32.vlgmr.msra.gmra.mxu0 %vm187_vm2, %v2897_v7 }
0x1054   :  { %4347 = vmatpush3.msra.mxu0 %v3071_v28  ;;  %4348 = vmatprep.mubr.msk.f32.mxu0 %vm4585_vm1, %v4584_v15  ;;  %v4011_v28 = vld [vmem:[%s5332_s8 + $0x1] ss:$0 sm:$0xff] }
0x1055   :  { %4356 = vmatprep.subr.mxu0 %v4584_v15 }
0x1057   :  { %4349 = vmatmul.mubr.msk.f32.vlgmr.msra.gmra.mxu0 %vm187_vm2, %v3069_v9 }
0x1058   :  { %v4545_v11 = vpop.eup %4544  ;;  %4357 = vmatpush3.msra.mxu0 %v3243_v10  ;;  %4358 = vmatprep.mubr.msk.f32.mxu0 %vm4585_vm1, %v4584_v15 }
0x1059   :  { %v3241_v12 = vmul.f32 %v4545_v11, %v5141_v43  ;;  %4369 = vmatprep.subr.bf16.mxu0 %v4584_v15 }
0x105b   :  { %4359 = vmatmul.mubr.msk.f32.vlgmr.msra.gmra.mxu0 %vm187_vm2, %v3241_v12  ;;  %v4012_v12 = vld [vmem:[%s5333_s9 + $0x1] ss:$0 sm:$0xff] }
0x105c   :  { %4373 = vmatprep.mubr.msk.bf16.mxu0 %vm4585_vm1, %v4584_v15 }
0x10d2   :  { %v2119_v13 = vpop.f32.mrf.mxu0 }
0x10d3   :  { %2123 = vst.msk [vmem:[#allocation2] sm:$0xff] %vm187_vm2, %v2119_v13 }
0x10d4   :  { %v4290_v14 = vpop.f32.mrf.mxu0 }
0x10d6   :  { %v2287_v16 = vpop.f32.mrf.mxu0 }
0x10d7   :  { %2292 = vrot.lane.b32.xlu0 %v2287_v16, %s5375_s3 }
0x10d8   :  { %v4300_v17 = vpop.f32.mrf.mxu0 }
0x1107   :  { %v2459_v18 = vpop.f32.mrf.mxu0 }
0x1108   :  { %2464 = vrot.lane.b32.xlu0 %v2459_v18, %s5376_s27  ;;  %v4454_v18 = vld [vmem:[%s5336_s12 + $0x38] sm:$0xff]  }
0x1109   :  { %v4310_v19 = vpop.f32.mrf.mxu0 }
0x110a   :  { %v4455_v19 = vld [vmem:[%s5336_s12 + $0x30] sm:$0xff]  }
0x110b   :  { %v2631_v36 = vpop.f32.mrf.mxu0 }
0x110c   :  { %2636 = vrot.lane.b32.xlu0 %v2631_v36, %s5377_s28  ;;  %v4456_v36 = vld [vmem:[%s5336_s12 + $0x28] sm:$0xff]  }
0x110d   :  { %v4320_v20 = vpop.f32.mrf.mxu0 }
0x110e   :  { %v4457_v20 = vld [vmem:[%s5336_s12 + $0x20] sm:$0xff]   ;;  %s4600_s12 = smov [#allocation3]  }
0x110f   :  { %v2802_v21 = vpop.f32.mrf.mxu0 }
0x1110   :  { %2806 = vst.msk [vmem:[#allocation2 + $0x8] sm:$0xff] %vm187_vm2, %v2802_v21  ;;  %v4018_v21 = vld [vmem:[%s5335_s11 + $0x1] ss:$0 sm:$0xff] }
0x1111   :  { %v4330_v23 = vpop.f32.mrf.mxu0 }
0x1113   :  { %v2970_v25 = vpop.f32.mrf.mxu0 }
0x1114   :  { %2975 = vrot.lane.b32.xlu1 %v2970_v25, %s5375_s3 }
0x1115   :  { %v4340_v26 = vpop.f32.mrf.mxu0 }
0x1117   :  { %v3142_v27 = vpop.f32.mrf.mxu0 }
0x1118   :  { %3147 = vrot.lane.b32.xlu1 %v3142_v27, %s5376_s27 }
0x1119   :  { %v4350_v29 = vpop.f32.mrf.mxu0 }
0x111b   :  { %v3314_v30 = vpop.f32.mrf.mxu0 }
0x111c   :  { %3319 = vrot.lane.b32.xlu1 %v3314_v30, %s5377_s28 }
0x111d   :  { %v4360_v33 = vpop.f32.mrf.mxu0 }
0x1149   :  { %v2293_v2 = vpop.permute.xlu0 %2292 }
0x114a   :  { %2295 = vst.msk [vmem:[#allocation2] sm:$0xff] %vm527_vm3, %v2293_v2 }
0x117a   :  { %v2465_v34 = vpop.permute.xlu0 %2464 }
0x117b   :  { %2467 = vst.msk [vmem:[#allocation2] sm:$0xff] %vm700_vm4, %v2465_v34 }
0x117e   :  { %v2637_v35 = vpop.permute.xlu0 %2636 }
0x117f   :  { %2639 = vst.msk [vmem:[#allocation2] sm:$0xff] %vm873_vm5, %v2637_v35 }
0x1186   :  { %v2976_v37 = vpop.permute.xlu1 %2975  ;;  %v3323_v40 = vld [vmem:[#allocation2] sm:$0xff] }
0x1187   :  { %2978 = vst.msk [vmem:[#allocation2 + $0x8] sm:$0xff] %vm527_vm3, %v2976_v37 }
0x118a   :  { %v3148_v38 = vpop.permute.xlu1 %3147 }
0x118b   :  { %3150 = vst.msk [vmem:[#allocation2 + $0x8] sm:$0xff] %vm700_vm4, %v3148_v38 }
0x118e   :  { %v3320_v39 = vpop.permute.xlu1 %3319 }
0x118f   :  { %3322 = vst.msk [vmem:[#allocation2 + $0x8] sm:$0xff] %vm873_vm5, %v3320_v39 }
0x1196   :  { %v3324_v41 = vld [vmem:[#allocation2 + $0x8] sm:$0xff] }
0x1197   :  { %v3332_v31 = vpack.c.bf16 %v3324_v41, %v3323_v40 }
0x1199   :  { %4366 = vmatmul.mubr.msk.bf16.vlgmr.msra.gmra.mxu1 %vm72_vm0, %v3332_v31  ;;  %v4031_v31 = vld [vmem:[%s5337_s13 + $0x1] ss:$0 sm:$0xff]  ;;  %s3911_s13 = sshll.u32 %s4600_s12, 4  ;;  %s3912_s13 = int_to_ptr.vmem [resolvable:$true] %s3911_s13 }
0x119a   :  { %4385 = vmatprep.mubr.msk.bf16.mxu1 %vm4585_vm1, %v4584_v15  ;;  %4378 = vmatpush3.bf16.msra.mxu1 %v4454_v18  ;;  %s4562_s22 = scalar_lea.vmem %s3912_s13, 32  ;;  %p4567_p1 = scmp.lt.s32.totalorder %s3912_s13, %s3912_s13 }
0x119b   :  { %4379 = vmatprep.subr.bf16.mxu1 %v4584_v15  ;;  %p4563_p0 = scmp.ne.s32.totalorder %s3912_s13, %s4562_s22  ;;  %p4568_p2 = scmp.lt.s32.totalorder %s4562_s22, %s4562_s22 }
0x119d   :  { %p4569_p3 = por %p4568_p2, %p4567_p1 }
0x119e   :  { %4380 = vmatpush3.bf16.msra.mxu1 %v4455_v19 }
0x119f   :  { %4381 = vmatprep.subr.bf16.mxu1 %v4584_v15  ;;  %p4570_p4 = pnand %p4569_p3, %p4563_p0 }
0x11a2   :  { %4382 = vmatpush3.bf16.msra.mxu1 %v4456_v36  ;;  %v4462_v36 = vld [vmem:[%s5342_s18 + $0x8] sm:$0xff]  }
0x11a3   :  { %4383 = vmatprep.subr.bf16.mxu1 %v4584_v15 }
0x11a6   :  { %4384 = vmatpush3.bf16.msra.mxu1 %v4457_v20  ;;  %v4463_v20 = vld [vmem:[%s5342_s18] sm:$0xff]  }
0x11a7   :  { %4405 = vmatprep.subr.bf16.mxu1 %v4584_v15 }
0x1259   :  { %v3388_v43 = vpop.f32.mrf.mxu1 }
0x125a   :  { %v3389_v32 = vadd.f32 %v4005_v42, %v3388_v43 }
0x125b   :  { %v4367_v44 = vpop.f32.mrf.mxu1 }
0x125c   :  { %v3395_v45 = vadd.f32 %v3389_v32, %v5003_v61 }
0x125d   :  { %v3391_v47 = vpop.f32.mrf.mxu1 }
0x125e   :  { %v3392_v48 = vadd.f32 %v4005_v42, %v3391_v47  ;;  %v3401_v49 = vsel %vm72_vm0, %v3395_v45, 0.0 }
0x125f   :  { %3402 = vadd.xlane.f32.xlu0 %v3401_v49  ;;  %v4368_v50 = vpop.f32.mrf.mxu1 }
0x1260   :  { %v3396_v51 = vadd.f32 %v3392_v48, %v5005_v62  ;;  %v4452_v62 = vld [vmem:[%s5334_s10 + $0x18] sm:$0xff]  }
0x1261   :  { %4370 = vmatpush3.bf16.msra.mxu0 %v4452_v62  ;;  %v4459_v62 = vld [vmem:[%s5340_s16] sm:$0xff]  }
0x1262   :  { %v3404_v52 = vsel %vm72_vm0, %v3396_v51, 0.0  ;;  %4371 = vmatprep.subr.bf16.mxu0 %v4584_v15 }
0x1263   :  { %3405 = vadd.xlane.f32.xlu1 %v3404_v52 }
0x1265   :  { %4372 = vmatpush3.bf16.msra.mxu0 %v4453_v60  ;;  %v4460_v60 = vld [vmem:[%s5340_s16 + $0x8] sm:$0xff]  }
0x1266   :  { %4389 = vmatprep.subr.bf16.mxu0 %v4584_v15 }
0x12e8   :  { %v3403_v53 = vpop.xlane.xlu0 %3402 }
0x12e9   :  { %v3407_v6 = vmul.f32 0.03125, %v3403_v53 }
0x12eb   :  { %v3409_v54 = vsub.f32 %v3395_v45, %v3407_v6 }
0x12ec   :  { %v3406_v46 = vpop.xlane.xlu1 %3405 }
0x12ed   :  { %v3408_v55 = vmul.f32 0.03125, %v3406_v46  ;;  %v3411_v56 = vmul.f32 %v3409_v54, %v3409_v54 }
0x12ef   :  { %v3410_v57 = vsub.f32 %v3396_v51, %v3408_v55  ;;  %v3413_v61 = vsel %vm72_vm0, %v3411_v56, 0.0 }
0x12f0   :  { %3414 = vadd.xlane.f32.xlu0 %v3413_v61 }
0x12f1   :  { %v3412_v58 = vmul.f32 %v3410_v57, %v3410_v57 }
0x12f3   :  { %v3416_v59 = vsel %vm72_vm0, %v3412_v58, 0.0 }
0x12f4   :  { %3417 = vadd.xlane.f32.xlu0 %v3416_v59  ;;  %v4458_v59 = vld [vmem:[%s5340_s16 + $0x8] sm:$0xff]  }
0x1379   :  { %v3415_v63 = vpop.xlane.xlu0 %3414 }
0x137a   :  { %v3419_v0 = vmul.f32 0.03125, %v3415_v63  ;;  %v4461_v63 = vld [vmem:[%s5340_s16] sm:$0xff]  }
0x137c   :  { %v3421_v1 = vadd.f32 1e-12, %v3419_v0 }
0x137d   :  { %v3418_v3 = vpop.xlane.xlu0 %3417 }
0x137e   :  { %4546 = vrsqrt.f32 %v3421_v1  ;;  %v3420_v4 = vmul.f32 0.03125, %v3418_v3 }
0x1380   :  { %v3422_v5 = vadd.f32 1e-12, %v3420_v4 }
0x1382   :  { %4548 = vrsqrt.f32 %v3422_v5 }
0x138b   :  { %v4547_v7 = vpop.eup %4546 }
0x138c   :  { %v3425_v8 = vmul.f32 %v4547_v7, %v3409_v54 }
0x138e   :  { %v3433_v11 = vmul.f32 %v4011_v28, %v3425_v8 }
0x138f   :  { %v4549_v9 = vpop.eup %4548 }
0x1390   :  { %v3426_v10 = vmul.f32 %v4549_v9, %v3410_v57  ;;  %v3441_v14 = vadd.f32 %v4012_v12, %v3433_v11 }
0x1392   :  { %v3434_v13 = vmul.f32 %v4011_v28, %v3426_v10  ;;  %v4039_v28 = vld [vmem:[%s5338_s14 + $0x1] ss:$0 sm:$0xff] }
0x1393   :  { %v4040_v10 = vld [vmem:[%s5339_s15 + $0x1] ss:$0 sm:$0xff] }
0x1394   :  { %v3442_v16 = vadd.f32 %v4012_v12, %v3434_v13 }
0x1396   :  { %v3450_v17 = vpack.c.bf16 %v3442_v16, %v3441_v14 }
0x1398   :  { %4374 = vmatmul.mubr.msk.bf16.vlgmr.msra.gmra.mxu0 %vm72_vm0, %v3450_v17 }
0x1399   :  { %4393 = vmatprep.mubr.msk.bf16.mxu0 %vm4585_vm1, %v4584_v15  ;;  %4390 = vmatpush3.bf16.msra.mxu0 %v4458_v59 }
0x139a   :  { %4391 = vmatprep.subr.bf16.mxu0 %v4584_v15 }
0x139d   :  { %4392 = vmatpush3.bf16.msra.mxu0 %v4459_v62 }
0x139e   :  { %4397 = vmatprep.subr.bf16.mxu0 %v4584_v15 }
0x1458   :  { %v3506_v22 = vpop.f32.mrf.mxu0 }
0x1459   :  { %v3507_v23 = vadd.f32 %v4018_v21, %v3506_v22 }
0x145a   :  { %v4375_v24 = vpop.f32.mrf.mxu0 }
0x145b   :  { %v3515_v25 = vmul.f32 0.70710677, %v3507_v23  ;;  %v3513_v35 = vmul.f32 0.5, %v3507_v23 }
0x145c   :  { %v3509_v26 = vpop.f32.mrf.mxu0 }
0x145d   :  { %4550 = verf.f32 %v3515_v25  ;;  %v3510_v27 = vadd.f32 %v4018_v21, %v3509_v26  ;;  %v3661_v21 = vld [vmem:[%s5341_s17] sm:$0x1] }
0x145e   :  { %v4376_v29 = vpop.f32.mrf.mxu0  ;;  %v3785_v25 = vld [vmem:[%s5341_s17] sm:$0x1] }
0x145f   :  { %v3516_v30 = vmul.f32 0.70710677, %v3510_v27  ;;  %v3514_v37 = vmul.f32 0.5, %v3510_v27 }
0x1461   :  { %4552 = verf.f32 %v3516_v30 }
0x146a   :  { %v4551_v33 = vpop.eup %4550 }
0x146b   :  { %v3519_v2 = vadd.f32 1.0, %v4551_v33 }
0x146d   :  { %v3521_v39 = vmul.f32 %v3519_v2, %v3513_v35 }
0x146e   :  { %v4553_v34 = vpop.eup %4552 }
0x146f   :  { %v3520_v38 = vadd.f32 1.0, %v4553_v34 }
0x1471   :  { %v3522_v40 = vmul.f32 %v3520_v38, %v3514_v37  ;;  %v4464_v37 = vld [vmem:[%s5342_s18 + $0x8] sm:$0xff]  }
0x1473   :  { %v3534_v41 = vpack.c.bf16 %v3522_v40, %v3521_v39  ;;  %v4465_v39 = vld [vmem:[%s5342_s18] sm:$0xff]  }
0x1475   :  { %4386 = vmatmul.mubr.msk.bf16.vlgmr.msra.gmra.mxu1 %vm1796_vm6, %v3534_v41 }
0x1476   :  { %4409 = vmatprep.mubr.msk.bf16.mxu1 %vm4585_vm1, %v4584_v15  ;;  %4406 = vmatpush3.bf16.msra.mxu1 %v4460_v60 }
0x1477   :  { %4407 = vmatprep.subr.bf16.mxu1 %v4584_v15 }
0x147a   :  { %4408 = vmatpush3.bf16.msra.mxu1 %v4461_v63 }
0x1535   :  { %v3602_v42 = vpop.f32.mrf.mxu1 }
0x1536   :  { %v3603_v43 = vadd.f32 %v4031_v31, %v3602_v42 }
0x1537   :  { %v4387_v32 = vpop.f32.mrf.mxu1 }
0x1538   :  { %v3609_v44 = vadd.f32 %v3603_v43, %v3441_v14 }
0x1539   :  { %v3605_v45 = vpop.f32.mrf.mxu1 }
0x153a   :  { %v3606_v47 = vadd.f32 %v4031_v31, %v3605_v45  ;;  %v3615_v48 = vsel %vm72_vm0, %v3609_v44, 0.0  ;;  %v3723_v31 = vld [vmem:[%s5343_s19] sm:$0x1] }
0x153b   :  { %3616 = vadd.xlane.f32.xlu0 %v3615_v48  ;;  %v4388_v49 = vpop.f32.mrf.mxu1 }
0x153c   :  { %v3610_v50 = vadd.f32 %v3606_v47, %v3442_v16  ;;  %v3847_v47 = vld [vmem:[%s5343_s19] sm:$0x1] }
0x153e   :  { %v3618_v51 = vsel %vm72_vm0, %v3610_v50, 0.0 }
0x153f   :  { %3619 = vadd.xlane.f32.xlu1 %v3618_v51 }
0x15c4   :  { %v3617_v52 = vpop.xlane.xlu0 %3616 }
0x15c5   :  { %v3621_v53 = vmul.f32 0.03125, %v3617_v52 }
0x15c7   :  { %v3623_v6 = vsub.f32 %v3609_v44, %v3621_v53 }
0x15c8   :  { %v3620_v54 = vpop.xlane.xlu1 %3619 }
0x15c9   :  { %v3622_v46 = vmul.f32 0.03125, %v3620_v54  ;;  %v3625_v55 = vmul.f32 %v3623_v6, %v3623_v6 }
0x15cb   :  { %v3624_v56 = vsub.f32 %v3610_v50, %v3622_v46  ;;  %v3627_v57 = vsel %vm72_vm0, %v3625_v55, 0.0 }
0x15cc   :  { %3628 = vadd.xlane.f32.xlu0 %v3627_v57 }
0x15cd   :  { %v3626_v61 = vmul.f32 %v3624_v56, %v3624_v56 }
0x15cf   :  { %v3630_v58 = vsel %vm72_vm0, %v3626_v61, 0.0 }
0x15d0   :  { %3631 = vadd.xlane.f32.xlu1 %v3630_v58 }
0x1655   :  { %v3629_v0 = vpop.xlane.xlu0 %3628 }
0x1656   :  { %v3633_v1 = vmul.f32 0.03125, %v3629_v0 }
0x1658   :  { %v3635_v3 = vadd.f32 1e-12, %v3633_v1 }
0x1659   :  { %v3632_v4 = vpop.xlane.xlu1 %3631 }
0x165a   :  { %4554 = vrsqrt.f32 %v3635_v3  ;;  %v3634_v5 = vmul.f32 0.03125, %v3632_v4 }
0x165c   :  { %v3636_v7 = vadd.f32 1e-12, %v3634_v5 }
0x165e   :  { %4556 = vrsqrt.f32 %v3636_v7 }
0x1667   :  { %v4555_v8 = vpop.eup %4554 }
0x1668   :  { %v3639_v9 = vmul.f32 %v4555_v8, %v3623_v6 }
0x166a   :  { %v3647_v11 = vmul.f32 %v4039_v28, %v3639_v9 }
0x166b   :  { %v4557_v12 = vpop.eup %4556 }
0x166c   :  { %v3640_v13 = vmul.f32 %v4557_v12, %v3624_v56  ;;  %v3655_v14 = vadd.f32 %v4040_v10, %v3647_v11 }
0x166e   :  { %v3662_v16 = vpack.c.bf16 %v3655_v14, %v3655_v14  ;;  %v3648_v17 = vmul.f32 %v4039_v28, %v3640_v13 }
0x1670   :  { %4394 = vmatmul.mubr.msk.bf16.vlgmr.msra.gmra.mxu0 %vm72_vm0, %v3662_v16  ;;  %v3656_v18 = vadd.f32 %v4040_v10, %v3648_v17 }
0x1671   :  { %4401 = vmatprep.mubr.msk.bf16.mxu0 %vm4585_vm1, %v4584_v15  ;;  %4398 = vmatpush3.bf16.msra.mxu0 %v4462_v36 }
0x1672   :  { %v3786_v19 = vpack.c.bf16 %v3656_v18, %v3656_v18  ;;  %4399 = vmatprep.subr.bf16.mxu0 %v4584_v15 }
0x1674   :  { %4410 = vmatmul.mubr.msk.bf16.vlgmr.msra.gmra.mxu1 %vm72_vm0, %v3786_v19 }
0x1675   :  { %4400 = vmatpush3.bf16.msra.mxu0 %v4463_v20 }
0x1676   :  { %4413 = vmatprep.subr.bf16.mxu0 %v4584_v15 }
0x1730   :  { %v3712_v22 = vpop.f32.mrf.mxu0 }
0x1731   :  { %v3713_v23 = vadd.f32 %v3712_v22, %v3661_v21 }
0x1732   :  { %v4395_v24 = vpop.f32.mrf.mxu0 }
0x1733   :  { %4558 = vtanh.f32 %v3713_v23 }
0x1734   :  { %v3715_v26 = vpop.f32.mrf.mxu0  ;;  %v3836_v27 = vpop.f32.mrf.mxu1 }
0x1735   :  { %v3837_v29 = vadd.f32 %v3836_v27, %v3785_v25 }
0x1736   :  { %v4396_v30 = vpop.f32.mrf.mxu0  ;;  %v4411_v33 = vpop.f32.mrf.mxu1 }
0x1737   :  { %4560 = vtanh.f32 %v3837_v29 }
0x1738   :  { %v3839_v2 = vpop.f32.mrf.mxu1 }
0x173a   :  { %v4412_v34 = vpop.f32.mrf.mxu1 }
0x1740   :  { %v4559_v35 = vpop.eup %4558 }
0x1741   :  { %v3724_v38 = vpack.c.bf16 %v4559_v35, %v4559_v35 }
0x1743   :  { %4402 = vmatmul.mubr.msk.bf16.vlgmr.msra.gmra.mxu0 %vm72_vm0, %v3724_v38 }
0x1744   :  { %4414 = vmatpush3.bf16.msra.mxu0 %v4464_v37  ;;  %4417 = vmatprep.mubr.msk.bf16.mxu0 %vm4585_vm1, %v4584_v15  ;;  %v4561_v40 = vpop.eup %4560 }
0x1745   :  { %4415 = vmatprep.subr.bf16.mxu0 %v4584_v15  ;;  %v3848_v41 = vpack.c.bf16 %v4561_v40, %v4561_v40 }
0x1748   :  { %4416 = vmatpush3.bf16.msra.mxu0 %v4465_v39 }
0x174b   :  { %4418 = vmatmul.mubr.msk.bf16.vlgmr.msra.gmra.mxu0 %vm72_vm0, %v3848_v41 }
0x1803   :  { %v3774_v42 = vpop.f32.mrf.mxu0 }
0x1804   :  { %v3775_v43 = vadd.f32 %v3774_v42, %v3723_v31 }
0x1805   :  { %v4403_v32 = vpop.f32.mrf.mxu0 }
0x1806   :  { %3780 = vst [vmem:[#allocation3] sm:$0x1] %v3775_v43 }
0x1807   :  { %v3777_v44 = vpop.f32.mrf.mxu0 }
0x1809   :  { %v4404_v45 = vpop.f32.mrf.mxu0 }
0x180b   :  { %v3898_v15 = vpop.f32.mrf.mxu0 }
0x180c   :  { %v3899_v48 = vadd.f32 %v3898_v15, %v3847_v47 }
0x180d   :  { %v4419_v49 = vpop.f32.mrf.mxu0 }
0x180e   :  { %3904 = vst [vmem:[#allocation3 + $0x1] sm:$0x1] %v3899_v48 }
0x180f   :  { %v3901_v50 = vpop.f32.mrf.mxu0 }
0x1810   :  { %4573 = shalt.err (!%p4570_p4)
}
0x1811   :  { %3914 = dma.vmem_to_hbm [thread:$0]  %s3912_s13, 32, %s5344_s20, [#allocation4]   ;;  %v4420_v51 = vpop.f32.mrf.mxu0 }
0x1812   :  { %4582 = dma.done.wait [#allocation4], 32  }
0x1813   :  { %4583 = vsyncadd [#allocation4], 4294967264 }
0x1814   :  { %3918 = vsyncpa [#allocation4], 1 }

</bundles_post_ra>
